<compile_context>
chip_gen: v7x
topology: tpu7x:2x2x1
jax: 0.10.0
libtpu: 0.0.40
codegen_flags: <defaults>
</compile_context>

<pallas_src>
import math

import jax
import jax.numpy as jnp
from jax import lax
from jax.experimental import pallas as pl
from jax.experimental.pallas import tpu as pltpu


# ----------------------------------------------------------------------------
# Fused whole-model kernel factory.
# Refs layout (positional):
#   x_ref (T*Bp, D),
#   [w_ih_wide (2, d_in, 8H), w_hh_comb (2H, 8H), b_comb (1, 8H)] * n_layers,
#   bn_ref (4, 1, 2H) = [gamma, beta, running_mean, running_var],
#   lin_w_ref (2H, Opad), lin_b_ref (1, Opad),
#   out_ref (Bp, Opad),
#   act_ref (T*Bp, 2H)   (VMEM scratch: fwd lanes 0:H, bwd lanes H:2H).
#
# Combined gate lane layout (width 8H): [i_f i_b | f_f f_b | g_f g_b | o_f o_b].
# ----------------------------------------------------------------------------
def _make_model_kernel(n_layers, T, Bp, H, eps=1e-5):
    f32 = jnp.float32
    H2 = 2 * H

    def kernel(*refs):
        x_ref = refs[0]
        layer_refs = refs[1:1 + 3 * n_layers]
        bn_ref = refs[1 + 3 * n_layers]
        lw_ref = refs[2 + 3 * n_layers]
        lb_ref = refs[3 + 3 * n_layers]
        out_ref = refs[4 + 3 * n_layers]
        act_ref = refs[5 + 3 * n_layers]

        for layer in range(n_layers):
            wihw_ref, whhc_ref, bc_ref = layer_refs[3 * layer:3 * layer + 3]
            is_last = layer == n_layers - 1

            # ---- hoisted input projection: one matmul per direction over all T ----
            # (wide interleaved weights; off the serial chain).  Bias folded once
            # into the forward-direction projection (it covers all 8H lanes).
            xin = x_ref[...] if layer == 0 else act_ref[...]
            gf_pre = jnp.dot(xin, wihw_ref[0], preferred_element_type=f32) + bc_ref[...]
            gb_pre = jnp.dot(xin, wihw_ref[1], preferred_element_type=f32)

            whh = whhc_ref[...]                       # (2H, 8H) block-diag, interleaved
            h = jnp.zeros((Bp, H2), f32)              # [h_f | h_b]
            c = jnp.zeros((Bp, H2), f32)              # [c_f | c_b]

            # ---- fused fwd/bwd recurrence, fully unrolled (T is static) ----
            for s in range(T):
                tf, tb = s, T - 1 - s
                gates = (jnp.dot(h, whh, preferred_element_type=f32)
                         + gf_pre[tf * Bp:(tf + 1) * Bp, :]
                         + gb_pre[tb * Bp:(tb + 1) * Bp, :])     # (Bp, 8H)
                sig = jax.nn.sigmoid(gates)                       # full-row (i,f,o used)
                g_g = jnp.tanh(gates[:, 2 * H2:3 * H2])           # tanh only on g slice
                c = sig[:, H2:2 * H2] * c + sig[:, 0:H2] * g_g
                h = sig[:, 3 * H2:4 * H2] * jnp.tanh(c)
                # store activations for the next layer; last layer only keeps the
                # two final-time pieces (which land in row block T-1).
                if (not is_last) or tf == T - 1:
                    act_ref[tf * Bp:(tf + 1) * Bp, 0:H] = h[:, 0:H]
                if (not is_last) or tb == T - 1:
                    act_ref[tb * Bp:(tb + 1) * Bp, H:H2] = h[:, H:H2]
            # TODO(synk): nn.LSTM inter-layer dropout is train-only; eval forward omits it.

        # ---- head: ReLU -> BatchNorm1d (eval, running stats) -> Linear -> LogSoftmax ----
        z = act_ref[(T - 1) * Bp:T * Bp, :]                       # (Bp, 2H) = [z_f | z_b]
        z = jnp.maximum(z, 0.0)
        gamma, beta, mean, var = bn_ref[0], bn_ref[1], bn_ref[2], bn_ref[3]
        zn = (z - mean) * lax.rsqrt(var + eps) * gamma + beta
        logits = jnp.dot(zn, lw_ref[...], preferred_element_type=f32) + lb_ref[...]
        m = jnp.max(logits, axis=-1, keepdims=True)
        lse = m + jnp.log(jnp.sum(jnp.exp(logits - m), axis=-1, keepdims=True))
        out_ref[...] = logits - lse

    return kernel


# ----------------------------------------------------------------------------
# Host-facing forward pass: one pallas_call for the whole model.
# x is (B, T, input_size), batch_first like the PyTorch module.
# ----------------------------------------------------------------------------
@jax.jit
def sequence_classifier_forward(x, params):
    B, T, D = x.shape
    lstm = params["lstm"]
    n_layers = len(lstm)
    H = lstm[0]["w_hh"].shape[1]
    O = params["linear"]["w"].shape[1]
    Opad = ((O + 127) // 128) * 128

    # Pad batch to the 8-sublane tile so all in-kernel slices/stores are aligned.
    # TODO(synk): at large B/T, deliver time-major tiles via a gridded BlockSpec
    # instead of this wrapper-side transpose/pad/reshape copy.
    Bp = ((B + 7) // 8) * 8
    x_tm = jnp.transpose(x, (1, 0, 2)).astype(jnp.float32)          # (T, B, D)
    if Bp != B:
        x_tm = jnp.pad(x_tm, ((0, 0), (0, Bp - B), (0, 0)))
    x_flat = x_tm.reshape(T * Bp, D)                                 # time-major rows

    # ---- rearrange natural PyTorch-style weights into the interleaved layout ----
    def widen(w, d):
        # w: (d_in, 4H) natural gate columns [i|f|g|o] for direction d.
        # -> (d_in, 8H) with gate g occupying cols [2Hg, 2H(g+1)), direction d half.
        d_in = w.shape[0]
        wr = w.reshape(d_in, 4, H)
        z = jnp.zeros_like(wr)
        parts = (wr, z) if d == 0 else (z, wr)
        return jnp.stack(parts, axis=2).reshape(d_in, 8 * H)

    args = [x_flat]
    for lp in lstm:
        w_ih, w_hh, b = lp["w_ih"], lp["w_hh"], lp["b"]
        wih_wide = jnp.stack([widen(w_ih[0], 0), widen(w_ih[1], 1)], axis=0)      # (2, d_in, 8H)
        whh_comb = jnp.concatenate([widen(w_hh[0], 0), widen(w_hh[1], 1)], axis=0)  # (2H, 8H)
        b_comb = jnp.stack([b[0].reshape(4, H), b[1].reshape(4, H)],
                           axis=1).reshape(1, 8 * H)                               # (1, 8H)
        args += [wih_wide, whh_comb, b_comb]

    lw_pad = jnp.pad(params["linear"]["w"], ((0, 0), (0, Opad - O)))
    lb_pad = jnp.pad(params["linear"]["b"], ((0, 0), (0, Opad - O)),
                     constant_values=-1e30)
    args += [params["bn"], lw_pad, lb_pad]

    vmem = pl.BlockSpec(memory_space=pltpu.MemorySpace.VMEM)
    out = pl.pallas_call(
        _make_model_kernel(n_layers, T, Bp, H),
        out_shape=jax.ShapeDtypeStruct((Bp, Opad), jnp.float32),
        in_specs=[vmem] * len(args),
        out_specs=vmem,
        scratch_shapes=[
            pltpu.VMEM((T * Bp, 2 * H), jnp.float32),   # merged fwd|bwd activations
        ],
        compiler_params=pltpu.CompilerParams(vmem_limit_bytes=32 * 1024 * 1024),
    )(*args)
    return out[:B, :O]


# ----------------------------------------------------------------------------
# Deterministic parameter construction (matches nn.LSTM / nn.Linear shapes).
# Weights kept transposed ((d_in, 4H) / (H, 4H)) and stacked over direction.
# ----------------------------------------------------------------------------
def init_params(key, input_size, hidden_size, output_size, n_layers):
    k = 1.0 / math.sqrt(hidden_size)

    def uni(key, shape, lim):
        return jax.random.uniform(key, shape, jnp.float32, minval=-lim, maxval=lim)

    layers = []
    for layer in range(n_layers):
        d_in = input_size if layer == 0 else 2 * hidden_size
        key, k1, k2, k3, k4 = jax.random.split(key, 5)
        layers.append({
            "w_ih": uni(k1, (2, d_in, 4 * hidden_size), k),           # [fwd, bwd]
            "w_hh": uni(k2, (2, hidden_size, 4 * hidden_size), k),
            "b": (uni(k3, (2, 1, 4 * hidden_size), k)
                  + uni(k4, (2, 1, 4 * hidden_size), k)),             # b_ih + b_hh
        })

    feat = 2 * hidden_size
    bn = jnp.stack([
        jnp.ones((1, feat)),   # gamma
        jnp.zeros((1, feat)),  # beta
        jnp.zeros((1, feat)),  # running_mean
        jnp.ones((1, feat)),   # running_var
    ]).astype(jnp.float32)

    kl = 1.0 / math.sqrt(feat)
    key, k1, k2 = jax.random.split(key, 3)
    return {
        "lstm": layers,
        "bn": bn,
        "linear": {"w": uni(k1, (feat, output_size), kl),
                   "b": uni(k2, (1, output_size), kl)},
    }


# ----------------------------------------------------------------------------
# Pure-JAX reference (same math, lax.scan LSTM) for a correctness cross-check.
# ----------------------------------------------------------------------------
def _reference_forward(x, params):
    B, T, D = x.shape
    H = params["lstm"][0]["w_hh"].shape[1]
    h_seq = jnp.transpose(x, (1, 0, 2)).astype(jnp.float32)          # (T, B, D)
    for lp in params["lstm"]:
        outs = []
        for d, rev in ((0, False), (1, True)):
            w_ih, w_hh, b = lp["w_ih"][d], lp["w_hh"][d], lp["b"][d]
            xs = h_seq[::-1] if rev else h_seq

            def step(carry, x_t, w_ih=w_ih, w_hh=w_hh, b=b):
                h, c = carry
                g = x_t @ w_ih + h @ w_hh + b
                i = jax.nn.sigmoid(g[:, 0 * H:1 * H])
                f = jax.nn.sigmoid(g[:, 1 * H:2 * H])
                gg = jnp.tanh(g[:, 2 * H:3 * H])
                o = jax.nn.sigmoid(g[:, 3 * H:4 * H])
                c = f * c + i * gg
                h = o * jnp.tanh(c)
                return (h, c), h

            init = (jnp.zeros((B, H), jnp.float32), jnp.zeros((B, H), jnp.float32))
            _, hs = lax.scan(step, init, xs)
            outs.append(hs[::-1] if rev else hs)
        h_seq = jnp.concatenate(outs, axis=-1)
    z = jnp.maximum(h_seq[-1], 0.0)
    bn = params["bn"]
    z = (z - bn[2]) * lax.rsqrt(bn[3] + 1e-5) * bn[0] + bn[1]
    logits = z @ params["linear"]["w"] + params["linear"]["b"]
    return jax.nn.log_softmax(logits, axis=-1)


if __name__ == "__main__":
    batch, seq, input_size, hidden_size, output_size, n_layers = 2, 8, 16, 32, 10, 4

    key = jax.random.PRNGKey(0)
    key, kx, kp = jax.random.split(key, 3)
    x = jax.random.normal(kx, (batch, seq, input_size), jnp.float32)
    params = init_params(kp, input_size, hidden_size, output_size, n_layers)

    y = sequence_classifier_forward(x, params)
    jax.block_until_ready(y)

    assert y.shape == (batch, output_size)
    # log-softmax rows must (log-)sum to ~0
    assert jnp.allclose(jnp.sum(jnp.exp(y), axis=-1), 1.0, atol=1e-4)
    # cross-check against the pure-JAX reference
    y_ref = _reference_forward(x, params)
    assert jnp.allclose(y, y_ref, atol=1e-3, rtol=1e-3)
    print("KERNEL_OK")
</pallas_src>

<mosaic_0001>
module attributes {stable_mosaic.version = 11 : i64} {
  func.func @kernel(%arg0: memref<64x16xf32, #tpu.memory_space<vmem>>, %arg1: memref<2x16x256xf32, #tpu.memory_space<vmem>>, %arg2: memref<64x256xf32, #tpu.memory_space<vmem>>, %arg3: memref<1x256xf32, #tpu.memory_space<vmem>>, %arg4: memref<2x64x256xf32, #tpu.memory_space<vmem>>, %arg5: memref<64x256xf32, #tpu.memory_space<vmem>>, %arg6: memref<1x256xf32, #tpu.memory_space<vmem>>, %arg7: memref<2x64x256xf32, #tpu.memory_space<vmem>>, %arg8: memref<64x256xf32, #tpu.memory_space<vmem>>, %arg9: memref<1x256xf32, #tpu.memory_space<vmem>>, %arg10: memref<2x64x256xf32, #tpu.memory_space<vmem>>, %arg11: memref<64x256xf32, #tpu.memory_space<vmem>>, %arg12: memref<1x256xf32, #tpu.memory_space<vmem>>, %arg13: memref<4x1x64xf32, #tpu.memory_space<vmem>>, %arg14: memref<64x128xf32, #tpu.memory_space<vmem>>, %arg15: memref<1x128xf32, #tpu.memory_space<vmem>>, %arg16: memref<8x128xf32, #tpu.memory_space<vmem>>, %arg17: memref<64x64xf32, #tpu.memory_space<vmem>>) attributes {dimension_semantics = [], scalar_prefetch = 0 : i64, scratch_operands = 1 : i64, tpu.core_type = #tpu.core_type<tc>} {
    %c0 = arith.constant 0 : index
    %c0_0 = arith.constant 0 : index
    %0 = vector.load %arg0[%c0, %c0_0] : memref<64x16xf32, #tpu.memory_space<vmem>>, vector<64x16xf32>
    %c0_1 = arith.constant 0 : index
    %c0_2 = arith.constant 0 : index
    %c0_3 = arith.constant 0 : index
    %1 = vector.load %arg1[%c0_1, %c0_2, %c0_3] : memref<2x16x256xf32, #tpu.memory_space<vmem>>, vector<1x16x256xf32>
    %2 = vector.shape_cast %1 : vector<1x16x256xf32> to vector<16x256xf32>
    %cst = arith.constant dense<0.000000e+00> : vector<64x256xf32>
    %3 = tpu.matmul %0, %2, %cst {dimension_numbers = #tpu.dot_dimension_numbers<[1], [0], [0], [1], [0, 0, 1, 1], [], []>} : vector<64x16xf32>, vector<16x256xf32>, vector<64x256xf32> -> vector<64x256xf32>
    %c0_4 = arith.constant 0 : index
    %c0_5 = arith.constant 0 : index
    %4 = vector.load %arg3[%c0_4, %c0_5] : memref<1x256xf32, #tpu.memory_space<vmem>>, vector<1x256xf32>
    %5 = vector.broadcast %4 : vector<1x256xf32> to vector<64x256xf32>
    %6 = arith.addf %3, %5 : vector<64x256xf32>
    %c1 = arith.constant 1 : index
    %c0_6 = arith.constant 0 : index
    %c0_7 = arith.constant 0 : index
    %7 = vector.load %arg1[%c1, %c0_6, %c0_7] : memref<2x16x256xf32, #tpu.memory_space<vmem>>, vector<1x16x256xf32>
    %8 = vector.shape_cast %7 : vector<1x16x256xf32> to vector<16x256xf32>
    %cst_8 = arith.constant dense<0.000000e+00> : vector<64x256xf32>
    %9 = tpu.matmul %0, %8, %cst_8 {dimension_numbers = #tpu.dot_dimension_numbers<[1], [0], [0], [1], [0, 0, 1, 1], [], []>} : vector<64x16xf32>, vector<16x256xf32>, vector<64x256xf32> -> vector<64x256xf32>
    %c0_9 = arith.constant 0 : index
    %c0_10 = arith.constant 0 : index
    %10 = vector.load %arg2[%c0_9, %c0_10] : memref<64x256xf32, #tpu.memory_space<vmem>>, vector<64x256xf32>
    %cst_11 = arith.constant 0.000000e+00 : f32
    %11 = vector.broadcast %cst_11 : f32 to vector<8x64xf32>
    %cst_12 = arith.constant 0.000000e+00 : f32
    %12 = vector.broadcast %cst_12 : f32 to vector<8x64xf32>
    %cst_13 = arith.constant dense<0.000000e+00> : vector<8x256xf32>
    %13 = tpu.matmul %11, %10, %cst_13 {dimension_numbers = #tpu.dot_dimension_numbers<[1], [0], [0], [1], [0, 0, 1, 1], [], []>} : vector<8x64xf32>, vector<64x256xf32>, vector<8x256xf32> -> vector<8x256xf32>
    %14 = vector.extract_strided_slice %6 {offsets = [0, 0], sizes = [8, 256], strides = [1, 1]} : vector<64x256xf32> to vector<8x256xf32>
    %15 = arith.addf %13, %14 : vector<8x256xf32>
    %16 = vector.extract_strided_slice %9 {offsets = [56, 0], sizes = [8, 256], strides = [1, 1]} : vector<64x256xf32> to vector<8x256xf32>
    %17 = arith.addf %15, %16 : vector<8x256xf32>
    %18 = arith.negf %17 : vector<8x256xf32>
    %19 = math.exp %18 : vector<8x256xf32>
    %cst_14 = arith.constant 1.000000e+00 : f32
    %20 = vector.broadcast %cst_14 : f32 to vector<8x256xf32>
    %21 = arith.addf %20, %19 : vector<8x256xf32>
    %22 = arith.divf %20, %21 : vector<8x256xf32>
    %23 = vector.extract_strided_slice %17 {offsets = [0, 128], sizes = [8, 64], strides = [1, 1]} : vector<8x256xf32> to vector<8x64xf32>
    %24 = math.tanh %23 : vector<8x64xf32>
    %25 = vector.extract_strided_slice %22 {offsets = [0, 64], sizes = [8, 64], strides = [1, 1]} : vector<8x256xf32> to vector<8x64xf32>
    %26 = arith.mulf %25, %12 : vector<8x64xf32>
    %27 = vector.extract_strided_slice %22 {offsets = [0, 0], sizes = [8, 64], strides = [1, 1]} : vector<8x256xf32> to vector<8x64xf32>
    %28 = arith.mulf %27, %24 : vector<8x64xf32>
    %29 = arith.addf %26, %28 : vector<8x64xf32>
    %30 = vector.extract_strided_slice %22 {offsets = [0, 192], sizes = [8, 64], strides = [1, 1]} : vector<8x256xf32> to vector<8x64xf32>
    %31 = math.tanh %29 : vector<8x64xf32>
    %32 = arith.mulf %30, %31 : vector<8x64xf32>
    %33 = vector.extract_strided_slice %32 {offsets = [0, 0], sizes = [8, 32], strides = [1, 1]} : vector<8x64xf32> to vector<8x32xf32>
    %c0_15 = arith.constant 0 : index
    %c0_16 = arith.constant 0 : index
    %34 = vector.load %arg17[%c0_15, %c0_16] : memref<64x64xf32, #tpu.memory_space<vmem>>, vector<8x32xf32>
    tpu.vector_store %arg17[%c0_15, %c0_16], %33 {strides = array<i32>} : memref<64x64xf32, #tpu.memory_space<vmem>>, vector<8x32xf32>,
    %35 = vector.extract_strided_slice %32 {offsets = [0, 32], sizes = [8, 32], strides = [1, 1]} : vector<8x64xf32> to vector<8x32xf32>
    %c56 = arith.constant 56 : index
    %c32 = arith.constant 32 : index
    %36 = vector.load %arg17[%c56, %c32] : memref<64x64xf32, #tpu.memory_space<vmem>>, vector<8x32xf32>
    tpu.vector_store %arg17[%c56, %c32], %35 {strides = array<i32>} : memref<64x64xf32, #tpu.memory_space<vmem>>, vector<8x32xf32>,
    %cst_17 = arith.constant dense<0.000000e+00> : vector<8x256xf32>
    %37 = tpu.matmul %32, %10, %cst_17 {dimension_numbers = #tpu.dot_dimension_numbers<[1], [0], [0], [1], [0, 0, 1, 1], [], []>} : vector<8x64xf32>, vector<64x256xf32>, vector<8x256xf32> -> vector<8x256xf32>
    %38 = vector.extract_strided_slice %6 {offsets = [8, 0], sizes = [8, 256], strides = [1, 1]} : vector<64x256xf32> to vector<8x256xf32>
    %39 = arith.addf %37, %38 : vector<8x256xf32>
    %40 = vector.extract_strided_slice %9 {offsets = [48, 0], sizes = [8, 256], strides = [1, 1]} : vector<64x256xf32> to vector<8x256xf32>
    %41 = arith.addf %39, %40 : vector<8x256xf32>
    %42 = arith.negf %41 : vector<8x256xf32>
    %43 = math.exp %42 : vector<8x256xf32>
    %cst_18 = arith.constant 1.000000e+00 : f32
    %44 = vector.broadcast %cst_18 : f32 to vector<8x256xf32>
    %45 = arith.addf %44, %43 : vector<8x256xf32>
    %46 = arith.divf %44, %45 : vector<8x256xf32>
    %47 = vector.extract_strided_slice %41 {offsets = [0, 128], sizes = [8, 64], strides = [1, 1]} : vector<8x256xf32> to vector<8x64xf32>
    %48 = math.tanh %47 : vector<8x64xf32>
    %49 = vector.extract_strided_slice %46 {offsets = [0, 64], sizes = [8, 64], strides = [1, 1]} : vector<8x256xf32> to vector<8x64xf32>
    %50 = arith.mulf %49, %29 : vector<8x64xf32>
    %51 = vector.extract_strided_slice %46 {offsets = [0, 0], sizes = [8, 64], strides = [1, 1]} : vector<8x256xf32> to vector<8x64xf32>
    %52 = arith.mulf %51, %48 : vector<8x64xf32>
    %53 = arith.addf %50, %52 : vector<8x64xf32>
    %54 = vector.extract_strided_slice %46 {offsets = [0, 192], sizes = [8, 64], strides = [1, 1]} : vector<8x256xf32> to vector<8x64xf32>
    %55 = math.tanh %53 : vector<8x64xf32>
    %56 = arith.mulf %54, %55 : vector<8x64xf32>
    %57 = vector.extract_strided_slice %56 {offsets = [0, 0], sizes = [8, 32], strides = [1, 1]} : vector<8x64xf32> to vector<8x32xf32>
    %c8 = arith.constant 8 : index
    %c0_19 = arith.constant 0 : index
    %58 = vector.load %arg17[%c8, %c0_19] : memref<64x64xf32, #tpu.memory_space<vmem>>, vector<8x32xf32>
    tpu.vector_store %arg17[%c8, %c0_19], %57 {strides = array<i32>} : memref<64x64xf32, #tpu.memory_space<vmem>>, vector<8x32xf32>,
    %59 = vector.extract_strided_slice %56 {offsets = [0, 32], sizes = [8, 32], strides = [1, 1]} : vector<8x64xf32> to vector<8x32xf32>
    %c48 = arith.constant 48 : index
    %c32_20 = arith.constant 32 : index
    %60 = vector.load %arg17[%c48, %c32_20] : memref<64x64xf32, #tpu.memory_space<vmem>>, vector<8x32xf32>
    tpu.vector_store %arg17[%c48, %c32_20], %59 {strides = array<i32>} : memref<64x64xf32, #tpu.memory_space<vmem>>, vector<8x32xf32>,
    %cst_21 = arith.constant dense<0.000000e+00> : vector<8x256xf32>
    %61 = tpu.matmul %56, %10, %cst_21 {dimension_numbers = #tpu.dot_dimension_numbers<[1], [0], [0], [1], [0, 0, 1, 1], [], []>} : vector<8x64xf32>, vector<64x256xf32>, vector<8x256xf32> -> vector<8x256xf32>
    %62 = vector.extract_strided_slice %6 {offsets = [16, 0], sizes = [8, 256], strides = [1, 1]} : vector<64x256xf32> to vector<8x256xf32>
    %63 = arith.addf %61, %62 : vector<8x256xf32>
    %64 = vector.extract_strided_slice %9 {offsets = [40, 0], sizes = [8, 256], strides = [1, 1]} : vector<64x256xf32> to vector<8x256xf32>
    %65 = arith.addf %63, %64 : vector<8x256xf32>
    %66 = arith.negf %65 : vector<8x256xf32>
    %67 = math.exp %66 : vector<8x256xf32>
    %cst_22 = arith.constant 1.000000e+00 : f32
    %68 = vector.broadcast %cst_22 : f32 to vector<8x256xf32>
    %69 = arith.addf %68, %67 : vector<8x256xf32>
    %70 = arith.divf %68, %69 : vector<8x256xf32>
    %71 = vector.extract_strided_slice %65 {offsets = [0, 128], sizes = [8, 64], strides = [1, 1]} : vector<8x256xf32> to vector<8x64xf32>
    %72 = math.tanh %71 : vector<8x64xf32>
    %73 = vector.extract_strided_slice %70 {offsets = [0, 64], sizes = [8, 64], strides = [1, 1]} : vector<8x256xf32> to vector<8x64xf32>
    %74 = arith.mulf %73, %53 : vector<8x64xf32>
    %75 = vector.extract_strided_slice %70 {offsets = [0, 0], sizes = [8, 64], strides = [1, 1]} : vector<8x256xf32> to vector<8x64xf32>
    %76 = arith.mulf %75, %72 : vector<8x64xf32>
    %77 = arith.addf %74, %76 : vector<8x64xf32>
    %78 = vector.extract_strided_slice %70 {offsets = [0, 192], sizes = [8, 64], strides = [1, 1]} : vector<8x256xf32> to vector<8x64xf32>
    %79 = math.tanh %77 : vector<8x64xf32>
    %80 = arith.mulf %78, %79 : vector<8x64xf32>
    %81 = vector.extract_strided_slice %80 {offsets = [0, 0], sizes = [8, 32], strides = [1, 1]} : vector<8x64xf32> to vector<8x32xf32>
    %c16 = arith.constant 16 : index
    %c0_23 = arith.constant 0 : index
    %82 = vector.load %arg17[%c16, %c0_23] : memref<64x64xf32, #tpu.memory_space<vmem>>, vector<8x32xf32>
    tpu.vector_store %arg17[%c16, %c0_23], %81 {strides = array<i32>} : memref<64x64xf32, #tpu.memory_space<vmem>>, vector<8x32xf32>,
    %83 = vector.extract_strided_slice %80 {offsets = [0, 32], sizes = [8, 32], strides = [1, 1]} : vector<8x64xf32> to vector<8x32xf32>
    %c40 = arith.constant 40 : index
    %c32_24 = arith.constant 32 : index
    %84 = vector.load %arg17[%c40, %c32_24] : memref<64x64xf32, #tpu.memory_space<vmem>>, vector<8x32xf32>
    tpu.vector_store %arg17[%c40, %c32_24], %83 {strides = array<i32>} : memref<64x64xf32, #tpu.memory_space<vmem>>, vector<8x32xf32>,
    %cst_25 = arith.constant dense<0.000000e+00> : vector<8x256xf32>
    %85 = tpu.matmul %80, %10, %cst_25 {dimension_numbers = #tpu.dot_dimension_numbers<[1], [0], [0], [1], [0, 0, 1, 1], [], []>} : vector<8x64xf32>, vector<64x256xf32>, vector<8x256xf32> -> vector<8x256xf32>
    %86 = vector.extract_strided_slice %6 {offsets = [24, 0], sizes = [8, 256], strides = [1, 1]} : vector<64x256xf32> to vector<8x256xf32>
    %87 = arith.addf %85, %86 : vector<8x256xf32>
    %88 = vector.extract_strided_slice %9 {offsets = [32, 0], sizes = [8, 256], strides = [1, 1]} : vector<64x256xf32> to vector<8x256xf32>
    %89 = arith.addf %87, %88 : vector<8x256xf32>
    %90 = arith.negf %89 : vector<8x256xf32>
    %91 = math.exp %90 : vector<8x256xf32>
    %cst_26 = arith.constant 1.000000e+00 : f32
    %92 = vector.broadcast %cst_26 : f32 to vector<8x256xf32>
    %93 = arith.addf %92, %91 : vector<8x256xf32>
    %94 = arith.divf %92, %93 : vector<8x256xf32>
    %95 = vector.extract_strided_slice %89 {offsets = [0, 128], sizes = [8, 64], strides = [1, 1]} : vector<8x256xf32> to vector<8x64xf32>
    %96 = math.tanh %95 : vector<8x64xf32>
    %97 = vector.extract_strided_slice %94 {offsets = [0, 64], sizes = [8, 64], strides = [1, 1]} : vector<8x256xf32> to vector<8x64xf32>
    %98 = arith.mulf %97, %77 : vector<8x64xf32>
    %99 = vector.extract_strided_slice %94 {offsets = [0, 0], sizes = [8, 64], strides = [1, 1]} : vector<8x256xf32> to vector<8x64xf32>
    %100 = arith.mulf %99, %96 : vector<8x64xf32>
    %101 = arith.addf %98, %100 : vector<8x64xf32>
    %102 = vector.extract_strided_slice %94 {offsets = [0, 192], sizes = [8, 64], strides = [1, 1]} : vector<8x256xf32> to vector<8x64xf32>
    %103 = math.tanh %101 : vector<8x64xf32>
    %104 = arith.mulf %102, %103 : vector<8x64xf32>
    %105 = vector.extract_strided_slice %104 {offsets = [0, 0], sizes = [8, 32], strides = [1, 1]} : vector<8x64xf32> to vector<8x32xf32>
    %c24 = arith.constant 24 : index
    %c0_27 = arith.constant 0 : index
    %106 = vector.load %arg17[%c24, %c0_27] : memref<64x64xf32, #tpu.memory_space<vmem>>, vector<8x32xf32>
    tpu.vector_store %arg17[%c24, %c0_27], %105 {strides = array<i32>} : memref<64x64xf32, #tpu.memory_space<vmem>>, vector<8x32xf32>,
    %107 = vector.extract_strided_slice %104 {offsets = [0, 32], sizes = [8, 32], strides = [1, 1]} : vector<8x64xf32> to vector<8x32xf32>
    %c32_28 = arith.constant 32 : index
    %c32_29 = arith.constant 32 : index
    %108 = vector.load %arg17[%c32_28, %c32_29] : memref<64x64xf32, #tpu.memory_space<vmem>>, vector<8x32xf32>
    tpu.vector_store %arg17[%c32_28, %c32_29], %107 {strides = array<i32>} : memref<64x64xf32, #tpu.memory_space<vmem>>, vector<8x32xf32>,
    %cst_30 = arith.constant dense<0.000000e+00> : vector<8x256xf32>
    %109 = tpu.matmul %104, %10, %cst_30 {dimension_numbers = #tpu.dot_dimension_numbers<[1], [0], [0], [1], [0, 0, 1, 1], [], []>} : vector<8x64xf32>, vector<64x256xf32>, vector<8x256xf32> -> vector<8x256xf32>
    %110 = vector.extract_strided_slice %6 {offsets = [32, 0], sizes = [8, 256], strides = [1, 1]} : vector<64x256xf32> to vector<8x256xf32>
    %111 = arith.addf %109, %110 : vector<8x256xf32>
    %112 = vector.extract_strided_slice %9 {offsets = [24, 0], sizes = [8, 256], strides = [1, 1]} : vector<64x256xf32> to vector<8x256xf32>
    %113 = arith.addf %111, %112 : vector<8x256xf32>
    %114 = arith.negf %113 : vector<8x256xf32>
    %115 = math.exp %114 : vector<8x256xf32>
    %cst_31 = arith.constant 1.000000e+00 : f32
    %116 = vector.broadcast %cst_31 : f32 to vector<8x256xf32>
    %117 = arith.addf %116, %115 : vector<8x256xf32>
    %118 = arith.divf %116, %117 : vector<8x256xf32>
    %119 = vector.extract_strided_slice %113 {offsets = [0, 128], sizes = [8, 64], strides = [1, 1]} : vector<8x256xf32> to vector<8x64xf32>
    %120 = math.tanh %119 : vector<8x64xf32>
    %121 = vector.extract_strided_slice %118 {offsets = [0, 64], sizes = [8, 64], strides = [1, 1]} : vector<8x256xf32> to vector<8x64xf32>
    %122 = arith.mulf %121, %101 : vector<8x64xf32>
    %123 = vector.extract_strided_slice %118 {offsets = [0, 0], sizes = [8, 64], strides = [1, 1]} : vector<8x256xf32> to vector<8x64xf32>
    %124 = arith.mulf %123, %120 : vector<8x64xf32>
    %125 = arith.addf %122, %124 : vector<8x64xf32>
    %126 = vector.extract_strided_slice %118 {offsets = [0, 192], sizes = [8, 64], strides = [1, 1]} : vector<8x256xf32> to vector<8x64xf32>
    %127 = math.tanh %125 : vector<8x64xf32>
    %128 = arith.mulf %126, %127 : vector<8x64xf32>
    %129 = vector.extract_strided_slice %128 {offsets = [0, 0], sizes = [8, 32], strides = [1, 1]} : vector<8x64xf32> to vector<8x32xf32>
    %c32_32 = arith.constant 32 : index
    %c0_33 = arith.constant 0 : index
    %130 = vector.load %arg17[%c32_32, %c0_33] : memref<64x64xf32, #tpu.memory_space<vmem>>, vector<8x32xf32>
    tpu.vector_store %arg17[%c32_32, %c0_33], %129 {strides = array<i32>} : memref<64x64xf32, #tpu.memory_space<vmem>>, vector<8x32xf32>,
    %131 = vector.extract_strided_slice %128 {offsets = [0, 32], sizes = [8, 32], strides = [1, 1]} : vector<8x64xf32> to vector<8x32xf32>
    %c24_34 = arith.constant 24 : index
    %c32_35 = arith.constant 32 : index
    %132 = vector.load %arg17[%c24_34, %c32_35] : memref<64x64xf32, #tpu.memory_space<vmem>>, vector<8x32xf32>
    tpu.vector_store %arg17[%c24_34, %c32_35], %131 {strides = array<i32>} : memref<64x64xf32, #tpu.memory_space<vmem>>, vector<8x32xf32>,
    %cst_36 = arith.constant dense<0.000000e+00> : vector<8x256xf32>
    %133 = tpu.matmul %128, %10, %cst_36 {dimension_numbers = #tpu.dot_dimension_numbers<[1], [0], [0], [1], [0, 0, 1, 1], [], []>} : vector<8x64xf32>, vector<64x256xf32>, vector<8x256xf32> -> vector<8x256xf32>
    %134 = vector.extract_strided_slice %6 {offsets = [40, 0], sizes = [8, 256], strides = [1, 1]} : vector<64x256xf32> to vector<8x256xf32>
    %135 = arith.addf %133, %134 : vector<8x256xf32>
    %136 = vector.extract_strided_slice %9 {offsets = [16, 0], sizes = [8, 256], strides = [1, 1]} : vector<64x256xf32> to vector<8x256xf32>
    %137 = arith.addf %135, %136 : vector<8x256xf32>
    %138 = arith.negf %137 : vector<8x256xf32>
    %139 = math.exp %138 : vector<8x256xf32>
    %cst_37 = arith.constant 1.000000e+00 : f32
    %140 = vector.broadcast %cst_37 : f32 to vector<8x256xf32>
    %141 = arith.addf %140, %139 : vector<8x256xf32>
    %142 = arith.divf %140, %141 : vector<8x256xf32>
    %143 = vector.extract_strided_slice %137 {offsets = [0, 128], sizes = [8, 64], strides = [1, 1]} : vector<8x256xf32> to vector<8x64xf32>
    %144 = math.tanh %143 : vector<8x64xf32>
    %145 = vector.extract_strided_slice %142 {offsets = [0, 64], sizes = [8, 64], strides = [1, 1]} : vector<8x256xf32> to vector<8x64xf32>
    %146 = arith.mulf %145, %125 : vector<8x64xf32>
    %147 = vector.extract_strided_slice %142 {offsets = [0, 0], sizes = [8, 64], strides = [1, 1]} : vector<8x256xf32> to vector<8x64xf32>
    %148 = arith.mulf %147, %144 : vector<8x64xf32>
    %149 = arith.addf %146, %148 : vector<8x64xf32>
    %150 = vector.extract_strided_slice %142 {offsets = [0, 192], sizes = [8, 64], strides = [1, 1]} : vector<8x256xf32> to vector<8x64xf32>
    %151 = math.tanh %149 : vector<8x64xf32>
    %152 = arith.mulf %150, %151 : vector<8x64xf32>
    %153 = vector.extract_strided_slice %152 {offsets = [0, 0], sizes = [8, 32], strides = [1, 1]} : vector<8x64xf32> to vector<8x32xf32>
    %c40_38 = arith.constant 40 : index
    %c0_39 = arith.constant 0 : index
    %154 = vector.load %arg17[%c40_38, %c0_39] : memref<64x64xf32, #tpu.memory_space<vmem>>, vector<8x32xf32>
    tpu.vector_store %arg17[%c40_38, %c0_39], %153 {strides = array<i32>} : memref<64x64xf32, #tpu.memory_space<vmem>>, vector<8x32xf32>,
    %155 = vector.extract_strided_slice %152 {offsets = [0, 32], sizes = [8, 32], strides = [1, 1]} : vector<8x64xf32> to vector<8x32xf32>
    %c16_40 = arith.constant 16 : index
    %c32_41 = arith.constant 32 : index
    %156 = vector.load %arg17[%c16_40, %c32_41] : memref<64x64xf32, #tpu.memory_space<vmem>>, vector<8x32xf32>
    tpu.vector_store %arg17[%c16_40, %c32_41], %155 {strides = array<i32>} : memref<64x64xf32, #tpu.memory_space<vmem>>, vector<8x32xf32>,
    %cst_42 = arith.constant dense<0.000000e+00> : vector<8x256xf32>
    %157 = tpu.matmul %152, %10, %cst_42 {dimension_numbers = #tpu.dot_dimension_numbers<[1], [0], [0], [1], [0, 0, 1, 1], [], []>} : vector<8x64xf32>, vector<64x256xf32>, vector<8x256xf32> -> vector<8x256xf32>
    %158 = vector.extract_strided_slice %6 {offsets = [48, 0], sizes = [8, 256], strides = [1, 1]} : vector<64x256xf32> to vector<8x256xf32>
    %159 = arith.addf %157, %158 : vector<8x256xf32>
    %160 = vector.extract_strided_slice %9 {offsets = [8, 0], sizes = [8, 256], strides = [1, 1]} : vector<64x256xf32> to vector<8x256xf32>
    %161 = arith.addf %159, %160 : vector<8x256xf32>
    %162 = arith.negf %161 : vector<8x256xf32>
    %163 = math.exp %162 : vector<8x256xf32>
    %cst_43 = arith.constant 1.000000e+00 : f32
    %164 = vector.broadcast %cst_43 : f32 to vector<8x256xf32>
    %165 = arith.addf %164, %163 : vector<8x256xf32>
    %166 = arith.divf %164, %165 : vector<8x256xf32>
    %167 = vector.extract_strided_slice %161 {offsets = [0, 128], sizes = [8, 64], strides = [1, 1]} : vector<8x256xf32> to vector<8x64xf32>
    %168 = math.tanh %167 : vector<8x64xf32>
    %169 = vector.extract_strided_slice %166 {offsets = [0, 64], sizes = [8, 64], strides = [1, 1]} : vector<8x256xf32> to vector<8x64xf32>
    %170 = arith.mulf %169, %149 : vector<8x64xf32>
    %171 = vector.extract_strided_slice %166 {offsets = [0, 0], sizes = [8, 64], strides = [1, 1]} : vector<8x256xf32> to vector<8x64xf32>
    %172 = arith.mulf %171, %168 : vector<8x64xf32>
    %173 = arith.addf %170, %172 : vector<8x64xf32>
    %174 = vector.extract_strided_slice %166 {offsets = [0, 192], sizes = [8, 64], strides = [1, 1]} : vector<8x256xf32> to vector<8x64xf32>
    %175 = math.tanh %173 : vector<8x64xf32>
    %176 = arith.mulf %174, %175 : vector<8x64xf32>
    %177 = vector.extract_strided_slice %176 {offsets = [0, 0], sizes = [8, 32], strides = [1, 1]} : vector<8x64xf32> to vector<8x32xf32>
    %c48_44 = arith.constant 48 : index
    %c0_45 = arith.constant 0 : index
    %178 = vector.load %arg17[%c48_44, %c0_45] : memref<64x64xf32, #tpu.memory_space<vmem>>, vector<8x32xf32>
    tpu.vector_store %arg17[%c48_44, %c0_45], %177 {strides = array<i32>} : memref<64x64xf32, #tpu.memory_space<vmem>>, vector<8x32xf32>,
    %179 = vector.extract_strided_slice %176 {offsets = [0, 32], sizes = [8, 32], strides = [1, 1]} : vector<8x64xf32> to vector<8x32xf32>
    %c8_46 = arith.constant 8 : index
    %c32_47 = arith.constant 32 : index
    %180 = vector.load %arg17[%c8_46, %c32_47] : memref<64x64xf32, #tpu.memory_space<vmem>>, vector<8x32xf32>
    tpu.vector_store %arg17[%c8_46, %c32_47], %179 {strides = array<i32>} : memref<64x64xf32, #tpu.memory_space<vmem>>, vector<8x32xf32>,
    %cst_48 = arith.constant dense<0.000000e+00> : vector<8x256xf32>
    %181 = tpu.matmul %176, %10, %cst_48 {dimension_numbers = #tpu.dot_dimension_numbers<[1], [0], [0], [1], [0, 0, 1, 1], [], []>} : vector<8x64xf32>, vector<64x256xf32>, vector<8x256xf32> -> vector<8x256xf32>
    %182 = vector.extract_strided_slice %6 {offsets = [56, 0], sizes = [8, 256], strides = [1, 1]} : vector<64x256xf32> to vector<8x256xf32>
    %183 = arith.addf %181, %182 : vector<8x256xf32>
    %184 = vector.extract_strided_slice %9 {offsets = [0, 0], sizes = [8, 256], strides = [1, 1]} : vector<64x256xf32> to vector<8x256xf32>
    %185 = arith.addf %183, %184 : vector<8x256xf32>
    %186 = arith.negf %185 : vector<8x256xf32>
    %187 = math.exp %186 : vector<8x256xf32>
    %cst_49 = arith.constant 1.000000e+00 : f32
    %188 = vector.broadcast %cst_49 : f32 to vector<8x256xf32>
    %189 = arith.addf %188, %187 : vector<8x256xf32>
    %190 = arith.divf %188, %189 : vector<8x256xf32>
    %191 = vector.extract_strided_slice %185 {offsets = [0, 128], sizes = [8, 64], strides = [1, 1]} : vector<8x256xf32> to vector<8x64xf32>
    %192 = math.tanh %191 : vector<8x64xf32>
    %193 = vector.extract_strided_slice %190 {offsets = [0, 64], sizes = [8, 64], strides = [1, 1]} : vector<8x256xf32> to vector<8x64xf32>
    %194 = arith.mulf %193, %173 : vector<8x64xf32>
    %195 = vector.extract_strided_slice %190 {offsets = [0, 0], sizes = [8, 64], strides = [1, 1]} : vector<8x256xf32> to vector<8x64xf32>
    %196 = arith.mulf %195, %192 : vector<8x64xf32>
    %197 = arith.addf %194, %196 : vector<8x64xf32>
    %198 = vector.extract_strided_slice %190 {offsets = [0, 192], sizes = [8, 64], strides = [1, 1]} : vector<8x256xf32> to vector<8x64xf32>
    %199 = math.tanh %197 : vector<8x64xf32>
    %200 = arith.mulf %198, %199 : vector<8x64xf32>
    %201 = vector.extract_strided_slice %200 {offsets = [0, 0], sizes = [8, 32], strides = [1, 1]} : vector<8x64xf32> to vector<8x32xf32>
    %c56_50 = arith.constant 56 : index
    %c0_51 = arith.constant 0 : index
    %202 = vector.load %arg17[%c56_50, %c0_51] : memref<64x64xf32, #tpu.memory_space<vmem>>, vector<8x32xf32>
    tpu.vector_store %arg17[%c56_50, %c0_51], %201 {strides = array<i32>} : memref<64x64xf32, #tpu.memory_space<vmem>>, vector<8x32xf32>,
    %203 = vector.extract_strided_slice %200 {offsets = [0, 32], sizes = [8, 32], strides = [1, 1]} : vector<8x64xf32> to vector<8x32xf32>
    %c0_52 = arith.constant 0 : index
    %c32_53 = arith.constant 32 : index
    %204 = vector.load %arg17[%c0_52, %c32_53] : memref<64x64xf32, #tpu.memory_space<vmem>>, vector<8x32xf32>
    tpu.vector_store %arg17[%c0_52, %c32_53], %203 {strides = array<i32>} : memref<64x64xf32, #tpu.memory_space<vmem>>, vector<8x32xf32>,
    %c0_54 = arith.constant 0 : index
    %c0_55 = arith.constant 0 : index
    %205 = vector.load %arg17[%c0_54, %c0_55] : memref<64x64xf32, #tpu.memory_space<vmem>>, vector<64x64xf32>
    %c0_56 = arith.constant 0 : index
    %c0_57 = arith.constant 0 : index
    %c0_58 = arith.constant 0 : index
    %206 = vector.load %arg4[%c0_56, %c0_57, %c0_58] : memref<2x64x256xf32, #tpu.memory_space<vmem>>, vector<1x64x256xf32>
    %207 = vector.shape_cast %206 : vector<1x64x256xf32> to vector<64x256xf32>
    %cst_59 = arith.constant dense<0.000000e+00> : vector<64x256xf32>
    %208 = tpu.matmul %205, %207, %cst_59 {dimension_numbers = #tpu.dot_dimension_numbers<[1], [0], [0], [1], [0, 0, 1, 1], [], []>} : vector<64x64xf32>, vector<64x256xf32>, vector<64x256xf32> -> vector<64x256xf32>
    %c0_60 = arith.constant 0 : index
    %c0_61 = arith.constant 0 : index
    %209 = vector.load %arg6[%c0_60, %c0_61] : memref<1x256xf32, #tpu.memory_space<vmem>>, vector<1x256xf32>
    %210 = vector.broadcast %209 : vector<1x256xf32> to vector<64x256xf32>
    %211 = arith.addf %208, %210 : vector<64x256xf32>
    %c1_62 = arith.constant 1 : index
    %c0_63 = arith.constant 0 : index
    %c0_64 = arith.constant 0 : index
    %212 = vector.load %arg4[%c1_62, %c0_63, %c0_64] : memref<2x64x256xf32, #tpu.memory_space<vmem>>, vector<1x64x256xf32>
    %213 = vector.shape_cast %212 : vector<1x64x256xf32> to vector<64x256xf32>
    %cst_65 = arith.constant dense<0.000000e+00> : vector<64x256xf32>
    %214 = tpu.matmul %205, %213, %cst_65 {dimension_numbers = #tpu.dot_dimension_numbers<[1], [0], [0], [1], [0, 0, 1, 1], [], []>} : vector<64x64xf32>, vector<64x256xf32>, vector<64x256xf32> -> vector<64x256xf32>
    %c0_66 = arith.constant 0 : index
    %c0_67 = arith.constant 0 : index
    %215 = vector.load %arg5[%c0_66, %c0_67] : memref<64x256xf32, #tpu.memory_space<vmem>>, vector<64x256xf32>
    %cst_68 = arith.constant 0.000000e+00 : f32
    %216 = vector.broadcast %cst_68 : f32 to vector<8x64xf32>
    %cst_69 = arith.constant 0.000000e+00 : f32
    %217 = vector.broadcast %cst_69 : f32 to vector<8x64xf32>
    %cst_70 = arith.constant dense<0.000000e+00> : vector<8x256xf32>
    %218 = tpu.matmul %216, %215, %cst_70 {dimension_numbers = #tpu.dot_dimension_numbers<[1], [0], [0], [1], [0, 0, 1, 1], [], []>} : vector<8x64xf32>, vector<64x256xf32>, vector<8x256xf32> -> vector<8x256xf32>
    %219 = vector.extract_strided_slice %211 {offsets = [0, 0], sizes = [8, 256], strides = [1, 1]} : vector<64x256xf32> to vector<8x256xf32>
    %220 = arith.addf %218, %219 : vector<8x256xf32>
    %221 = vector.extract_strided_slice %214 {offsets = [56, 0], sizes = [8, 256], strides = [1, 1]} : vector<64x256xf32> to vector<8x256xf32>
    %222 = arith.addf %220, %221 : vector<8x256xf32>
    %223 = arith.negf %222 : vector<8x256xf32>
    %224 = math.exp %223 : vector<8x256xf32>
    %cst_71 = arith.constant 1.000000e+00 : f32
    %225 = vector.broadcast %cst_71 : f32 to vector<8x256xf32>
    %226 = arith.addf %225, %224 : vector<8x256xf32>
    %227 = arith.divf %225, %226 : vector<8x256xf32>
    %228 = vector.extract_strided_slice %222 {offsets = [0, 128], sizes = [8, 64], strides = [1, 1]} : vector<8x256xf32> to vector<8x64xf32>
    %229 = math.tanh %228 : vector<8x64xf32>
    %230 = vector.extract_strided_slice %227 {offsets = [0, 64], sizes = [8, 64], strides = [1, 1]} : vector<8x256xf32> to vector<8x64xf32>
    %231 = arith.mulf %230, %217 : vector<8x64xf32>
    %232 = vector.extract_strided_slice %227 {offsets = [0, 0], sizes = [8, 64], strides = [1, 1]} : vector<8x256xf32> to vector<8x64xf32>
    %233 = arith.mulf %232, %229 : vector<8x64xf32>
    %234 = arith.addf %231, %233 : vector<8x64xf32>
    %235 = vector.extract_strided_slice %227 {offsets = [0, 192], sizes = [8, 64], strides = [1, 1]} : vector<8x256xf32> to vector<8x64xf32>
    %236 = math.tanh %234 : vector<8x64xf32>
    %237 = arith.mulf %235, %236 : vector<8x64xf32>
    %238 = vector.extract_strided_slice %237 {offsets = [0, 0], sizes = [8, 32], strides = [1, 1]} : vector<8x64xf32> to vector<8x32xf32>
    %c0_72 = arith.constant 0 : index
    %c0_73 = arith.constant 0 : index
    %239 = vector.load %arg17[%c0_72, %c0_73] : memref<64x64xf32, #tpu.memory_space<vmem>>, vector<8x32xf32>
    tpu.vector_store %arg17[%c0_72, %c0_73], %238 {strides = array<i32>} : memref<64x64xf32, #tpu.memory_space<vmem>>, vector<8x32xf32>,
    %240 = vector.extract_strided_slice %237 {offsets = [0, 32], sizes = [8, 32], strides = [1, 1]} : vector<8x64xf32> to vector<8x32xf32>
    %c56_74 = arith.constant 56 : index
    %c32_75 = arith.constant 32 : index
    %241 = vector.load %arg17[%c56_74, %c32_75] : memref<64x64xf32, #tpu.memory_space<vmem>>, vector<8x32xf32>
    tpu.vector_store %arg17[%c56_74, %c32_75], %240 {strides = array<i32>} : memref<64x64xf32, #tpu.memory_space<vmem>>, vector<8x32xf32>,
    %cst_76 = arith.constant dense<0.000000e+00> : vector<8x256xf32>
    %242 = tpu.matmul %237, %215, %cst_76 {dimension_numbers = #tpu.dot_dimension_numbers<[1], [0], [0], [1], [0, 0, 1, 1], [], []>} : vector<8x64xf32>, vector<64x256xf32>, vector<8x256xf32> -> vector<8x256xf32>
    %243 = vector.extract_strided_slice %211 {offsets = [8, 0], sizes = [8, 256], strides = [1, 1]} : vector<64x256xf32> to vector<8x256xf32>
    %244 = arith.addf %242, %243 : vector<8x256xf32>
    %245 = vector.extract_strided_slice %214 {offsets = [48, 0], sizes = [8, 256], strides = [1, 1]} : vector<64x256xf32> to vector<8x256xf32>
    %246 = arith.addf %244, %245 : vector<8x256xf32>
    %247 = arith.negf %246 : vector<8x256xf32>
    %248 = math.exp %247 : vector<8x256xf32>
    %cst_77 = arith.constant 1.000000e+00 : f32
    %249 = vector.broadcast %cst_77 : f32 to vector<8x256xf32>
    %250 = arith.addf %249, %248 : vector<8x256xf32>
    %251 = arith.divf %249, %250 : vector<8x256xf32>
    %252 = vector.extract_strided_slice %246 {offsets = [0, 128], sizes = [8, 64], strides = [1, 1]} : vector<8x256xf32> to vector<8x64xf32>
    %253 = math.tanh %252 : vector<8x64xf32>
    %254 = vector.extract_strided_slice %251 {offsets = [0, 64], sizes = [8, 64], strides = [1, 1]} : vector<8x256xf32> to vector<8x64xf32>
    %255 = arith.mulf %254, %234 : vector<8x64xf32>
    %256 = vector.extract_strided_slice %251 {offsets = [0, 0], sizes = [8, 64], strides = [1, 1]} : vector<8x256xf32> to vector<8x64xf32>
    %257 = arith.mulf %256, %253 : vector<8x64xf32>
    %258 = arith.addf %255, %257 : vector<8x64xf32>
    %259 = vector.extract_strided_slice %251 {offsets = [0, 192], sizes = [8, 64], strides = [1, 1]} : vector<8x256xf32> to vector<8x64xf32>
    %260 = math.tanh %258 : vector<8x64xf32>
    %261 = arith.mulf %259, %260 : vector<8x64xf32>
    %262 = vector.extract_strided_slice %261 {offsets = [0, 0], sizes = [8, 32], strides = [1, 1]} : vector<8x64xf32> to vector<8x32xf32>
    %c8_78 = arith.constant 8 : index
    %c0_79 = arith.constant 0 : index
    %263 = vector.load %arg17[%c8_78, %c0_79] : memref<64x64xf32, #tpu.memory_space<vmem>>, vector<8x32xf32>
    tpu.vector_store %arg17[%c8_78, %c0_79], %262 {strides = array<i32>} : memref<64x64xf32, #tpu.memory_space<vmem>>, vector<8x32xf32>,
    %264 = vector.extract_strided_slice %261 {offsets = [0, 32], sizes = [8, 32], strides = [1, 1]} : vector<8x64xf32> to vector<8x32xf32>
    %c48_80 = arith.constant 48 : index
    %c32_81 = arith.constant 32 : index
    %265 = vector.load %arg17[%c48_80, %c32_81] : memref<64x64xf32, #tpu.memory_space<vmem>>, vector<8x32xf32>
    tpu.vector_store %arg17[%c48_80, %c32_81], %264 {strides = array<i32>} : memref<64x64xf32, #tpu.memory_space<vmem>>, vector<8x32xf32>,
    %cst_82 = arith.constant dense<0.000000e+00> : vector<8x256xf32>
    %266 = tpu.matmul %261, %215, %cst_82 {dimension_numbers = #tpu.dot_dimension_numbers<[1], [0], [0], [1], [0, 0, 1, 1], [], []>} : vector<8x64xf32>, vector<64x256xf32>, vector<8x256xf32> -> vector<8x256xf32>
    %267 = vector.extract_strided_slice %211 {offsets = [16, 0], sizes = [8, 256], strides = [1, 1]} : vector<64x256xf32> to vector<8x256xf32>
    %268 = arith.addf %266, %267 : vector<8x256xf32>
    %269 = vector.extract_strided_slice %214 {offsets = [40, 0], sizes = [8, 256], strides = [1, 1]} : vector<64x256xf32> to vector<8x256xf32>
    %270 = arith.addf %268, %269 : vector<8x256xf32>
    %271 = arith.negf %270 : vector<8x256xf32>
    %272 = math.exp %271 : vector<8x256xf32>
    %cst_83 = arith.constant 1.000000e+00 : f32
    %273 = vector.broadcast %cst_83 : f32 to vector<8x256xf32>
    %274 = arith.addf %273, %272 : vector<8x256xf32>
    %275 = arith.divf %273, %274 : vector<8x256xf32>
    %276 = vector.extract_strided_slice %270 {offsets = [0, 128], sizes = [8, 64], strides = [1, 1]} : vector<8x256xf32> to vector<8x64xf32>
    %277 = math.tanh %276 : vector<8x64xf32>
    %278 = vector.extract_strided_slice %275 {offsets = [0, 64], sizes = [8, 64], strides = [1, 1]} : vector<8x256xf32> to vector<8x64xf32>
    %279 = arith.mulf %278, %258 : vector<8x64xf32>
    %280 = vector.extract_strided_slice %275 {offsets = [0, 0], sizes = [8, 64], strides = [1, 1]} : vector<8x256xf32> to vector<8x64xf32>
    %281 = arith.mulf %280, %277 : vector<8x64xf32>
    %282 = arith.addf %279, %281 : vector<8x64xf32>
    %283 = vector.extract_strided_slice %275 {offsets = [0, 192], sizes = [8, 64], strides = [1, 1]} : vector<8x256xf32> to vector<8x64xf32>
    %284 = math.tanh %282 : vector<8x64xf32>
    %285 = arith.mulf %283, %284 : vector<8x64xf32>
    %286 = vector.extract_strided_slice %285 {offsets = [0, 0], sizes = [8, 32], strides = [1, 1]} : vector<8x64xf32> to vector<8x32xf32>
    %c16_84 = arith.constant 16 : index
    %c0_85 = arith.constant 0 : index
    %287 = vector.load %arg17[%c16_84, %c0_85] : memref<64x64xf32, #tpu.memory_space<vmem>>, vector<8x32xf32>
    tpu.vector_store %arg17[%c16_84, %c0_85], %286 {strides = array<i32>} : memref<64x64xf32, #tpu.memory_space<vmem>>, vector<8x32xf32>,
    %288 = vector.extract_strided_slice %285 {offsets = [0, 32], sizes = [8, 32], strides = [1, 1]} : vector<8x64xf32> to vector<8x32xf32>
    %c40_86 = arith.constant 40 : index
    %c32_87 = arith.constant 32 : index
    %289 = vector.load %arg17[%c40_86, %c32_87] : memref<64x64xf32, #tpu.memory_space<vmem>>, vector<8x32xf32>
    tpu.vector_store %arg17[%c40_86, %c32_87], %288 {strides = array<i32>} : memref<64x64xf32, #tpu.memory_space<vmem>>, vector<8x32xf32>,
    %cst_88 = arith.constant dense<0.000000e+00> : vector<8x256xf32>
    %290 = tpu.matmul %285, %215, %cst_88 {dimension_numbers = #tpu.dot_dimension_numbers<[1], [0], [0], [1], [0, 0, 1, 1], [], []>} : vector<8x64xf32>, vector<64x256xf32>, vector<8x256xf32> -> vector<8x256xf32>
    %291 = vector.extract_strided_slice %211 {offsets = [24, 0], sizes = [8, 256], strides = [1, 1]} : vector<64x256xf32> to vector<8x256xf32>
    %292 = arith.addf %290, %291 : vector<8x256xf32>
    %293 = vector.extract_strided_slice %214 {offsets = [32, 0], sizes = [8, 256], strides = [1, 1]} : vector<64x256xf32> to vector<8x256xf32>
    %294 = arith.addf %292, %293 : vector<8x256xf32>
    %295 = arith.negf %294 : vector<8x256xf32>
    %296 = math.exp %295 : vector<8x256xf32>
    %cst_89 = arith.constant 1.000000e+00 : f32
    %297 = vector.broadcast %cst_89 : f32 to vector<8x256xf32>
    %298 = arith.addf %297, %296 : vector<8x256xf32>
    %299 = arith.divf %297, %298 : vector<8x256xf32>
    %300 = vector.extract_strided_slice %294 {offsets = [0, 128], sizes = [8, 64], strides = [1, 1]} : vector<8x256xf32> to vector<8x64xf32>
    %301 = math.tanh %300 : vector<8x64xf32>
    %302 = vector.extract_strided_slice %299 {offsets = [0, 64], sizes = [8, 64], strides = [1, 1]} : vector<8x256xf32> to vector<8x64xf32>
    %303 = arith.mulf %302, %282 : vector<8x64xf32>
    %304 = vector.extract_strided_slice %299 {offsets = [0, 0], sizes = [8, 64], strides = [1, 1]} : vector<8x256xf32> to vector<8x64xf32>
    %305 = arith.mulf %304, %301 : vector<8x64xf32>
    %306 = arith.addf %303, %305 : vector<8x64xf32>
    %307 = vector.extract_strided_slice %299 {offsets = [0, 192], sizes = [8, 64], strides = [1, 1]} : vector<8x256xf32> to vector<8x64xf32>
    %308 = math.tanh %306 : vector<8x64xf32>
    %309 = arith.mulf %307, %308 : vector<8x64xf32>
    %310 = vector.extract_strided_slice %309 {offsets = [0, 0], sizes = [8, 32], strides = [1, 1]} : vector<8x64xf32> to vector<8x32xf32>
    %c24_90 = arith.constant 24 : index
    %c0_91 = arith.constant 0 : index
    %311 = vector.load %arg17[%c24_90, %c0_91] : memref<64x64xf32, #tpu.memory_space<vmem>>, vector<8x32xf32>
    tpu.vector_store %arg17[%c24_90, %c0_91], %310 {strides = array<i32>} : memref<64x64xf32, #tpu.memory_space<vmem>>, vector<8x32xf32>,
    %312 = vector.extract_strided_slice %309 {offsets = [0, 32], sizes = [8, 32], strides = [1, 1]} : vector<8x64xf32> to vector<8x32xf32>
    %c32_92 = arith.constant 32 : index
    %c32_93 = arith.constant 32 : index
    %313 = vector.load %arg17[%c32_92, %c32_93] : memref<64x64xf32, #tpu.memory_space<vmem>>, vector<8x32xf32>
    tpu.vector_store %arg17[%c32_92, %c32_93], %312 {strides = array<i32>} : memref<64x64xf32, #tpu.memory_space<vmem>>, vector<8x32xf32>,
    %cst_94 = arith.constant dense<0.000000e+00> : vector<8x256xf32>
    %314 = tpu.matmul %309, %215, %cst_94 {dimension_numbers = #tpu.dot_dimension_numbers<[1], [0], [0], [1], [0, 0, 1, 1], [], []>} : vector<8x64xf32>, vector<64x256xf32>, vector<8x256xf32> -> vector<8x256xf32>
    %315 = vector.extract_strided_slice %211 {offsets = [32, 0], sizes = [8, 256], strides = [1, 1]} : vector<64x256xf32> to vector<8x256xf32>
    %316 = arith.addf %314, %315 : vector<8x256xf32>
    %317 = vector.extract_strided_slice %214 {offsets = [24, 0], sizes = [8, 256], strides = [1, 1]} : vector<64x256xf32> to vector<8x256xf32>
    %318 = arith.addf %316, %317 : vector<8x256xf32>
    %319 = arith.negf %318 : vector<8x256xf32>
    %320 = math.exp %319 : vector<8x256xf32>
    %cst_95 = arith.constant 1.000000e+00 : f32
    %321 = vector.broadcast %cst_95 : f32 to vector<8x256xf32>
    %322 = arith.addf %321, %320 : vector<8x256xf32>
    %323 = arith.divf %321, %322 : vector<8x256xf32>
    %324 = vector.extract_strided_slice %318 {offsets = [0, 128], sizes = [8, 64], strides = [1, 1]} : vector<8x256xf32> to vector<8x64xf32>
    %325 = math.tanh %324 : vector<8x64xf32>
    %326 = vector.extract_strided_slice %323 {offsets = [0, 64], sizes = [8, 64], strides = [1, 1]} : vector<8x256xf32> to vector<8x64xf32>
    %327 = arith.mulf %326, %306 : vector<8x64xf32>
    %328 = vector.extract_strided_slice %323 {offsets = [0, 0], sizes = [8, 64], strides = [1, 1]} : vector<8x256xf32> to vector<8x64xf32>
    %329 = arith.mulf %328, %325 : vector<8x64xf32>
    %330 = arith.addf %327, %329 : vector<8x64xf32>
    %331 = vector.extract_strided_slice %323 {offsets = [0, 192], sizes = [8, 64], strides = [1, 1]} : vector<8x256xf32> to vector<8x64xf32>
    %332 = math.tanh %330 : vector<8x64xf32>
    %333 = arith.mulf %331, %332 : vector<8x64xf32>
    %334 = vector.extract_strided_slice %333 {offsets = [0, 0], sizes = [8, 32], strides = [1, 1]} : vector<8x64xf32> to vector<8x32xf32>
    %c32_96 = arith.constant 32 : index
    %c0_97 = arith.constant 0 : index
    %335 = vector.load %arg17[%c32_96, %c0_97] : memref<64x64xf32, #tpu.memory_space<vmem>>, vector<8x32xf32>
    tpu.vector_store %arg17[%c32_96, %c0_97], %334 {strides = array<i32>} : memref<64x64xf32, #tpu.memory_space<vmem>>, vector<8x32xf32>,
    %336 = vector.extract_strided_slice %333 {offsets = [0, 32], sizes = [8, 32], strides = [1, 1]} : vector<8x64xf32> to vector<8x32xf32>
    %c24_98 = arith.constant 24 : index
    %c32_99 = arith.constant 32 : index
    %337 = vector.load %arg17[%c24_98, %c32_99] : memref<64x64xf32, #tpu.memory_space<vmem>>, vector<8x32xf32>
    tpu.vector_store %arg17[%c24_98, %c32_99], %336 {strides = array<i32>} : memref<64x64xf32, #tpu.memory_space<vmem>>, vector<8x32xf32>,
    %cst_100 = arith.constant dense<0.000000e+00> : vector<8x256xf32>
    %338 = tpu.matmul %333, %215, %cst_100 {dimension_numbers = #tpu.dot_dimension_numbers<[1], [0], [0], [1], [0, 0, 1, 1], [], []>} : vector<8x64xf32>, vector<64x256xf32>, vector<8x256xf32> -> vector<8x256xf32>
    %339 = vector.extract_strided_slice %211 {offsets = [40, 0], sizes = [8, 256], strides = [1, 1]} : vector<64x256xf32> to vector<8x256xf32>
    %340 = arith.addf %338, %339 : vector<8x256xf32>
    %341 = vector.extract_strided_slice %214 {offsets = [16, 0], sizes = [8, 256], strides = [1, 1]} : vector<64x256xf32> to vector<8x256xf32>
    %342 = arith.addf %340, %341 : vector<8x256xf32>
    %343 = arith.negf %342 : vector<8x256xf32>
    %344 = math.exp %343 : vector<8x256xf32>
    %cst_101 = arith.constant 1.000000e+00 : f32
    %345 = vector.broadcast %cst_101 : f32 to vector<8x256xf32>
    %346 = arith.addf %345, %344 : vector<8x256xf32>
    %347 = arith.divf %345, %346 : vector<8x256xf32>
    %348 = vector.extract_strided_slice %342 {offsets = [0, 128], sizes = [8, 64], strides = [1, 1]} : vector<8x256xf32> to vector<8x64xf32>
    %349 = math.tanh %348 : vector<8x64xf32>
    %350 = vector.extract_strided_slice %347 {offsets = [0, 64], sizes = [8, 64], strides = [1, 1]} : vector<8x256xf32> to vector<8x64xf32>
    %351 = arith.mulf %350, %330 : vector<8x64xf32>
    %352 = vector.extract_strided_slice %347 {offsets = [0, 0], sizes = [8, 64], strides = [1, 1]} : vector<8x256xf32> to vector<8x64xf32>
    %353 = arith.mulf %352, %349 : vector<8x64xf32>
    %354 = arith.addf %351, %353 : vector<8x64xf32>
    %355 = vector.extract_strided_slice %347 {offsets = [0, 192], sizes = [8, 64], strides = [1, 1]} : vector<8x256xf32> to vector<8x64xf32>
    %356 = math.tanh %354 : vector<8x64xf32>
    %357 = arith.mulf %355, %356 : vector<8x64xf32>
    %358 = vector.extract_strided_slice %357 {offsets = [0, 0], sizes = [8, 32], strides = [1, 1]} : vector<8x64xf32> to vector<8x32xf32>
    %c40_102 = arith.constant 40 : index
    %c0_103 = arith.constant 0 : index
    %359 = vector.load %arg17[%c40_102, %c0_103] : memref<64x64xf32, #tpu.memory_space<vmem>>, vector<8x32xf32>
    tpu.vector_store %arg17[%c40_102, %c0_103], %358 {strides = array<i32>} : memref<64x64xf32, #tpu.memory_space<vmem>>, vector<8x32xf32>,
    %360 = vector.extract_strided_slice %357 {offsets = [0, 32], sizes = [8, 32], strides = [1, 1]} : vector<8x64xf32> to vector<8x32xf32>
    %c16_104 = arith.constant 16 : index
    %c32_105 = arith.constant 32 : index
    %361 = vector.load %arg17[%c16_104, %c32_105] : memref<64x64xf32, #tpu.memory_space<vmem>>, vector<8x32xf32>
    tpu.vector_store %arg17[%c16_104, %c32_105], %360 {strides = array<i32>} : memref<64x64xf32, #tpu.memory_space<vmem>>, vector<8x32xf32>,
    %cst_106 = arith.constant dense<0.000000e+00> : vector<8x256xf32>
    %362 = tpu.matmul %357, %215, %cst_106 {dimension_numbers = #tpu.dot_dimension_numbers<[1], [0], [0], [1], [0, 0, 1, 1], [], []>} : vector<8x64xf32>, vector<64x256xf32>, vector<8x256xf32> -> vector<8x256xf32>
    %363 = vector.extract_strided_slice %211 {offsets = [48, 0], sizes = [8, 256], strides = [1, 1]} : vector<64x256xf32> to vector<8x256xf32>
    %364 = arith.addf %362, %363 : vector<8x256xf32>
    %365 = vector.extract_strided_slice %214 {offsets = [8, 0], sizes = [8, 256], strides = [1, 1]} : vector<64x256xf32> to vector<8x256xf32>
    %366 = arith.addf %364, %365 : vector<8x256xf32>
    %367 = arith.negf %366 : vector<8x256xf32>
    %368 = math.exp %367 : vector<8x256xf32>
    %cst_107 = arith.constant 1.000000e+00 : f32
    %369 = vector.broadcast %cst_107 : f32 to vector<8x256xf32>
    %370 = arith.addf %369, %368 : vector<8x256xf32>
    %371 = arith.divf %369, %370 : vector<8x256xf32>
    %372 = vector.extract_strided_slice %366 {offsets = [0, 128], sizes = [8, 64], strides = [1, 1]} : vector<8x256xf32> to vector<8x64xf32>
    %373 = math.tanh %372 : vector<8x64xf32>
    %374 = vector.extract_strided_slice %371 {offsets = [0, 64], sizes = [8, 64], strides = [1, 1]} : vector<8x256xf32> to vector<8x64xf32>
    %375 = arith.mulf %374, %354 : vector<8x64xf32>
    %376 = vector.extract_strided_slice %371 {offsets = [0, 0], sizes = [8, 64], strides = [1, 1]} : vector<8x256xf32> to vector<8x64xf32>
    %377 = arith.mulf %376, %373 : vector<8x64xf32>
    %378 = arith.addf %375, %377 : vector<8x64xf32>
    %379 = vector.extract_strided_slice %371 {offsets = [0, 192], sizes = [8, 64], strides = [1, 1]} : vector<8x256xf32> to vector<8x64xf32>
    %380 = math.tanh %378 : vector<8x64xf32>
    %381 = arith.mulf %379, %380 : vector<8x64xf32>
    %382 = vector.extract_strided_slice %381 {offsets = [0, 0], sizes = [8, 32], strides = [1, 1]} : vector<8x64xf32> to vector<8x32xf32>
    %c48_108 = arith.constant 48 : index
    %c0_109 = arith.constant 0 : index
    %383 = vector.load %arg17[%c48_108, %c0_109] : memref<64x64xf32, #tpu.memory_space<vmem>>, vector<8x32xf32>
    tpu.vector_store %arg17[%c48_108, %c0_109], %382 {strides = array<i32>} : memref<64x64xf32, #tpu.memory_space<vmem>>, vector<8x32xf32>,
    %384 = vector.extract_strided_slice %381 {offsets = [0, 32], sizes = [8, 32], strides = [1, 1]} : vector<8x64xf32> to vector<8x32xf32>
    %c8_110 = arith.constant 8 : index
    %c32_111 = arith.constant 32 : index
    %385 = vector.load %arg17[%c8_110, %c32_111] : memref<64x64xf32, #tpu.memory_space<vmem>>, vector<8x32xf32>
    tpu.vector_store %arg17[%c8_110, %c32_111], %384 {strides = array<i32>} : memref<64x64xf32, #tpu.memory_space<vmem>>, vector<8x32xf32>,
    %cst_112 = arith.constant dense<0.000000e+00> : vector<8x256xf32>
    %386 = tpu.matmul %381, %215, %cst_112 {dimension_numbers = #tpu.dot_dimension_numbers<[1], [0], [0], [1], [0, 0, 1, 1], [], []>} : vector<8x64xf32>, vector<64x256xf32>, vector<8x256xf32> -> vector<8x256xf32>
    %387 = vector.extract_strided_slice %211 {offsets = [56, 0], sizes = [8, 256], strides = [1, 1]} : vector<64x256xf32> to vector<8x256xf32>
    %388 = arith.addf %386, %387 : vector<8x256xf32>
    %389 = vector.extract_strided_slice %214 {offsets = [0, 0], sizes = [8, 256], strides = [1, 1]} : vector<64x256xf32> to vector<8x256xf32>
    %390 = arith.addf %388, %389 : vector<8x256xf32>
    %391 = arith.negf %390 : vector<8x256xf32>
    %392 = math.exp %391 : vector<8x256xf32>
    %cst_113 = arith.constant 1.000000e+00 : f32
    %393 = vector.broadcast %cst_113 : f32 to vector<8x256xf32>
    %394 = arith.addf %393, %392 : vector<8x256xf32>
    %395 = arith.divf %393, %394 : vector<8x256xf32>
    %396 = vector.extract_strided_slice %390 {offsets = [0, 128], sizes = [8, 64], strides = [1, 1]} : vector<8x256xf32> to vector<8x64xf32>
    %397 = math.tanh %396 : vector<8x64xf32>
    %398 = vector.extract_strided_slice %395 {offsets = [0, 64], sizes = [8, 64], strides = [1, 1]} : vector<8x256xf32> to vector<8x64xf32>
    %399 = arith.mulf %398, %378 : vector<8x64xf32>
    %400 = vector.extract_strided_slice %395 {offsets = [0, 0], sizes = [8, 64], strides = [1, 1]} : vector<8x256xf32> to vector<8x64xf32>
    %401 = arith.mulf %400, %397 : vector<8x64xf32>
    %402 = arith.addf %399, %401 : vector<8x64xf32>
    %403 = vector.extract_strided_slice %395 {offsets = [0, 192], sizes = [8, 64], strides = [1, 1]} : vector<8x256xf32> to vector<8x64xf32>
    %404 = math.tanh %402 : vector<8x64xf32>
    %405 = arith.mulf %403, %404 : vector<8x64xf32>
    %406 = vector.extract_strided_slice %405 {offsets = [0, 0], sizes = [8, 32], strides = [1, 1]} : vector<8x64xf32> to vector<8x32xf32>
    %c56_114 = arith.constant 56 : index
    %c0_115 = arith.constant 0 : index
    %407 = vector.load %arg17[%c56_114, %c0_115] : memref<64x64xf32, #tpu.memory_space<vmem>>, vector<8x32xf32>
    tpu.vector_store %arg17[%c56_114, %c0_115], %406 {strides = array<i32>} : memref<64x64xf32, #tpu.memory_space<vmem>>, vector<8x32xf32>,
    %408 = vector.extract_strided_slice %405 {offsets = [0, 32], sizes = [8, 32], strides = [1, 1]} : vector<8x64xf32> to vector<8x32xf32>
    %c0_116 = arith.constant 0 : index
    %c32_117 = arith.constant 32 : index
    %409 = vector.load %arg17[%c0_116, %c32_117] : memref<64x64xf32, #tpu.memory_space<vmem>>, vector<8x32xf32>
    tpu.vector_store %arg17[%c0_116, %c32_117], %408 {strides = array<i32>} : memref<64x64xf32, #tpu.memory_space<vmem>>, vector<8x32xf32>,
    %c0_118 = arith.constant 0 : index
    %c0_119 = arith.constant 0 : index
    %410 = vector.load %arg17[%c0_118, %c0_119] : memref<64x64xf32, #tpu.memory_space<vmem>>, vector<64x64xf32>
    %c0_120 = arith.constant 0 : index
    %c0_121 = arith.constant 0 : index
    %c0_122 = arith.constant 0 : index
    %411 = vector.load %arg7[%c0_120, %c0_121, %c0_122] : memref<2x64x256xf32, #tpu.memory_space<vmem>>, vector<1x64x256xf32>
    %412 = vector.shape_cast %411 : vector<1x64x256xf32> to vector<64x256xf32>
    %cst_123 = arith.constant dense<0.000000e+00> : vector<64x256xf32>
    %413 = tpu.matmul %410, %412, %cst_123 {dimension_numbers = #tpu.dot_dimension_numbers<[1], [0], [0], [1], [0, 0, 1, 1], [], []>} : vector<64x64xf32>, vector<64x256xf32>, vector<64x256xf32> -> vector<64x256xf32>
    %c0_124 = arith.constant 0 : index
    %c0_125 = arith.constant 0 : index
    %414 = vector.load %arg9[%c0_124, %c0_125] : memref<1x256xf32, #tpu.memory_space<vmem>>, vector<1x256xf32>
    %415 = vector.broadcast %414 : vector<1x256xf32> to vector<64x256xf32>
    %416 = arith.addf %413, %415 : vector<64x256xf32>
    %c1_126 = arith.constant 1 : index
    %c0_127 = arith.constant 0 : index
    %c0_128 = arith.constant 0 : index
    %417 = vector.load %arg7[%c1_126, %c0_127, %c0_128] : memref<2x64x256xf32, #tpu.memory_space<vmem>>, vector<1x64x256xf32>
    %418 = vector.shape_cast %417 : vector<1x64x256xf32> to vector<64x256xf32>
    %cst_129 = arith.constant dense<0.000000e+00> : vector<64x256xf32>
    %419 = tpu.matmul %410, %418, %cst_129 {dimension_numbers = #tpu.dot_dimension_numbers<[1], [0], [0], [1], [0, 0, 1, 1], [], []>} : vector<64x64xf32>, vector<64x256xf32>, vector<64x256xf32> -> vector<64x256xf32>
    %c0_130 = arith.constant 0 : index
    %c0_131 = arith.constant 0 : index
    %420 = vector.load %arg8[%c0_130, %c0_131] : memref<64x256xf32, #tpu.memory_space<vmem>>, vector<64x256xf32>
    %cst_132 = arith.constant 0.000000e+00 : f32
    %421 = vector.broadcast %cst_132 : f32 to vector<8x64xf32>
    %cst_133 = arith.constant 0.000000e+00 : f32
    %422 = vector.broadcast %cst_133 : f32 to vector<8x64xf32>
    %cst_134 = arith.constant dense<0.000000e+00> : vector<8x256xf32>
    %423 = tpu.matmul %421, %420, %cst_134 {dimension_numbers = #tpu.dot_dimension_numbers<[1], [0], [0], [1], [0, 0, 1, 1], [], []>} : vector<8x64xf32>, vector<64x256xf32>, vector<8x256xf32> -> vector<8x256xf32>
    %424 = vector.extract_strided_slice %416 {offsets = [0, 0], sizes = [8, 256], strides = [1, 1]} : vector<64x256xf32> to vector<8x256xf32>
    %425 = arith.addf %423, %424 : vector<8x256xf32>
    %426 = vector.extract_strided_slice %419 {offsets = [56, 0], sizes = [8, 256], strides = [1, 1]} : vector<64x256xf32> to vector<8x256xf32>
    %427 = arith.addf %425, %426 : vector<8x256xf32>
    %428 = arith.negf %427 : vector<8x256xf32>
    %429 = math.exp %428 : vector<8x256xf32>
    %cst_135 = arith.constant 1.000000e+00 : f32
    %430 = vector.broadcast %cst_135 : f32 to vector<8x256xf32>
    %431 = arith.addf %430, %429 : vector<8x256xf32>
    %432 = arith.divf %430, %431 : vector<8x256xf32>
    %433 = vector.extract_strided_slice %427 {offsets = [0, 128], sizes = [8, 64], strides = [1, 1]} : vector<8x256xf32> to vector<8x64xf32>
    %434 = math.tanh %433 : vector<8x64xf32>
    %435 = vector.extract_strided_slice %432 {offsets = [0, 64], sizes = [8, 64], strides = [1, 1]} : vector<8x256xf32> to vector<8x64xf32>
    %436 = arith.mulf %435, %422 : vector<8x64xf32>
    %437 = vector.extract_strided_slice %432 {offsets = [0, 0], sizes = [8, 64], strides = [1, 1]} : vector<8x256xf32> to vector<8x64xf32>
    %438 = arith.mulf %437, %434 : vector<8x64xf32>
    %439 = arith.addf %436, %438 : vector<8x64xf32>
    %440 = vector.extract_strided_slice %432 {offsets = [0, 192], sizes = [8, 64], strides = [1, 1]} : vector<8x256xf32> to vector<8x64xf32>
    %441 = math.tanh %439 : vector<8x64xf32>
    %442 = arith.mulf %440, %441 : vector<8x64xf32>
    %443 = vector.extract_strided_slice %442 {offsets = [0, 0], sizes = [8, 32], strides = [1, 1]} : vector<8x64xf32> to vector<8x32xf32>
    %c0_136 = arith.constant 0 : index
    %c0_137 = arith.constant 0 : index
    %444 = vector.load %arg17[%c0_136, %c0_137] : memref<64x64xf32, #tpu.memory_space<vmem>>, vector<8x32xf32>
    tpu.vector_store %arg17[%c0_136, %c0_137], %443 {strides = array<i32>} : memref<64x64xf32, #tpu.memory_space<vmem>>, vector<8x32xf32>,
    %445 = vector.extract_strided_slice %442 {offsets = [0, 32], sizes = [8, 32], strides = [1, 1]} : vector<8x64xf32> to vector<8x32xf32>
    %c56_138 = arith.constant 56 : index
    %c32_139 = arith.constant 32 : index
    %446 = vector.load %arg17[%c56_138, %c32_139] : memref<64x64xf32, #tpu.memory_space<vmem>>, vector<8x32xf32>
    tpu.vector_store %arg17[%c56_138, %c32_139], %445 {strides = array<i32>} : memref<64x64xf32, #tpu.memory_space<vmem>>, vector<8x32xf32>,
    %cst_140 = arith.constant dense<0.000000e+00> : vector<8x256xf32>
    %447 = tpu.matmul %442, %420, %cst_140 {dimension_numbers = #tpu.dot_dimension_numbers<[1], [0], [0], [1], [0, 0, 1, 1], [], []>} : vector<8x64xf32>, vector<64x256xf32>, vector<8x256xf32> -> vector<8x256xf32>
    %448 = vector.extract_strided_slice %416 {offsets = [8, 0], sizes = [8, 256], strides = [1, 1]} : vector<64x256xf32> to vector<8x256xf32>
    %449 = arith.addf %447, %448 : vector<8x256xf32>
    %450 = vector.extract_strided_slice %419 {offsets = [48, 0], sizes = [8, 256], strides = [1, 1]} : vector<64x256xf32> to vector<8x256xf32>
    %451 = arith.addf %449, %450 : vector<8x256xf32>
    %452 = arith.negf %451 : vector<8x256xf32>
    %453 = math.exp %452 : vector<8x256xf32>
    %cst_141 = arith.constant 1.000000e+00 : f32
    %454 = vector.broadcast %cst_141 : f32 to vector<8x256xf32>
    %455 = arith.addf %454, %453 : vector<8x256xf32>
    %456 = arith.divf %454, %455 : vector<8x256xf32>
    %457 = vector.extract_strided_slice %451 {offsets = [0, 128], sizes = [8, 64], strides = [1, 1]} : vector<8x256xf32> to vector<8x64xf32>
    %458 = math.tanh %457 : vector<8x64xf32>
    %459 = vector.extract_strided_slice %456 {offsets = [0, 64], sizes = [8, 64], strides = [1, 1]} : vector<8x256xf32> to vector<8x64xf32>
    %460 = arith.mulf %459, %439 : vector<8x64xf32>
    %461 = vector.extract_strided_slice %456 {offsets = [0, 0], sizes = [8, 64], strides = [1, 1]} : vector<8x256xf32> to vector<8x64xf32>
    %462 = arith.mulf %461, %458 : vector<8x64xf32>
    %463 = arith.addf %460, %462 : vector<8x64xf32>
    %464 = vector.extract_strided_slice %456 {offsets = [0, 192], sizes = [8, 64], strides = [1, 1]} : vector<8x256xf32> to vector<8x64xf32>
    %465 = math.tanh %463 : vector<8x64xf32>
    %466 = arith.mulf %464, %465 : vector<8x64xf32>
    %467 = vector.extract_strided_slice %466 {offsets = [0, 0], sizes = [8, 32], strides = [1, 1]} : vector<8x64xf32> to vector<8x32xf32>
    %c8_142 = arith.constant 8 : index
    %c0_143 = arith.constant 0 : index
    %468 = vector.load %arg17[%c8_142, %c0_143] : memref<64x64xf32, #tpu.memory_space<vmem>>, vector<8x32xf32>
    tpu.vector_store %arg17[%c8_142, %c0_143], %467 {strides = array<i32>} : memref<64x64xf32, #tpu.memory_space<vmem>>, vector<8x32xf32>,
    %469 = vector.extract_strided_slice %466 {offsets = [0, 32], sizes = [8, 32], strides = [1, 1]} : vector<8x64xf32> to vector<8x32xf32>
    %c48_144 = arith.constant 48 : index
    %c32_145 = arith.constant 32 : index
    %470 = vector.load %arg17[%c48_144, %c32_145] : memref<64x64xf32, #tpu.memory_space<vmem>>, vector<8x32xf32>
    tpu.vector_store %arg17[%c48_144, %c32_145], %469 {strides = array<i32>} : memref<64x64xf32, #tpu.memory_space<vmem>>, vector<8x32xf32>,
    %cst_146 = arith.constant dense<0.000000e+00> : vector<8x256xf32>
    %471 = tpu.matmul %466, %420, %cst_146 {dimension_numbers = #tpu.dot_dimension_numbers<[1], [0], [0], [1], [0, 0, 1, 1], [], []>} : vector<8x64xf32>, vector<64x256xf32>, vector<8x256xf32> -> vector<8x256xf32>
    %472 = vector.extract_strided_slice %416 {offsets = [16, 0], sizes = [8, 256], strides = [1, 1]} : vector<64x256xf32> to vector<8x256xf32>
    %473 = arith.addf %471, %472 : vector<8x256xf32>
    %474 = vector.extract_strided_slice %419 {offsets = [40, 0], sizes = [8, 256], strides = [1, 1]} : vector<64x256xf32> to vector<8x256xf32>
    %475 = arith.addf %473, %474 : vector<8x256xf32>
    %476 = arith.negf %475 : vector<8x256xf32>
    %477 = math.exp %476 : vector<8x256xf32>
    %cst_147 = arith.constant 1.000000e+00 : f32
    %478 = vector.broadcast %cst_147 : f32 to vector<8x256xf32>
    %479 = arith.addf %478, %477 : vector<8x256xf32>
    %480 = arith.divf %478, %479 : vector<8x256xf32>
    %481 = vector.extract_strided_slice %475 {offsets = [0, 128], sizes = [8, 64], strides = [1, 1]} : vector<8x256xf32> to vector<8x64xf32>
    %482 = math.tanh %481 : vector<8x64xf32>
    %483 = vector.extract_strided_slice %480 {offsets = [0, 64], sizes = [8, 64], strides = [1, 1]} : vector<8x256xf32> to vector<8x64xf32>
    %484 = arith.mulf %483, %463 : vector<8x64xf32>
    %485 = vector.extract_strided_slice %480 {offsets = [0, 0], sizes = [8, 64], strides = [1, 1]} : vector<8x256xf32> to vector<8x64xf32>
    %486 = arith.mulf %485, %482 : vector<8x64xf32>
    %487 = arith.addf %484, %486 : vector<8x64xf32>
    %488 = vector.extract_strided_slice %480 {offsets = [0, 192], sizes = [8, 64], strides = [1, 1]} : vector<8x256xf32> to vector<8x64xf32>
    %489 = math.tanh %487 : vector<8x64xf32>
    %490 = arith.mulf %488, %489 : vector<8x64xf32>
    %491 = vector.extract_strided_slice %490 {offsets = [0, 0], sizes = [8, 32], strides = [1, 1]} : vector<8x64xf32> to vector<8x32xf32>
    %c16_148 = arith.constant 16 : index
    %c0_149 = arith.constant 0 : index
    %492 = vector.load %arg17[%c16_148, %c0_149] : memref<64x64xf32, #tpu.memory_space<vmem>>, vector<8x32xf32>
    tpu.vector_store %arg17[%c16_148, %c0_149], %491 {strides = array<i32>} : memref<64x64xf32, #tpu.memory_space<vmem>>, vector<8x32xf32>,
    %493 = vector.extract_strided_slice %490 {offsets = [0, 32], sizes = [8, 32], strides = [1, 1]} : vector<8x64xf32> to vector<8x32xf32>
    %c40_150 = arith.constant 40 : index
    %c32_151 = arith.constant 32 : index
    %494 = vector.load %arg17[%c40_150, %c32_151] : memref<64x64xf32, #tpu.memory_space<vmem>>, vector<8x32xf32>
    tpu.vector_store %arg17[%c40_150, %c32_151], %493 {strides = array<i32>} : memref<64x64xf32, #tpu.memory_space<vmem>>, vector<8x32xf32>,
    %cst_152 = arith.constant dense<0.000000e+00> : vector<8x256xf32>
    %495 = tpu.matmul %490, %420, %cst_152 {dimension_numbers = #tpu.dot_dimension_numbers<[1], [0], [0], [1], [0, 0, 1, 1], [], []>} : vector<8x64xf32>, vector<64x256xf32>, vector<8x256xf32> -> vector<8x256xf32>
    %496 = vector.extract_strided_slice %416 {offsets = [24, 0], sizes = [8, 256], strides = [1, 1]} : vector<64x256xf32> to vector<8x256xf32>
    %497 = arith.addf %495, %496 : vector<8x256xf32>
    %498 = vector.extract_strided_slice %419 {offsets = [32, 0], sizes = [8, 256], strides = [1, 1]} : vector<64x256xf32> to vector<8x256xf32>
    %499 = arith.addf %497, %498 : vector<8x256xf32>
    %500 = arith.negf %499 : vector<8x256xf32>
    %501 = math.exp %500 : vector<8x256xf32>
    %cst_153 = arith.constant 1.000000e+00 : f32
    %502 = vector.broadcast %cst_153 : f32 to vector<8x256xf32>
    %503 = arith.addf %502, %501 : vector<8x256xf32>
    %504 = arith.divf %502, %503 : vector<8x256xf32>
    %505 = vector.extract_strided_slice %499 {offsets = [0, 128], sizes = [8, 64], strides = [1, 1]} : vector<8x256xf32> to vector<8x64xf32>
    %506 = math.tanh %505 : vector<8x64xf32>
    %507 = vector.extract_strided_slice %504 {offsets = [0, 64], sizes = [8, 64], strides = [1, 1]} : vector<8x256xf32> to vector<8x64xf32>
    %508 = arith.mulf %507, %487 : vector<8x64xf32>
    %509 = vector.extract_strided_slice %504 {offsets = [0, 0], sizes = [8, 64], strides = [1, 1]} : vector<8x256xf32> to vector<8x64xf32>
    %510 = arith.mulf %509, %506 : vector<8x64xf32>
    %511 = arith.addf %508, %510 : vector<8x64xf32>
    %512 = vector.extract_strided_slice %504 {offsets = [0, 192], sizes = [8, 64], strides = [1, 1]} : vector<8x256xf32> to vector<8x64xf32>
    %513 = math.tanh %511 : vector<8x64xf32>
    %514 = arith.mulf %512, %513 : vector<8x64xf32>
    %515 = vector.extract_strided_slice %514 {offsets = [0, 0], sizes = [8, 32], strides = [1, 1]} : vector<8x64xf32> to vector<8x32xf32>
    %c24_154 = arith.constant 24 : index
    %c0_155 = arith.constant 0 : index
    %516 = vector.load %arg17[%c24_154, %c0_155] : memref<64x64xf32, #tpu.memory_space<vmem>>, vector<8x32xf32>
    tpu.vector_store %arg17[%c24_154, %c0_155], %515 {strides = array<i32>} : memref<64x64xf32, #tpu.memory_space<vmem>>, vector<8x32xf32>,
    %517 = vector.extract_strided_slice %514 {offsets = [0, 32], sizes = [8, 32], strides = [1, 1]} : vector<8x64xf32> to vector<8x32xf32>
    %c32_156 = arith.constant 32 : index
    %c32_157 = arith.constant 32 : index
    %518 = vector.load %arg17[%c32_156, %c32_157] : memref<64x64xf32, #tpu.memory_space<vmem>>, vector<8x32xf32>
    tpu.vector_store %arg17[%c32_156, %c32_157], %517 {strides = array<i32>} : memref<64x64xf32, #tpu.memory_space<vmem>>, vector<8x32xf32>,
    %cst_158 = arith.constant dense<0.000000e+00> : vector<8x256xf32>
    %519 = tpu.matmul %514, %420, %cst_158 {dimension_numbers = #tpu.dot_dimension_numbers<[1], [0], [0], [1], [0, 0, 1, 1], [], []>} : vector<8x64xf32>, vector<64x256xf32>, vector<8x256xf32> -> vector<8x256xf32>
    %520 = vector.extract_strided_slice %416 {offsets = [32, 0], sizes = [8, 256], strides = [1, 1]} : vector<64x256xf32> to vector<8x256xf32>
    %521 = arith.addf %519, %520 : vector<8x256xf32>
    %522 = vector.extract_strided_slice %419 {offsets = [24, 0], sizes = [8, 256], strides = [1, 1]} : vector<64x256xf32> to vector<8x256xf32>
    %523 = arith.addf %521, %522 : vector<8x256xf32>
    %524 = arith.negf %523 : vector<8x256xf32>
    %525 = math.exp %524 : vector<8x256xf32>
    %cst_159 = arith.constant 1.000000e+00 : f32
    %526 = vector.broadcast %cst_159 : f32 to vector<8x256xf32>
    %527 = arith.addf %526, %525 : vector<8x256xf32>
    %528 = arith.divf %526, %527 : vector<8x256xf32>
    %529 = vector.extract_strided_slice %523 {offsets = [0, 128], sizes = [8, 64], strides = [1, 1]} : vector<8x256xf32> to vector<8x64xf32>
    %530 = math.tanh %529 : vector<8x64xf32>
    %531 = vector.extract_strided_slice %528 {offsets = [0, 64], sizes = [8, 64], strides = [1, 1]} : vector<8x256xf32> to vector<8x64xf32>
    %532 = arith.mulf %531, %511 : vector<8x64xf32>
    %533 = vector.extract_strided_slice %528 {offsets = [0, 0], sizes = [8, 64], strides = [1, 1]} : vector<8x256xf32> to vector<8x64xf32>
    %534 = arith.mulf %533, %530 : vector<8x64xf32>
    %535 = arith.addf %532, %534 : vector<8x64xf32>
    %536 = vector.extract_strided_slice %528 {offsets = [0, 192], sizes = [8, 64], strides = [1, 1]} : vector<8x256xf32> to vector<8x64xf32>
    %537 = math.tanh %535 : vector<8x64xf32>
    %538 = arith.mulf %536, %537 : vector<8x64xf32>
    %539 = vector.extract_strided_slice %538 {offsets = [0, 0], sizes = [8, 32], strides = [1, 1]} : vector<8x64xf32> to vector<8x32xf32>
    %c32_160 = arith.constant 32 : index
    %c0_161 = arith.constant 0 : index
    %540 = vector.load %arg17[%c32_160, %c0_161] : memref<64x64xf32, #tpu.memory_space<vmem>>, vector<8x32xf32>
    tpu.vector_store %arg17[%c32_160, %c0_161], %539 {strides = array<i32>} : memref<64x64xf32, #tpu.memory_space<vmem>>, vector<8x32xf32>,
    %541 = vector.extract_strided_slice %538 {offsets = [0, 32], sizes = [8, 32], strides = [1, 1]} : vector<8x64xf32> to vector<8x32xf32>
    %c24_162 = arith.constant 24 : index
    %c32_163 = arith.constant 32 : index
    %542 = vector.load %arg17[%c24_162, %c32_163] : memref<64x64xf32, #tpu.memory_space<vmem>>, vector<8x32xf32>
    tpu.vector_store %arg17[%c24_162, %c32_163], %541 {strides = array<i32>} : memref<64x64xf32, #tpu.memory_space<vmem>>, vector<8x32xf32>,
    %cst_164 = arith.constant dense<0.000000e+00> : vector<8x256xf32>
    %543 = tpu.matmul %538, %420, %cst_164 {dimension_numbers = #tpu.dot_dimension_numbers<[1], [0], [0], [1], [0, 0, 1, 1], [], []>} : vector<8x64xf32>, vector<64x256xf32>, vector<8x256xf32> -> vector<8x256xf32>
    %544 = vector.extract_strided_slice %416 {offsets = [40, 0], sizes = [8, 256], strides = [1, 1]} : vector<64x256xf32> to vector<8x256xf32>
    %545 = arith.addf %543, %544 : vector<8x256xf32>
    %546 = vector.extract_strided_slice %419 {offsets = [16, 0], sizes = [8, 256], strides = [1, 1]} : vector<64x256xf32> to vector<8x256xf32>
    %547 = arith.addf %545, %546 : vector<8x256xf32>
    %548 = arith.negf %547 : vector<8x256xf32>
    %549 = math.exp %548 : vector<8x256xf32>
    %cst_165 = arith.constant 1.000000e+00 : f32
    %550 = vector.broadcast %cst_165 : f32 to vector<8x256xf32>
    %551 = arith.addf %550, %549 : vector<8x256xf32>
    %552 = arith.divf %550, %551 : vector<8x256xf32>
    %553 = vector.extract_strided_slice %547 {offsets = [0, 128], sizes = [8, 64], strides = [1, 1]} : vector<8x256xf32> to vector<8x64xf32>
    %554 = math.tanh %553 : vector<8x64xf32>
    %555 = vector.extract_strided_slice %552 {offsets = [0, 64], sizes = [8, 64], strides = [1, 1]} : vector<8x256xf32> to vector<8x64xf32>
    %556 = arith.mulf %555, %535 : vector<8x64xf32>
    %557 = vector.extract_strided_slice %552 {offsets = [0, 0], sizes = [8, 64], strides = [1, 1]} : vector<8x256xf32> to vector<8x64xf32>
    %558 = arith.mulf %557, %554 : vector<8x64xf32>
    %559 = arith.addf %556, %558 : vector<8x64xf32>
    %560 = vector.extract_strided_slice %552 {offsets = [0, 192], sizes = [8, 64], strides = [1, 1]} : vector<8x256xf32> to vector<8x64xf32>
    %561 = math.tanh %559 : vector<8x64xf32>
    %562 = arith.mulf %560, %561 : vector<8x64xf32>
    %563 = vector.extract_strided_slice %562 {offsets = [0, 0], sizes = [8, 32], strides = [1, 1]} : vector<8x64xf32> to vector<8x32xf32>
    %c40_166 = arith.constant 40 : index
    %c0_167 = arith.constant 0 : index
    %564 = vector.load %arg17[%c40_166, %c0_167] : memref<64x64xf32, #tpu.memory_space<vmem>>, vector<8x32xf32>
    tpu.vector_store %arg17[%c40_166, %c0_167], %563 {strides = array<i32>} : memref<64x64xf32, #tpu.memory_space<vmem>>, vector<8x32xf32>,
    %565 = vector.extract_strided_slice %562 {offsets = [0, 32], sizes = [8, 32], strides = [1, 1]} : vector<8x64xf32> to vector<8x32xf32>
    %c16_168 = arith.constant 16 : index
    %c32_169 = arith.constant 32 : index
    %566 = vector.load %arg17[%c16_168, %c32_169] : memref<64x64xf32, #tpu.memory_space<vmem>>, vector<8x32xf32>
    tpu.vector_store %arg17[%c16_168, %c32_169], %565 {strides = array<i32>} : memref<64x64xf32, #tpu.memory_space<vmem>>, vector<8x32xf32>,
    %cst_170 = arith.constant dense<0.000000e+00> : vector<8x256xf32>
    %567 = tpu.matmul %562, %420, %cst_170 {dimension_numbers = #tpu.dot_dimension_numbers<[1], [0], [0], [1], [0, 0, 1, 1], [], []>} : vector<8x64xf32>, vector<64x256xf32>, vector<8x256xf32> -> vector<8x256xf32>
    %568 = vector.extract_strided_slice %416 {offsets = [48, 0], sizes = [8, 256], strides = [1, 1]} : vector<64x256xf32> to vector<8x256xf32>
    %569 = arith.addf %567, %568 : vector<8x256xf32>
    %570 = vector.extract_strided_slice %419 {offsets = [8, 0], sizes = [8, 256], strides = [1, 1]} : vector<64x256xf32> to vector<8x256xf32>
    %571 = arith.addf %569, %570 : vector<8x256xf32>
    %572 = arith.negf %571 : vector<8x256xf32>
    %573 = math.exp %572 : vector<8x256xf32>
    %cst_171 = arith.constant 1.000000e+00 : f32
    %574 = vector.broadcast %cst_171 : f32 to vector<8x256xf32>
    %575 = arith.addf %574, %573 : vector<8x256xf32>
    %576 = arith.divf %574, %575 : vector<8x256xf32>
    %577 = vector.extract_strided_slice %571 {offsets = [0, 128], sizes = [8, 64], strides = [1, 1]} : vector<8x256xf32> to vector<8x64xf32>
    %578 = math.tanh %577 : vector<8x64xf32>
    %579 = vector.extract_strided_slice %576 {offsets = [0, 64], sizes = [8, 64], strides = [1, 1]} : vector<8x256xf32> to vector<8x64xf32>
    %580 = arith.mulf %579, %559 : vector<8x64xf32>
    %581 = vector.extract_strided_slice %576 {offsets = [0, 0], sizes = [8, 64], strides = [1, 1]} : vector<8x256xf32> to vector<8x64xf32>
    %582 = arith.mulf %581, %578 : vector<8x64xf32>
    %583 = arith.addf %580, %582 : vector<8x64xf32>
    %584 = vector.extract_strided_slice %576 {offsets = [0, 192], sizes = [8, 64], strides = [1, 1]} : vector<8x256xf32> to vector<8x64xf32>
    %585 = math.tanh %583 : vector<8x64xf32>
    %586 = arith.mulf %584, %585 : vector<8x64xf32>
    %587 = vector.extract_strided_slice %586 {offsets = [0, 0], sizes = [8, 32], strides = [1, 1]} : vector<8x64xf32> to vector<8x32xf32>
    %c48_172 = arith.constant 48 : index
    %c0_173 = arith.constant 0 : index
    %588 = vector.load %arg17[%c48_172, %c0_173] : memref<64x64xf32, #tpu.memory_space<vmem>>, vector<8x32xf32>
    tpu.vector_store %arg17[%c48_172, %c0_173], %587 {strides = array<i32>} : memref<64x64xf32, #tpu.memory_space<vmem>>, vector<8x32xf32>,
    %589 = vector.extract_strided_slice %586 {offsets = [0, 32], sizes = [8, 32], strides = [1, 1]} : vector<8x64xf32> to vector<8x32xf32>
    %c8_174 = arith.constant 8 : index
    %c32_175 = arith.constant 32 : index
    %590 = vector.load %arg17[%c8_174, %c32_175] : memref<64x64xf32, #tpu.memory_space<vmem>>, vector<8x32xf32>
    tpu.vector_store %arg17[%c8_174, %c32_175], %589 {strides = array<i32>} : memref<64x64xf32, #tpu.memory_space<vmem>>, vector<8x32xf32>,
    %cst_176 = arith.constant dense<0.000000e+00> : vector<8x256xf32>
    %591 = tpu.matmul %586, %420, %cst_176 {dimension_numbers = #tpu.dot_dimension_numbers<[1], [0], [0], [1], [0, 0, 1, 1], [], []>} : vector<8x64xf32>, vector<64x256xf32>, vector<8x256xf32> -> vector<8x256xf32>
    %592 = vector.extract_strided_slice %416 {offsets = [56, 0], sizes = [8, 256], strides = [1, 1]} : vector<64x256xf32> to vector<8x256xf32>
    %593 = arith.addf %591, %592 : vector<8x256xf32>
    %594 = vector.extract_strided_slice %419 {offsets = [0, 0], sizes = [8, 256], strides = [1, 1]} : vector<64x256xf32> to vector<8x256xf32>
    %595 = arith.addf %593, %594 : vector<8x256xf32>
    %596 = arith.negf %595 : vector<8x256xf32>
    %597 = math.exp %596 : vector<8x256xf32>
    %cst_177 = arith.constant 1.000000e+00 : f32
    %598 = vector.broadcast %cst_177 : f32 to vector<8x256xf32>
    %599 = arith.addf %598, %597 : vector<8x256xf32>
    %600 = arith.divf %598, %599 : vector<8x256xf32>
    %601 = vector.extract_strided_slice %595 {offsets = [0, 128], sizes = [8, 64], strides = [1, 1]} : vector<8x256xf32> to vector<8x64xf32>
    %602 = math.tanh %601 : vector<8x64xf32>
    %603 = vector.extract_strided_slice %600 {offsets = [0, 64], sizes = [8, 64], strides = [1, 1]} : vector<8x256xf32> to vector<8x64xf32>
    %604 = arith.mulf %603, %583 : vector<8x64xf32>
    %605 = vector.extract_strided_slice %600 {offsets = [0, 0], sizes = [8, 64], strides = [1, 1]} : vector<8x256xf32> to vector<8x64xf32>
    %606 = arith.mulf %605, %602 : vector<8x64xf32>
    %607 = arith.addf %604, %606 : vector<8x64xf32>
    %608 = vector.extract_strided_slice %600 {offsets = [0, 192], sizes = [8, 64], strides = [1, 1]} : vector<8x256xf32> to vector<8x64xf32>
    %609 = math.tanh %607 : vector<8x64xf32>
    %610 = arith.mulf %608, %609 : vector<8x64xf32>
    %611 = vector.extract_strided_slice %610 {offsets = [0, 0], sizes = [8, 32], strides = [1, 1]} : vector<8x64xf32> to vector<8x32xf32>
    %c56_178 = arith.constant 56 : index
    %c0_179 = arith.constant 0 : index
    %612 = vector.load %arg17[%c56_178, %c0_179] : memref<64x64xf32, #tpu.memory_space<vmem>>, vector<8x32xf32>
    tpu.vector_store %arg17[%c56_178, %c0_179], %611 {strides = array<i32>} : memref<64x64xf32, #tpu.memory_space<vmem>>, vector<8x32xf32>,
    %613 = vector.extract_strided_slice %610 {offsets = [0, 32], sizes = [8, 32], strides = [1, 1]} : vector<8x64xf32> to vector<8x32xf32>
    %c0_180 = arith.constant 0 : index
    %c32_181 = arith.constant 32 : index
    %614 = vector.load %arg17[%c0_180, %c32_181] : memref<64x64xf32, #tpu.memory_space<vmem>>, vector<8x32xf32>
    tpu.vector_store %arg17[%c0_180, %c32_181], %613 {strides = array<i32>} : memref<64x64xf32, #tpu.memory_space<vmem>>, vector<8x32xf32>,
    %c0_182 = arith.constant 0 : index
    %c0_183 = arith.constant 0 : index
    %615 = vector.load %arg17[%c0_182, %c0_183] : memref<64x64xf32, #tpu.memory_space<vmem>>, vector<64x64xf32>
    %c0_184 = arith.constant 0 : index
    %c0_185 = arith.constant 0 : index
    %c0_186 = arith.constant 0 : index
    %616 = vector.load %arg10[%c0_184, %c0_185, %c0_186] : memref<2x64x256xf32, #tpu.memory_space<vmem>>, vector<1x64x256xf32>
    %617 = vector.shape_cast %616 : vector<1x64x256xf32> to vector<64x256xf32>
    %cst_187 = arith.constant dense<0.000000e+00> : vector<64x256xf32>
    %618 = tpu.matmul %615, %617, %cst_187 {dimension_numbers = #tpu.dot_dimension_numbers<[1], [0], [0], [1], [0, 0, 1, 1], [], []>} : vector<64x64xf32>, vector<64x256xf32>, vector<64x256xf32> -> vector<64x256xf32>
    %c0_188 = arith.constant 0 : index
    %c0_189 = arith.constant 0 : index
    %619 = vector.load %arg12[%c0_188, %c0_189] : memref<1x256xf32, #tpu.memory_space<vmem>>, vector<1x256xf32>
    %620 = vector.broadcast %619 : vector<1x256xf32> to vector<64x256xf32>
    %621 = arith.addf %618, %620 : vector<64x256xf32>
    %c1_190 = arith.constant 1 : index
    %c0_191 = arith.constant 0 : index
    %c0_192 = arith.constant 0 : index
    %622 = vector.load %arg10[%c1_190, %c0_191, %c0_192] : memref<2x64x256xf32, #tpu.memory_space<vmem>>, vector<1x64x256xf32>
    %623 = vector.shape_cast %622 : vector<1x64x256xf32> to vector<64x256xf32>
    %cst_193 = arith.constant dense<0.000000e+00> : vector<64x256xf32>
    %624 = tpu.matmul %615, %623, %cst_193 {dimension_numbers = #tpu.dot_dimension_numbers<[1], [0], [0], [1], [0, 0, 1, 1], [], []>} : vector<64x64xf32>, vector<64x256xf32>, vector<64x256xf32> -> vector<64x256xf32>
    %c0_194 = arith.constant 0 : index
    %c0_195 = arith.constant 0 : index
    %625 = vector.load %arg11[%c0_194, %c0_195] : memref<64x256xf32, #tpu.memory_space<vmem>>, vector<64x256xf32>
    %cst_196 = arith.constant 0.000000e+00 : f32
    %626 = vector.broadcast %cst_196 : f32 to vector<8x64xf32>
    %cst_197 = arith.constant 0.000000e+00 : f32
    %627 = vector.broadcast %cst_197 : f32 to vector<8x64xf32>
    %cst_198 = arith.constant dense<0.000000e+00> : vector<8x256xf32>
    %628 = tpu.matmul %626, %625, %cst_198 {dimension_numbers = #tpu.dot_dimension_numbers<[1], [0], [0], [1], [0, 0, 1, 1], [], []>} : vector<8x64xf32>, vector<64x256xf32>, vector<8x256xf32> -> vector<8x256xf32>
    %629 = vector.extract_strided_slice %621 {offsets = [0, 0], sizes = [8, 256], strides = [1, 1]} : vector<64x256xf32> to vector<8x256xf32>
    %630 = arith.addf %628, %629 : vector<8x256xf32>
    %631 = vector.extract_strided_slice %624 {offsets = [56, 0], sizes = [8, 256], strides = [1, 1]} : vector<64x256xf32> to vector<8x256xf32>
    %632 = arith.addf %630, %631 : vector<8x256xf32>
    %633 = arith.negf %632 : vector<8x256xf32>
    %634 = math.exp %633 : vector<8x256xf32>
    %cst_199 = arith.constant 1.000000e+00 : f32
    %635 = vector.broadcast %cst_199 : f32 to vector<8x256xf32>
    %636 = arith.addf %635, %634 : vector<8x256xf32>
    %637 = arith.divf %635, %636 : vector<8x256xf32>
    %638 = vector.extract_strided_slice %632 {offsets = [0, 128], sizes = [8, 64], strides = [1, 1]} : vector<8x256xf32> to vector<8x64xf32>
    %639 = math.tanh %638 : vector<8x64xf32>
    %640 = vector.extract_strided_slice %637 {offsets = [0, 64], sizes = [8, 64], strides = [1, 1]} : vector<8x256xf32> to vector<8x64xf32>
    %641 = arith.mulf %640, %627 : vector<8x64xf32>
    %642 = vector.extract_strided_slice %637 {offsets = [0, 0], sizes = [8, 64], strides = [1, 1]} : vector<8x256xf32> to vector<8x64xf32>
    %643 = arith.mulf %642, %639 : vector<8x64xf32>
    %644 = arith.addf %641, %643 : vector<8x64xf32>
    %645 = vector.extract_strided_slice %637 {offsets = [0, 192], sizes = [8, 64], strides = [1, 1]} : vector<8x256xf32> to vector<8x64xf32>
    %646 = math.tanh %644 : vector<8x64xf32>
    %647 = arith.mulf %645, %646 : vector<8x64xf32>
    %648 = vector.extract_strided_slice %647 {offsets = [0, 32], sizes = [8, 32], strides = [1, 1]} : vector<8x64xf32> to vector<8x32xf32>
    %c56_200 = arith.constant 56 : index
    %c32_201 = arith.constant 32 : index
    %649 = vector.load %arg17[%c56_200, %c32_201] : memref<64x64xf32, #tpu.memory_space<vmem>>, vector<8x32xf32>
    tpu.vector_store %arg17[%c56_200, %c32_201], %648 {strides = array<i32>} : memref<64x64xf32, #tpu.memory_space<vmem>>, vector<8x32xf32>,
    %cst_202 = arith.constant dense<0.000000e+00> : vector<8x256xf32>
    %650 = tpu.matmul %647, %625, %cst_202 {dimension_numbers = #tpu.dot_dimension_numbers<[1], [0], [0], [1], [0, 0, 1, 1], [], []>} : vector<8x64xf32>, vector<64x256xf32>, vector<8x256xf32> -> vector<8x256xf32>
    %651 = vector.extract_strided_slice %621 {offsets = [8, 0], sizes = [8, 256], strides = [1, 1]} : vector<64x256xf32> to vector<8x256xf32>
    %652 = arith.addf %650, %651 : vector<8x256xf32>
    %653 = vector.extract_strided_slice %624 {offsets = [48, 0], sizes = [8, 256], strides = [1, 1]} : vector<64x256xf32> to vector<8x256xf32>
    %654 = arith.addf %652, %653 : vector<8x256xf32>
    %655 = arith.negf %654 : vector<8x256xf32>
    %656 = math.exp %655 : vector<8x256xf32>
    %cst_203 = arith.constant 1.000000e+00 : f32
    %657 = vector.broadcast %cst_203 : f32 to vector<8x256xf32>
    %658 = arith.addf %657, %656 : vector<8x256xf32>
    %659 = arith.divf %657, %658 : vector<8x256xf32>
    %660 = vector.extract_strided_slice %654 {offsets = [0, 128], sizes = [8, 64], strides = [1, 1]} : vector<8x256xf32> to vector<8x64xf32>
    %661 = math.tanh %660 : vector<8x64xf32>
    %662 = vector.extract_strided_slice %659 {offsets = [0, 64], sizes = [8, 64], strides = [1, 1]} : vector<8x256xf32> to vector<8x64xf32>
    %663 = arith.mulf %662, %644 : vector<8x64xf32>
    %664 = vector.extract_strided_slice %659 {offsets = [0, 0], sizes = [8, 64], strides = [1, 1]} : vector<8x256xf32> to vector<8x64xf32>
    %665 = arith.mulf %664, %661 : vector<8x64xf32>
    %666 = arith.addf %663, %665 : vector<8x64xf32>
    %667 = vector.extract_strided_slice %659 {offsets = [0, 192], sizes = [8, 64], strides = [1, 1]} : vector<8x256xf32> to vector<8x64xf32>
    %668 = math.tanh %666 : vector<8x64xf32>
    %669 = arith.mulf %667, %668 : vector<8x64xf32>
    %cst_204 = arith.constant dense<0.000000e+00> : vector<8x256xf32>
    %670 = tpu.matmul %669, %625, %cst_204 {dimension_numbers = #tpu.dot_dimension_numbers<[1], [0], [0], [1], [0, 0, 1, 1], [], []>} : vector<8x64xf32>, vector<64x256xf32>, vector<8x256xf32> -> vector<8x256xf32>
    %671 = vector.extract_strided_slice %621 {offsets = [16, 0], sizes = [8, 256], strides = [1, 1]} : vector<64x256xf32> to vector<8x256xf32>
    %672 = arith.addf %670, %671 : vector<8x256xf32>
    %673 = vector.extract_strided_slice %624 {offsets = [40, 0], sizes = [8, 256], strides = [1, 1]} : vector<64x256xf32> to vector<8x256xf32>
    %674 = arith.addf %672, %673 : vector<8x256xf32>
    %675 = arith.negf %674 : vector<8x256xf32>
    %676 = math.exp %675 : vector<8x256xf32>
    %cst_205 = arith.constant 1.000000e+00 : f32
    %677 = vector.broadcast %cst_205 : f32 to vector<8x256xf32>
    %678 = arith.addf %677, %676 : vector<8x256xf32>
    %679 = arith.divf %677, %678 : vector<8x256xf32>
    %680 = vector.extract_strided_slice %674 {offsets = [0, 128], sizes = [8, 64], strides = [1, 1]} : vector<8x256xf32> to vector<8x64xf32>
    %681 = math.tanh %680 : vector<8x64xf32>
    %682 = vector.extract_strided_slice %679 {offsets = [0, 64], sizes = [8, 64], strides = [1, 1]} : vector<8x256xf32> to vector<8x64xf32>
    %683 = arith.mulf %682, %666 : vector<8x64xf32>
    %684 = vector.extract_strided_slice %679 {offsets = [0, 0], sizes = [8, 64], strides = [1, 1]} : vector<8x256xf32> to vector<8x64xf32>
    %685 = arith.mulf %684, %681 : vector<8x64xf32>
    %686 = arith.addf %683, %685 : vector<8x64xf32>
    %687 = vector.extract_strided_slice %679 {offsets = [0, 192], sizes = [8, 64], strides = [1, 1]} : vector<8x256xf32> to vector<8x64xf32>
    %688 = math.tanh %686 : vector<8x64xf32>
    %689 = arith.mulf %687, %688 : vector<8x64xf32>
    %cst_206 = arith.constant dense<0.000000e+00> : vector<8x256xf32>
    %690 = tpu.matmul %689, %625, %cst_206 {dimension_numbers = #tpu.dot_dimension_numbers<[1], [0], [0], [1], [0, 0, 1, 1], [], []>} : vector<8x64xf32>, vector<64x256xf32>, vector<8x256xf32> -> vector<8x256xf32>
    %691 = vector.extract_strided_slice %621 {offsets = [24, 0], sizes = [8, 256], strides = [1, 1]} : vector<64x256xf32> to vector<8x256xf32>
    %692 = arith.addf %690, %691 : vector<8x256xf32>
    %693 = vector.extract_strided_slice %624 {offsets = [32, 0], sizes = [8, 256], strides = [1, 1]} : vector<64x256xf32> to vector<8x256xf32>
    %694 = arith.addf %692, %693 : vector<8x256xf32>
    %695 = arith.negf %694 : vector<8x256xf32>
    %696 = math.exp %695 : vector<8x256xf32>
    %cst_207 = arith.constant 1.000000e+00 : f32
    %697 = vector.broadcast %cst_207 : f32 to vector<8x256xf32>
    %698 = arith.addf %697, %696 : vector<8x256xf32>
    %699 = arith.divf %697, %698 : vector<8x256xf32>
    %700 = vector.extract_strided_slice %694 {offsets = [0, 128], sizes = [8, 64], strides = [1, 1]} : vector<8x256xf32> to vector<8x64xf32>
    %701 = math.tanh %700 : vector<8x64xf32>
    %702 = vector.extract_strided_slice %699 {offsets = [0, 64], sizes = [8, 64], strides = [1, 1]} : vector<8x256xf32> to vector<8x64xf32>
    %703 = arith.mulf %702, %686 : vector<8x64xf32>
    %704 = vector.extract_strided_slice %699 {offsets = [0, 0], sizes = [8, 64], strides = [1, 1]} : vector<8x256xf32> to vector<8x64xf32>
    %705 = arith.mulf %704, %701 : vector<8x64xf32>
    %706 = arith.addf %703, %705 : vector<8x64xf32>
    %707 = vector.extract_strided_slice %699 {offsets = [0, 192], sizes = [8, 64], strides = [1, 1]} : vector<8x256xf32> to vector<8x64xf32>
    %708 = math.tanh %706 : vector<8x64xf32>
    %709 = arith.mulf %707, %708 : vector<8x64xf32>
    %cst_208 = arith.constant dense<0.000000e+00> : vector<8x256xf32>
    %710 = tpu.matmul %709, %625, %cst_208 {dimension_numbers = #tpu.dot_dimension_numbers<[1], [0], [0], [1], [0, 0, 1, 1], [], []>} : vector<8x64xf32>, vector<64x256xf32>, vector<8x256xf32> -> vector<8x256xf32>
    %711 = vector.extract_strided_slice %621 {offsets = [32, 0], sizes = [8, 256], strides = [1, 1]} : vector<64x256xf32> to vector<8x256xf32>
    %712 = arith.addf %710, %711 : vector<8x256xf32>
    %713 = vector.extract_strided_slice %624 {offsets = [24, 0], sizes = [8, 256], strides = [1, 1]} : vector<64x256xf32> to vector<8x256xf32>
    %714 = arith.addf %712, %713 : vector<8x256xf32>
    %715 = arith.negf %714 : vector<8x256xf32>
    %716 = math.exp %715 : vector<8x256xf32>
    %cst_209 = arith.constant 1.000000e+00 : f32
    %717 = vector.broadcast %cst_209 : f32 to vector<8x256xf32>
    %718 = arith.addf %717, %716 : vector<8x256xf32>
    %719 = arith.divf %717, %718 : vector<8x256xf32>
    %720 = vector.extract_strided_slice %714 {offsets = [0, 128], sizes = [8, 64], strides = [1, 1]} : vector<8x256xf32> to vector<8x64xf32>
    %721 = math.tanh %720 : vector<8x64xf32>
    %722 = vector.extract_strided_slice %719 {offsets = [0, 64], sizes = [8, 64], strides = [1, 1]} : vector<8x256xf32> to vector<8x64xf32>
    %723 = arith.mulf %722, %706 : vector<8x64xf32>
    %724 = vector.extract_strided_slice %719 {offsets = [0, 0], sizes = [8, 64], strides = [1, 1]} : vector<8x256xf32> to vector<8x64xf32>
    %725 = arith.mulf %724, %721 : vector<8x64xf32>
    %726 = arith.addf %723, %725 : vector<8x64xf32>
    %727 = vector.extract_strided_slice %719 {offsets = [0, 192], sizes = [8, 64], strides = [1, 1]} : vector<8x256xf32> to vector<8x64xf32>
    %728 = math.tanh %726 : vector<8x64xf32>
    %729 = arith.mulf %727, %728 : vector<8x64xf32>
    %cst_210 = arith.constant dense<0.000000e+00> : vector<8x256xf32>
    %730 = tpu.matmul %729, %625, %cst_210 {dimension_numbers = #tpu.dot_dimension_numbers<[1], [0], [0], [1], [0, 0, 1, 1], [], []>} : vector<8x64xf32>, vector<64x256xf32>, vector<8x256xf32> -> vector<8x256xf32>
    %731 = vector.extract_strided_slice %621 {offsets = [40, 0], sizes = [8, 256], strides = [1, 1]} : vector<64x256xf32> to vector<8x256xf32>
    %732 = arith.addf %730, %731 : vector<8x256xf32>
    %733 = vector.extract_strided_slice %624 {offsets = [16, 0], sizes = [8, 256], strides = [1, 1]} : vector<64x256xf32> to vector<8x256xf32>
    %734 = arith.addf %732, %733 : vector<8x256xf32>
    %735 = arith.negf %734 : vector<8x256xf32>
    %736 = math.exp %735 : vector<8x256xf32>
    %cst_211 = arith.constant 1.000000e+00 : f32
    %737 = vector.broadcast %cst_211 : f32 to vector<8x256xf32>
    %738 = arith.addf %737, %736 : vector<8x256xf32>
    %739 = arith.divf %737, %738 : vector<8x256xf32>
    %740 = vector.extract_strided_slice %734 {offsets = [0, 128], sizes = [8, 64], strides = [1, 1]} : vector<8x256xf32> to vector<8x64xf32>
    %741 = math.tanh %740 : vector<8x64xf32>
    %742 = vector.extract_strided_slice %739 {offsets = [0, 64], sizes = [8, 64], strides = [1, 1]} : vector<8x256xf32> to vector<8x64xf32>
    %743 = arith.mulf %742, %726 : vector<8x64xf32>
    %744 = vector.extract_strided_slice %739 {offsets = [0, 0], sizes = [8, 64], strides = [1, 1]} : vector<8x256xf32> to vector<8x64xf32>
    %745 = arith.mulf %744, %741 : vector<8x64xf32>
    %746 = arith.addf %743, %745 : vector<8x64xf32>
    %747 = vector.extract_strided_slice %739 {offsets = [0, 192], sizes = [8, 64], strides = [1, 1]} : vector<8x256xf32> to vector<8x64xf32>
    %748 = math.tanh %746 : vector<8x64xf32>
    %749 = arith.mulf %747, %748 : vector<8x64xf32>
    %cst_212 = arith.constant dense<0.000000e+00> : vector<8x256xf32>
    %750 = tpu.matmul %749, %625, %cst_212 {dimension_numbers = #tpu.dot_dimension_numbers<[1], [0], [0], [1], [0, 0, 1, 1], [], []>} : vector<8x64xf32>, vector<64x256xf32>, vector<8x256xf32> -> vector<8x256xf32>
    %751 = vector.extract_strided_slice %621 {offsets = [48, 0], sizes = [8, 256], strides = [1, 1]} : vector<64x256xf32> to vector<8x256xf32>
    %752 = arith.addf %750, %751 : vector<8x256xf32>
    %753 = vector.extract_strided_slice %624 {offsets = [8, 0], sizes = [8, 256], strides = [1, 1]} : vector<64x256xf32> to vector<8x256xf32>
    %754 = arith.addf %752, %753 : vector<8x256xf32>
    %755 = arith.negf %754 : vector<8x256xf32>
    %756 = math.exp %755 : vector<8x256xf32>
    %cst_213 = arith.constant 1.000000e+00 : f32
    %757 = vector.broadcast %cst_213 : f32 to vector<8x256xf32>
    %758 = arith.addf %757, %756 : vector<8x256xf32>
    %759 = arith.divf %757, %758 : vector<8x256xf32>
    %760 = vector.extract_strided_slice %754 {offsets = [0, 128], sizes = [8, 64], strides = [1, 1]} : vector<8x256xf32> to vector<8x64xf32>
    %761 = math.tanh %760 : vector<8x64xf32>
    %762 = vector.extract_strided_slice %759 {offsets = [0, 64], sizes = [8, 64], strides = [1, 1]} : vector<8x256xf32> to vector<8x64xf32>
    %763 = arith.mulf %762, %746 : vector<8x64xf32>
    %764 = vector.extract_strided_slice %759 {offsets = [0, 0], sizes = [8, 64], strides = [1, 1]} : vector<8x256xf32> to vector<8x64xf32>
    %765 = arith.mulf %764, %761 : vector<8x64xf32>
    %766 = arith.addf %763, %765 : vector<8x64xf32>
    %767 = vector.extract_strided_slice %759 {offsets = [0, 192], sizes = [8, 64], strides = [1, 1]} : vector<8x256xf32> to vector<8x64xf32>
    %768 = math.tanh %766 : vector<8x64xf32>
    %769 = arith.mulf %767, %768 : vector<8x64xf32>
    %cst_214 = arith.constant dense<0.000000e+00> : vector<8x256xf32>
    %770 = tpu.matmul %769, %625, %cst_214 {dimension_numbers = #tpu.dot_dimension_numbers<[1], [0], [0], [1], [0, 0, 1, 1], [], []>} : vector<8x64xf32>, vector<64x256xf32>, vector<8x256xf32> -> vector<8x256xf32>
    %771 = vector.extract_strided_slice %621 {offsets = [56, 0], sizes = [8, 256], strides = [1, 1]} : vector<64x256xf32> to vector<8x256xf32>
    %772 = arith.addf %770, %771 : vector<8x256xf32>
    %773 = vector.extract_strided_slice %624 {offsets = [0, 0], sizes = [8, 256], strides = [1, 1]} : vector<64x256xf32> to vector<8x256xf32>
    %774 = arith.addf %772, %773 : vector<8x256xf32>
    %775 = arith.negf %774 : vector<8x256xf32>
    %776 = math.exp %775 : vector<8x256xf32>
    %cst_215 = arith.constant 1.000000e+00 : f32
    %777 = vector.broadcast %cst_215 : f32 to vector<8x256xf32>
    %778 = arith.addf %777, %776 : vector<8x256xf32>
    %779 = arith.divf %777, %778 : vector<8x256xf32>
    %780 = vector.extract_strided_slice %774 {offsets = [0, 128], sizes = [8, 64], strides = [1, 1]} : vector<8x256xf32> to vector<8x64xf32>
    %781 = math.tanh %780 : vector<8x64xf32>
    %782 = vector.extract_strided_slice %779 {offsets = [0, 64], sizes = [8, 64], strides = [1, 1]} : vector<8x256xf32> to vector<8x64xf32>
    %783 = arith.mulf %782, %766 : vector<8x64xf32>
    %784 = vector.extract_strided_slice %779 {offsets = [0, 0], sizes = [8, 64], strides = [1, 1]} : vector<8x256xf32> to vector<8x64xf32>
    %785 = arith.mulf %784, %781 : vector<8x64xf32>
    %786 = arith.addf %783, %785 : vector<8x64xf32>
    %787 = vector.extract_strided_slice %779 {offsets = [0, 192], sizes = [8, 64], strides = [1, 1]} : vector<8x256xf32> to vector<8x64xf32>
    %788 = math.tanh %786 : vector<8x64xf32>
    %789 = arith.mulf %787, %788 : vector<8x64xf32>
    %790 = vector.extract_strided_slice %789 {offsets = [0, 0], sizes = [8, 32], strides = [1, 1]} : vector<8x64xf32> to vector<8x32xf32>
    %c56_216 = arith.constant 56 : index
    %c0_217 = arith.constant 0 : index
    %791 = vector.load %arg17[%c56_216, %c0_217] : memref<64x64xf32, #tpu.memory_space<vmem>>, vector<8x32xf32>
    tpu.vector_store %arg17[%c56_216, %c0_217], %790 {strides = array<i32>} : memref<64x64xf32, #tpu.memory_space<vmem>>, vector<8x32xf32>,
    %c56_218 = arith.constant 56 : index
    %c0_219 = arith.constant 0 : index
    %792 = vector.load %arg17[%c56_218, %c0_219] : memref<64x64xf32, #tpu.memory_space<vmem>>, vector<8x64xf32>
    %cst_220 = arith.constant 0.000000e+00 : f32
    %793 = vector.broadcast %cst_220 : f32 to vector<8x64xf32>
    %794 = arith.maximumf %792, %793 : vector<8x64xf32>
    %c0_221 = arith.constant 0 : index
    %c0_222 = arith.constant 0 : index
    %c0_223 = arith.constant 0 : index
    %795 = vector.load %arg13[%c0_221, %c0_222, %c0_223] : memref<4x1x64xf32, #tpu.memory_space<vmem>>, vector<1x1x64xf32>
    %796 = vector.shape_cast %795 : vector<1x1x64xf32> to vector<1x64xf32>
    %c1_224 = arith.constant 1 : index
    %c0_225 = arith.constant 0 : index
    %c0_226 = arith.constant 0 : index
    %797 = vector.load %arg13[%c1_224, %c0_225, %c0_226] : memref<4x1x64xf32, #tpu.memory_space<vmem>>, vector<1x1x64xf32>
    %798 = vector.shape_cast %797 : vector<1x1x64xf32> to vector<1x64xf32>
    %c2 = arith.constant 2 : index
    %c0_227 = arith.constant 0 : index
    %c0_228 = arith.constant 0 : index
    %799 = vector.load %arg13[%c2, %c0_227, %c0_228] : memref<4x1x64xf32, #tpu.memory_space<vmem>>, vector<1x1x64xf32>
    %800 = vector.shape_cast %799 : vector<1x1x64xf32> to vector<1x64xf32>
    %c3 = arith.constant 3 : index
    %c0_229 = arith.constant 0 : index
    %c0_230 = arith.constant 0 : index
    %801 = vector.load %arg13[%c3, %c0_229, %c0_230] : memref<4x1x64xf32, #tpu.memory_space<vmem>>, vector<1x1x64xf32>
    %802 = vector.shape_cast %801 : vector<1x1x64xf32> to vector<1x64xf32>
    %803 = vector.broadcast %800 : vector<1x64xf32> to vector<8x64xf32>
    %804 = arith.subf %794, %803 : vector<8x64xf32>
    %cst_231 = arith.constant 9.99999974E-6 : f32
    %805 = vector.broadcast %cst_231 : f32 to vector<1x64xf32>
    %806 = arith.addf %802, %805 : vector<1x64xf32>
    %807 = math.rsqrt %806 : vector<1x64xf32>
    %808 = vector.broadcast %807 : vector<1x64xf32> to vector<8x64xf32>
    %809 = arith.mulf %804, %808 : vector<8x64xf32>
    %810 = vector.broadcast %796 : vector<1x64xf32> to vector<8x64xf32>
    %811 = arith.mulf %809, %810 : vector<8x64xf32>
    %812 = vector.broadcast %798 : vector<1x64xf32> to vector<8x64xf32>
    %813 = arith.addf %811, %812 : vector<8x64xf32>
    %c0_232 = arith.constant 0 : index
    %c0_233 = arith.constant 0 : index
    %814 = vector.load %arg14[%c0_232, %c0_233] : memref<64x128xf32, #tpu.memory_space<vmem>>, vector<64x128xf32>
    %cst_234 = arith.constant dense<0.000000e+00> : vector<8x128xf32>
    %815 = tpu.matmul %813, %814, %cst_234 {dimension_numbers = #tpu.dot_dimension_numbers<[1], [0], [0], [1], [0, 0, 1, 1], [], []>} : vector<8x64xf32>, vector<64x128xf32>, vector<8x128xf32> -> vector<8x128xf32>
    %c0_235 = arith.constant 0 : index
    %c0_236 = arith.constant 0 : index
    %816 = vector.load %arg15[%c0_235, %c0_236] : memref<1x128xf32, #tpu.memory_space<vmem>>, vector<1x128xf32>
    %817 = vector.broadcast %816 : vector<1x128xf32> to vector<8x128xf32>
    %818 = arith.addf %815, %817 : vector<8x128xf32>
    %cst_237 = arith.constant dense<0xFF800000> : vector<8xf32>
    %819 = vector.multi_reduction <maximumf>, %818, %cst_237 [1] : vector<8x128xf32> to vector<8xf32>
    %820 = vector.shape_cast %819 : vector<8xf32> to vector<8x1xf32>
    %821 = vector.broadcast %820 : vector<8x1xf32> to vector<8x128xf32>
    %822 = arith.subf %818, %821 : vector<8x128xf32>
    %823 = math.exp %822 : vector<8x128xf32>
    %cst_238 = arith.constant dense<0.000000e+00> : vector<8xf32>
    %824 = vector.multi_reduction <add>, %823, %cst_238 [1] : vector<8x128xf32> to vector<8xf32>
    %825 = vector.shape_cast %824 : vector<8xf32> to vector<8x1xf32>
    %826 = math.log %825 : vector<8x1xf32>
    %827 = arith.addf %820, %826 : vector<8x1xf32>
    %828 = vector.broadcast %827 : vector<8x1xf32> to vector<8x128xf32>
    %829 = arith.subf %818, %828 : vector<8x128xf32>
    %c0_239 = arith.constant 0 : index
    %c0_240 = arith.constant 0 : index
    %830 = vector.load %arg16[%c0_239, %c0_240] : memref<8x128xf32, #tpu.memory_space<vmem>>, vector<8x128xf32>
    tpu.vector_store %arg16[%c0_239, %c0_240], %829 {strides = array<i32>} : memref<8x128xf32, #tpu.memory_space<vmem>>, vector<8x128xf32>,
    return
  }
}

</mosaic_0001>

<bundles_post_ra>
// kernel: squeeze.28
= control target key start
LH: loop header
LB: loop body
LE: loop exit
PB: predicated region body
PF: predicated region fallthrough
CT: control target
= control target key end

     0   :  { %s37_s8 = smov 32   ;;  %vm7_vm0 = vcmask 261120   ;;  %s38_s9 = smov 64   ;;  %s55_s0 = inlined_call_operand.vmem [shape: f32[128], index: 0, kind: input, shape index: {}]   ;;  %s56_s1 = inlined_call_operand.vmem [shape: f32[4,1,32], index: 1, kind: output, shape index: {}]  }
   0x1   :  { %v4_v0 = vld [vmem:[%s55_s0] sm:$0x1]  ;;  %s36_s0 = smov 96  }
   0x2   :  { %5 = vst [vmem:[#allocation1] sm:$0x1] %v4_v0 }
   0x9   :  { %v9_v1 = vld [vmem:[#allocation1] sm:$0x1]  }
   0xa   :  { %v21_v2 = vld [vmem:[#allocation1] sm:$0x1]   ;;  %10 = vrot.lane.b32.xlu0 %v9_v1, %s36_s0 }
   0xb   :  { %22 = vrot.lane.b32.xlu1 %v21_v2, %s37_s8  ;;  %v6_v3 = vld [vmem:[#allocation1] sm:$0x1]  }
   0xc   :  { %v15_v4 = vld [vmem:[#allocation1] sm:$0x1]   ;;  %8 = vst.msk [vmem:[#allocation0] sm:$0x1] %vm7_vm0, %v6_v3  }
   0xe   :  { %16 = vrot.lane.b32.xlu0 %v15_v4, %s38_s9 }
  0x7c   :  { %v11_v5 = vpop.permute.xlu0 %10  }
  0x7d   :  { %v23_v6 = vpop.permute.xlu1 %22   ;;  %14 = vst.msk [vmem:[#allocation0 + $0x1] sm:$0x1] %vm7_vm0, %v11_v5  }
  0x7e   :  { %26 = vst.msk [vmem:[#allocation0 + $0x3] sm:$0x1] %vm7_vm0, %v23_v6  }
  0x80   :  { %v17_v7 = vpop.permute.xlu0 %16  }
  0x81   :  { %20 = vst.msk [vmem:[#allocation0 + $0x2] sm:$0x1] %vm7_vm0, %v17_v7  }
  0x88   :  { %v30_v8 = vld [vmem:[#allocation0] sm:$0xf] }
  0x89   :  { %32 = vst [vmem:[%s56_s1] sm:$0xf] %v30_v8 }

// kernel: squeeze.26
= control target key start
LH: loop header
LB: loop body
LE: loop exit
PB: predicated region body
PF: predicated region fallthrough
CT: control target
= control target key end

     0   :  { %vm3_vm0 = vcmask 261120   ;;  %s399_s12 = smov 96   ;;  %s401_s15 = smov 32   ;;  %s552_s0 = inlined_call_operand.vmem [shape: f32[1,32,128], index: 0, kind: input, shape index: {}]   ;;  %s553_s1 = inlined_call_operand.vmem [shape: f32[32,4,1,32], index: 1, kind: output, shape index: {}]  }
   0x1   :  { %v357_v0 = vld [vmem:[%s552_s0 + $0x10] sm:$0xff]   ;;  %v27_v1 = vld [vmem:[%s552_s0] sm:$0xff]   ;;  %v358_v2 = vld [vmem:[%s552_s0 + $0x18] sm:$0xff]  }
   0x2   :  { %46 = vrot.lane.b32.xlu1 %v357_v0, %s399_s12  ;;  %28 = vrot.lane.b32.xlu0 %v27_v1, %s399_s12  ;;  %v356_v3 = vld [vmem:[%s552_s0 + $0x8] sm:$0xff]   ;;  %4 = vst.msk [vmem:[#allocation0] ss:$8 sm:$0xf] %vm3_vm0, %v27_v1   ;;  %s400_s0 = smov 64  }
   0x3   :  { %5 = vst.msk [vmem:[#allocation0] ss:$8 sm:$0xf0] %vm3_vm0, %v27_v1   ;;  %24 = vst.msk [vmem:[#allocation0 + $0xc0] ss:$8 sm:$0xf] %vm3_vm0, %v358_v2  }
   0x4   :  { %26 = vst.msk [vmem:[#allocation0 + $0xc0] ss:$8 sm:$0xf0] %vm3_vm0, %v358_v2   ;;  %17 = vst.msk [vmem:[#allocation0 + $0x80] ss:$8 sm:$0xf] %vm3_vm0, %v357_v0  }
   0x5   :  { %19 = vst.msk [vmem:[#allocation0 + $0x80] ss:$8 sm:$0xf0] %vm3_vm0, %v357_v0   ;;  %12 = vst.msk [vmem:[#allocation0 + $0x40] ss:$8 sm:$0xf0] %vm3_vm0, %v356_v3  }
   0x6   :  { %10 = vst.msk [vmem:[#allocation0 + $0x40] ss:$8 sm:$0xf] %vm3_vm0, %v356_v3   ;;  %55 = vrot.lane.b32.xlu1 %v358_v2, %s399_s12  ;;  %37 = vrot.lane.b32.xlu0 %v356_v3, %s399_s12 }
   0xa   :  { %72 = vrot.lane.b32.xlu1 %v356_v3, %s400_s0  ;;  %63 = vrot.lane.b32.xlu0 %v27_v1, %s400_s0 }
   0xe   :  { %90 = vrot.lane.b32.xlu1 %v358_v2, %s400_s0  ;;  %81 = vrot.lane.b32.xlu0 %v357_v0, %s400_s0 }
  0x12   :  { %107 = vrot.lane.b32.xlu1 %v356_v3, %s401_s15  ;;  %98 = vrot.lane.b32.xlu0 %v27_v1, %s401_s15 }
  0x16   :  { %125 = vrot.lane.b32.xlu1 %v358_v2, %s401_s15  ;;  %116 = vrot.lane.b32.xlu0 %v357_v0, %s401_s15 }
  0x74   :  { %v47_v4 = vpop.permute.xlu1 %46   ;;  %v29_v5 = vpop.permute.xlu0 %28  }
  0x75   :  { %50 = vst.msk [vmem:[#allocation0 + $0x81] ss:$8 sm:$0xf] %vm3_vm0, %v47_v4   ;;  %52 = vst.msk [vmem:[#allocation0 + $0x81] ss:$8 sm:$0xf0] %vm3_vm0, %v47_v4  }
  0x76   :  { %32 = vst.msk [vmem:[#allocation0 + $0x1] ss:$8 sm:$0xf] %vm3_vm0, %v29_v5   ;;  %34 = vst.msk [vmem:[#allocation0 + $0x1] ss:$8 sm:$0xf0] %vm3_vm0, %v29_v5  }
  0x78   :  { %v56_v6 = vpop.permute.xlu1 %55   ;;  %v38_v7 = vpop.permute.xlu0 %37  }
  0x79   :  { %59 = vst.msk [vmem:[#allocation0 + $0xc1] ss:$8 sm:$0xf] %vm3_vm0, %v56_v6   ;;  %61 = vst.msk [vmem:[#allocation0 + $0xc1] ss:$8 sm:$0xf0] %vm3_vm0, %v56_v6  }
  0x7a   :  { %41 = vst.msk [vmem:[#allocation0 + $0x41] ss:$8 sm:$0xf] %vm3_vm0, %v38_v7   ;;  %43 = vst.msk [vmem:[#allocation0 + $0x41] ss:$8 sm:$0xf0] %vm3_vm0, %v38_v7  }
  0x7c   :  { %v73_v8 = vpop.permute.xlu1 %72   ;;  %v64_v9 = vpop.permute.xlu0 %63  }
  0x7d   :  { %76 = vst.msk [vmem:[#allocation0 + $0x42] ss:$8 sm:$0xf] %vm3_vm0, %v73_v8   ;;  %78 = vst.msk [vmem:[#allocation0 + $0x42] ss:$8 sm:$0xf0] %vm3_vm0, %v73_v8  }
  0x7e   :  { %67 = vst.msk [vmem:[#allocation0 + $0x2] ss:$8 sm:$0xf] %vm3_vm0, %v64_v9   ;;  %69 = vst.msk [vmem:[#allocation0 + $0x2] ss:$8 sm:$0xf0] %vm3_vm0, %v64_v9  }
  0x80   :  { %v91_v10 = vpop.permute.xlu1 %90   ;;  %v82_v11 = vpop.permute.xlu0 %81  }
  0x81   :  { %94 = vst.msk [vmem:[#allocation0 + $0xc2] ss:$8 sm:$0xf] %vm3_vm0, %v91_v10   ;;  %96 = vst.msk [vmem:[#allocation0 + $0xc2] ss:$8 sm:$0xf0] %vm3_vm0, %v91_v10  }
  0x82   :  { %85 = vst.msk [vmem:[#allocation0 + $0x82] ss:$8 sm:$0xf] %vm3_vm0, %v82_v11   ;;  %87 = vst.msk [vmem:[#allocation0 + $0x82] ss:$8 sm:$0xf0] %vm3_vm0, %v82_v11  }
  0x84   :  { %v108_v12 = vpop.permute.xlu1 %107   ;;  %v99_v13 = vpop.permute.xlu0 %98  }
  0x85   :  { %111 = vst.msk [vmem:[#allocation0 + $0x43] ss:$8 sm:$0xf] %vm3_vm0, %v108_v12   ;;  %113 = vst.msk [vmem:[#allocation0 + $0x43] ss:$8 sm:$0xf0] %vm3_vm0, %v108_v12  }
  0x86   :  { %102 = vst.msk [vmem:[#allocation0 + $0x3] ss:$8 sm:$0xf] %vm3_vm0, %v99_v13   ;;  %104 = vst.msk [vmem:[#allocation0 + $0x3] ss:$8 sm:$0xf0] %vm3_vm0, %v99_v13  }
  0x88   :  { %v126_v14 = vpop.permute.xlu1 %125   ;;  %v117_v15 = vpop.permute.xlu0 %116  }
  0x89   :  { %129 = vst.msk [vmem:[#allocation0 + $0xc3] ss:$8 sm:$0xf] %vm3_vm0, %v126_v14   ;;  %131 = vst.msk [vmem:[#allocation0 + $0xc3] ss:$8 sm:$0xf0] %vm3_vm0, %v126_v14  }
  0x8a   :  { %120 = vst.msk [vmem:[#allocation0 + $0x83] ss:$8 sm:$0xf] %vm3_vm0, %v117_v15   ;;  %122 = vst.msk [vmem:[#allocation0 + $0x83] ss:$8 sm:$0xf0] %vm3_vm0, %v117_v15  }
  0x8c   :  { %v180_v16 = vld [vmem:[#allocation0 + $0x40] sm:$0xf]  ;;  %v186_v17 = vld [vmem:[#allocation0 + $0x48] sm:$0xf]  ;;  %v192_v18 = vld [vmem:[#allocation0 + $0x50] sm:$0xf] }
  0x8d   :  { %372 = vst [vmem:[%s553_s1 + $0x20] sm:$0xf] %v180_v16  ;;  %373 = vst [vmem:[%s553_s1 + $0x24] sm:$0xf] %v186_v17  ;;  %v198_v19 = vld [vmem:[#allocation0 + $0x58] sm:$0xf] }
  0x8e   :  { %374 = vst [vmem:[%s553_s1 + $0x28] sm:$0xf] %v192_v18  ;;  %v204_v20 = vld [vmem:[#allocation0 + $0x60] sm:$0xf]  ;;  %v210_v21 = vld [vmem:[#allocation0 + $0x68] sm:$0xf] }
  0x8f   :  { %375 = vst [vmem:[%s553_s1 + $0x2c] sm:$0xf] %v198_v19  ;;  %v216_v22 = vld [vmem:[#allocation0 + $0x70] sm:$0xf]  ;;  %v222_v23 = vld [vmem:[#allocation0 + $0x78] sm:$0xf] }
  0x90   :  { %v135_v24 = vld [vmem:[#allocation0] sm:$0xf]  ;;  %376 = vst [vmem:[%s553_s1 + $0x30] sm:$0xf] %v204_v20  ;;  %377 = vst [vmem:[%s553_s1 + $0x34] sm:$0xf] %v210_v21 }
  0x91   :  { %137 = vst [vmem:[%s553_s1] sm:$0xf] %v135_v24  ;;  %v139_v25 = vld [vmem:[#allocation0 + $0x8] sm:$0xf]  ;;  %v144_v26 = vld [vmem:[#allocation0 + $0x10] sm:$0xf] }
  0x92   :  { %v150_v27 = vld [vmem:[#allocation0 + $0x18] sm:$0xf]  ;;  %378 = vst [vmem:[%s553_s1 + $0x38] sm:$0xf] %v216_v22  ;;  %379 = vst [vmem:[%s553_s1 + $0x3c] sm:$0xf] %v222_v23 }
  0x93   :  { %365 = vst [vmem:[%s553_s1 + $0x4] sm:$0xf] %v139_v25  ;;  %366 = vst [vmem:[%s553_s1 + $0x8] sm:$0xf] %v144_v26  ;;  %v156_v28 = vld [vmem:[#allocation0 + $0x20] sm:$0xf] }
  0x94   :  { %367 = vst [vmem:[%s553_s1 + $0xc] sm:$0xf] %v150_v27  ;;  %v162_v29 = vld [vmem:[#allocation0 + $0x28] sm:$0xf]  ;;  %v168_v30 = vld [vmem:[#allocation0 + $0x30] sm:$0xf] }
  0x95   :  { %368 = vst [vmem:[%s553_s1 + $0x10] sm:$0xf] %v156_v28  ;;  %369 = vst [vmem:[%s553_s1 + $0x14] sm:$0xf] %v162_v29  ;;  %v174_v31 = vld [vmem:[#allocation0 + $0x38] sm:$0xf] }
  0x96   :  { %370 = vst [vmem:[%s553_s1 + $0x18] sm:$0xf] %v168_v30  ;;  %v276_v32 = vld [vmem:[#allocation0 + $0xc0] sm:$0xf]  ;;  %v282_v33 = vld [vmem:[#allocation0 + $0xc8] sm:$0xf] }
  0x97   :  { %371 = vst [vmem:[%s553_s1 + $0x1c] sm:$0xf] %v174_v31  ;;  %388 = vst [vmem:[%s553_s1 + $0x60] sm:$0xf] %v276_v32  ;;  %v288_v34 = vld [vmem:[#allocation0 + $0xd0] sm:$0xf] }
  0x98   :  { %389 = vst [vmem:[%s553_s1 + $0x64] sm:$0xf] %v282_v33  ;;  %v294_v35 = vld [vmem:[#allocation0 + $0xd8] sm:$0xf]  ;;  %v300_v36 = vld [vmem:[#allocation0 + $0xe0] sm:$0xf] }
  0x99   :  { %390 = vst [vmem:[%s553_s1 + $0x68] sm:$0xf] %v288_v34  ;;  %391 = vst [vmem:[%s553_s1 + $0x6c] sm:$0xf] %v294_v35  ;;  %v306_v37 = vld [vmem:[#allocation0 + $0xe8] sm:$0xf] }
  0x9a   :  { %392 = vst [vmem:[%s553_s1 + $0x70] sm:$0xf] %v300_v36  ;;  %v312_v38 = vld [vmem:[#allocation0 + $0xf0] sm:$0xf]  ;;  %v318_v39 = vld [vmem:[#allocation0 + $0xf8] sm:$0xf] }
  0x9b   :  { %393 = vst [vmem:[%s553_s1 + $0x74] sm:$0xf] %v306_v37  ;;  %394 = vst [vmem:[%s553_s1 + $0x78] sm:$0xf] %v312_v38  ;;  %v228_v40 = vld [vmem:[#allocation0 + $0x80] sm:$0xf] }
  0x9c   :  { %395 = vst [vmem:[%s553_s1 + $0x7c] sm:$0xf] %v318_v39  ;;  %v234_v41 = vld [vmem:[#allocation0 + $0x88] sm:$0xf]  ;;  %v240_v42 = vld [vmem:[#allocation0 + $0x90] sm:$0xf] }
  0x9d   :  { %380 = vst [vmem:[%s553_s1 + $0x40] sm:$0xf] %v228_v40  ;;  %381 = vst [vmem:[%s553_s1 + $0x44] sm:$0xf] %v234_v41  ;;  %v246_v43 = vld [vmem:[#allocation0 + $0x98] sm:$0xf] }
  0x9e   :  { %382 = vst [vmem:[%s553_s1 + $0x48] sm:$0xf] %v240_v42  ;;  %v252_v44 = vld [vmem:[#allocation0 + $0xa0] sm:$0xf]  ;;  %v258_v45 = vld [vmem:[#allocation0 + $0xa8] sm:$0xf] }
  0x9f   :  { %383 = vst [vmem:[%s553_s1 + $0x4c] sm:$0xf] %v246_v43  ;;  %384 = vst [vmem:[%s553_s1 + $0x50] sm:$0xf] %v252_v44  ;;  %v264_v46 = vld [vmem:[#allocation0 + $0xb0] sm:$0xf] }
  0xa0   :  { %385 = vst [vmem:[%s553_s1 + $0x54] sm:$0xf] %v258_v45  ;;  %v270_v47 = vld [vmem:[#allocation0 + $0xb8] sm:$0xf]  ;;  %386 = vst [vmem:[%s553_s1 + $0x58] sm:$0xf] %v264_v46 }
  0xa1   :  { %387 = vst [vmem:[%s553_s1 + $0x5c] sm:$0xf] %v270_v47 }

// kernel: squeeze.24
= control target key start
LH: loop header
LB: loop body
LE: loop exit
PB: predicated region body
PF: predicated region fallthrough
CT: control target
= control target key end

     0   :  { %vm3_vm0 = vcmask 261120   ;;  %s196_s10 = smov 96   ;;  %s197_s11 = smov 32   ;;  %s278_s0 = inlined_call_operand.vmem [shape: f32[1,16,128], index: 0, kind: input, shape index: {}]   ;;  %s279_s1 = inlined_call_operand.vmem [shape: f32[16,4,1,32], index: 1, kind: output, shape index: {}]  }
   0x1   :  { %v30_v0 = vld [vmem:[%s278_s0] sm:$0xff]   ;;  %v175_v1 = vld [vmem:[%s278_s0 + $0x8] sm:$0xff]   ;;  %s195_s0 = smov 64  }
   0x2   :  { %31 = vrot.lane.b32.xlu1 %v30_v0, %s195_s0  ;;  %14 = vrot.lane.b32.xlu0 %v30_v0, %s196_s10  ;;  %10 = vst.msk [vmem:[#allocation0 + $0x40] ss:$8 sm:$0xf] %vm3_vm0, %v175_v1   ;;  %12 = vst.msk [vmem:[#allocation0 + $0x40] ss:$8 sm:$0xf0] %vm3_vm0, %v175_v1  }
   0x3   :  { %4 = vst.msk [vmem:[#allocation0] ss:$8 sm:$0xf] %vm3_vm0, %v30_v0   ;;  %5 = vst.msk [vmem:[#allocation0] ss:$8 sm:$0xf0] %vm3_vm0, %v30_v0  }
   0x6   :  { %40 = vrot.lane.b32.xlu1 %v175_v1, %s195_s0  ;;  %23 = vrot.lane.b32.xlu0 %v175_v1, %s196_s10 }
   0xa   :  { %57 = vrot.lane.b32.xlu1 %v175_v1, %s197_s11  ;;  %48 = vrot.lane.b32.xlu0 %v30_v0, %s197_s11 }
  0x74   :  { %v32_v2 = vpop.permute.xlu1 %31   ;;  %v15_v3 = vpop.permute.xlu0 %14  }
  0x75   :  { %35 = vst.msk [vmem:[#allocation0 + $0x2] ss:$8 sm:$0xf] %vm3_vm0, %v32_v2   ;;  %37 = vst.msk [vmem:[#allocation0 + $0x2] ss:$8 sm:$0xf0] %vm3_vm0, %v32_v2  }
  0x76   :  { %18 = vst.msk [vmem:[#allocation0 + $0x1] ss:$8 sm:$0xf] %vm3_vm0, %v15_v3   ;;  %20 = vst.msk [vmem:[#allocation0 + $0x1] ss:$8 sm:$0xf0] %vm3_vm0, %v15_v3  }
  0x78   :  { %v41_v4 = vpop.permute.xlu1 %40   ;;  %v24_v5 = vpop.permute.xlu0 %23  }
  0x79   :  { %44 = vst.msk [vmem:[#allocation0 + $0x42] ss:$8 sm:$0xf] %vm3_vm0, %v41_v4   ;;  %46 = vst.msk [vmem:[#allocation0 + $0x42] ss:$8 sm:$0xf0] %vm3_vm0, %v41_v4  }
  0x7a   :  { %27 = vst.msk [vmem:[#allocation0 + $0x41] ss:$8 sm:$0xf] %vm3_vm0, %v24_v5   ;;  %29 = vst.msk [vmem:[#allocation0 + $0x41] ss:$8 sm:$0xf0] %vm3_vm0, %v24_v5  }
  0x7c   :  { %v58_v6 = vpop.permute.xlu1 %57   ;;  %v49_v7 = vpop.permute.xlu0 %48  }
  0x7d   :  { %61 = vst.msk [vmem:[#allocation0 + $0x43] ss:$8 sm:$0xf] %vm3_vm0, %v58_v6   ;;  %63 = vst.msk [vmem:[#allocation0 + $0x43] ss:$8 sm:$0xf0] %vm3_vm0, %v58_v6  }
  0x7e   :  { %52 = vst.msk [vmem:[#allocation0 + $0x3] ss:$8 sm:$0xf] %vm3_vm0, %v49_v7   ;;  %54 = vst.msk [vmem:[#allocation0 + $0x3] ss:$8 sm:$0xf0] %vm3_vm0, %v49_v7  }
  0x84   :  { %v112_v8 = vld [vmem:[#allocation0 + $0x40] sm:$0xf]  ;;  %v118_v9 = vld [vmem:[#allocation0 + $0x48] sm:$0xf]  ;;  %v124_v10 = vld [vmem:[#allocation0 + $0x50] sm:$0xf] }
  0x85   :  { %184 = vst [vmem:[%s279_s1 + $0x20] sm:$0xf] %v112_v8  ;;  %185 = vst [vmem:[%s279_s1 + $0x24] sm:$0xf] %v118_v9  ;;  %v130_v11 = vld [vmem:[#allocation0 + $0x58] sm:$0xf] }
  0x86   :  { %186 = vst [vmem:[%s279_s1 + $0x28] sm:$0xf] %v124_v10  ;;  %v136_v12 = vld [vmem:[#allocation0 + $0x60] sm:$0xf]  ;;  %v142_v13 = vld [vmem:[#allocation0 + $0x68] sm:$0xf] }
  0x87   :  { %187 = vst [vmem:[%s279_s1 + $0x2c] sm:$0xf] %v130_v11  ;;  %188 = vst [vmem:[%s279_s1 + $0x30] sm:$0xf] %v136_v12  ;;  %v148_v14 = vld [vmem:[#allocation0 + $0x70] sm:$0xf] }
  0x88   :  { %189 = vst [vmem:[%s279_s1 + $0x34] sm:$0xf] %v142_v13  ;;  %v154_v15 = vld [vmem:[#allocation0 + $0x78] sm:$0xf]  ;;  %v67_v16 = vld [vmem:[#allocation0] sm:$0xf] }
  0x89   :  { %190 = vst [vmem:[%s279_s1 + $0x38] sm:$0xf] %v148_v14  ;;  %191 = vst [vmem:[%s279_s1 + $0x3c] sm:$0xf] %v154_v15  ;;  %v71_v17 = vld [vmem:[#allocation0 + $0x8] sm:$0xf] }
  0x8a   :  { %69 = vst [vmem:[%s279_s1] sm:$0xf] %v67_v16  ;;  %v76_v18 = vld [vmem:[#allocation0 + $0x10] sm:$0xf]  ;;  %v82_v19 = vld [vmem:[#allocation0 + $0x18] sm:$0xf] }
  0x8b   :  { %177 = vst [vmem:[%s279_s1 + $0x4] sm:$0xf] %v71_v17  ;;  %178 = vst [vmem:[%s279_s1 + $0x8] sm:$0xf] %v76_v18  ;;  %v88_v20 = vld [vmem:[#allocation0 + $0x20] sm:$0xf] }
  0x8c   :  { %179 = vst [vmem:[%s279_s1 + $0xc] sm:$0xf] %v82_v19  ;;  %v94_v21 = vld [vmem:[#allocation0 + $0x28] sm:$0xf]  ;;  %v100_v22 = vld [vmem:[#allocation0 + $0x30] sm:$0xf] }
  0x8d   :  { %180 = vst [vmem:[%s279_s1 + $0x10] sm:$0xf] %v88_v20  ;;  %181 = vst [vmem:[%s279_s1 + $0x14] sm:$0xf] %v94_v21  ;;  %v106_v23 = vld [vmem:[#allocation0 + $0x38] sm:$0xf] }
  0x8e   :  { %182 = vst [vmem:[%s279_s1 + $0x18] sm:$0xf] %v100_v22  ;;  %183 = vst [vmem:[%s279_s1 + $0x1c] sm:$0xf] %v106_v23 }

// kernel: sequence_classifier_forward.1
= control target key start
LH: loop header
LB: loop body
LE: loop exit
PB: predicated region body
PF: predicated region fallthrough
CT: control target
= control target key end

     0   :  { %v6181_v3 = vmov 0.0   ;;  %vm77_vm0 = vcmask 130048   ;;  %v67_v45 = vlaneseq  ;;  %vm452_vm1 = vcmask 261120   ;;  %s7573_s1 = inlined_call_operand.vmem [shape: f32[2,16,256], index: 1, kind: input, shape index: {}]   ;;  %s7574_s0 = inlined_call_operand.vmem [shape: f32[64,16], index: 0, kind: input, shape index: {}]   ;;  %s7575_s2 = inlined_call_operand.vmem [shape: f32[64,256], index: 2, kind: input, shape index: {}]   ;;  %s7576_s3 = inlined_call_operand.vmem [shape: f32[1,256], index: 3, kind: input, shape index: {}]   ;;  %s7577_s4 = inlined_call_operand.vmem [shape: f32[2,64,256], index: 4, kind: input, shape index: {}]   ;;  %s7578_s5 = inlined_call_operand.vmem [shape: f32[64,256], index: 5, kind: input, shape index: {}]   ;;  %s7579_s6 = inlined_call_operand.vmem [shape: f32[1,256], index: 6, kind: input, shape index: {}]   ;;  %s7580_s7 = inlined_call_operand.vmem [shape: f32[2,64,256], index: 7, kind: input, shape index: {}]   ;;  %s7581_s8 = inlined_call_operand.vmem [shape: f32[64,256], index: 8, kind: input, shape index: {}]   ;;  %s7582_s9 = inlined_call_operand.vmem [shape: f32[1,256], index: 9, kind: input, shape index: {}]   ;;  %s7583_s10 = inlined_call_operand.vmem [shape: f32[2,64,256], index: 10, kind: input, shape index: {}]   ;;  %s7584_s11 = inlined_call_operand.vmem [shape: f32[64,256], index: 11, kind: input, shape index: {}]   ;;  %s7585_s12 = inlined_call_operand.vmem [shape: f32[1,256], index: 12, kind: input, shape index: {}]   ;;  %s7586_s14 = inlined_call_operand.vmem [shape: f32[64,128], index: 14, kind: input, shape index: {}]   ;;  %s7587_s13 = inlined_call_operand.vmem [shape: f32[4,1,64], index: 13, kind: input, shape index: {}]   ;;  %s7588_s15 = inlined_call_operand.vmem [shape: f32[1,128], index: 15, kind: input, shape index: {}]   ;;  %s7589_s16 = inlined_call_operand.vmem [shape: f32[8,128], index: 16, kind: output, shape index: {}]  }
   0x1   :  { %7591 = sst [smem:[#allocation3_spill]] %s7573_s1  ;;  %166 = vmatprep.mubr.f32.mxu0 %v6181_v3  ;;  %1301 = vmatprep.mubr.f32.mxu1 %v6181_v3  ;;  %v53_v12 = vld [vmem:[%s7574_s0] sm:$0xff]  ;;  %v334_v14 = vld [vmem:[%s7575_s2 + $0x8] sm:$0xff]  ;;  %v336_v15 = vld [vmem:[%s7575_s2 + $0x18] sm:$0xff]  ;;  %vm454_vm2 = vcmask 523520   ;;  %vm349_vm3 = vcmask 523264  }
   0x2   :  { %s7592_s23 = sld [smem:[#allocation3_spill]]  ;;  %v6305_v16 = vpack.c.bf16 %v336_v15, %v334_v14  ;;  %v54_v17 = vld [vmem:[%s7574_s0 + $0x8] sm:$0xff]  ;;  %v55_v18 = vld [vmem:[%s7574_s0 + $0x10] sm:$0xff]  ;;  %v56_v19 = vld [vmem:[%s7574_s0 + $0x18] sm:$0xff]  ;;  %v68_v46 = vshrl.u32 %v67_v45, 7  ;;  %vm6184_vm4 = vmmov 0  }
   0x3   :  { %v57_v20 = vld [vmem:[%s7574_s0 + $0x20] sm:$0xff]  ;;  %v58_v21 = vld [vmem:[%s7574_s0 + $0x28] sm:$0xff]  ;;  %v59_v22 = vld [vmem:[%s7574_s0 + $0x30] sm:$0xff] }
   0x4   :  { %v60_v23 = vld [vmem:[%s7574_s0 + $0x38] sm:$0xff]  ;;  %v333_v24 = vld [vmem:[%s7575_s2] sm:$0xff]  ;;  %v335_v25 = vld [vmem:[%s7575_s2 + $0x10] sm:$0xff]  ;;  %v6435_v47 = vsub.s32 0, %v68_v46  ;;  %v6444_v54 = vsub.s32 1, %v68_v46 }
   0x5   :  { %v338_v26 = vld [vmem:[%s7575_s2 + $0x28] sm:$0xff]  ;;  %v340_v27 = vld [vmem:[%s7575_s2 + $0x38] sm:$0xff]  ;;  %v6357_v28 = vpack.c.bf16 %v335_v25, %v333_v24  ;;  %v337_v30 = vld [vmem:[%s7575_s2 + $0x20] sm:$0xff] }
   0x6   :  { %v6359_v29 = vpack.c.bf16 %v340_v27, %v338_v26  ;;  %v339_v31 = vld [vmem:[%s7575_s2 + $0x30] sm:$0xff]  ;;  %v342_v32 = vld [vmem:[%s7575_s2 + $0x48] sm:$0xff]  ;;  %v344_v33 = vld [vmem:[%s7575_s2 + $0x58] sm:$0xff] }
   0x7   :  { %v6376_v34 = vpack.c.bf16 %v339_v31, %v337_v30  ;;  %v6379_v35 = vpack.c.bf16 %v344_v33, %v342_v32  ;;  %v341_v36 = vld [vmem:[%s7575_s2 + $0x40] sm:$0xff]  ;;  %v343_v37 = vld [vmem:[%s7575_s2 + $0x50] sm:$0xff]  ;;  %v346_v38 = vld [vmem:[%s7575_s2 + $0x68] sm:$0xff] }
   0x8   :  { %v62_v0 = vld [vmem:[%s7592_s23 + $0x8] sm:$0xff]  ;;  %v64_v1 = vld [vmem:[%s7592_s23 + $0x18] sm:$0xff]  ;;  %v61_v2 = vld [vmem:[%s7592_s23] sm:$0xff]  ;;  %v6396_v40 = vpack.c.bf16 %v343_v37, %v341_v36 }
   0x9   :  { %v4967_v4 = vpack.c.bf16 %v64_v1, %v62_v0  ;;  %v63_v5 = vld [vmem:[%s7592_s23 + $0x10] sm:$0xff]  ;;  %v4732_v6 = vld [vmem:[%s7592_s23 + $0x28] sm:$0xff]  ;;  %v4734_v8 = vld [vmem:[%s7592_s23 + $0x38] sm:$0xff] }
   0xa   :  { %v4969_v7 = vpack.c.bf16 %v63_v5, %v61_v2  ;;  %v4731_v9 = vld [vmem:[%s7592_s23 + $0x20] sm:$0xff]  ;;  %v4733_v10 = vld [vmem:[%s7592_s23 + $0x30] sm:$0xff]  ;;  %v4971_v11 = vpack.c.bf16 %v4734_v8, %v4732_v6  ;;  %v348_v39 = vld [vmem:[%s7575_s2 + $0x78] sm:$0xff] }
   0xb   :  { %4968 = vmatprep.subr.bf16.mxu0 %v4967_v4  ;;  %v4973_v13 = vpack.c.bf16 %v4733_v10, %v4731_v9  ;;  %v6399_v41 = vpack.c.bf16 %v348_v39, %v346_v38  ;;  %v345_v42 = vld [vmem:[%s7575_s2 + $0x60] sm:$0xff]  ;;  %v347_v43 = vld [vmem:[%s7575_s2 + $0x70] sm:$0xff] }
   0xc   :  { %4970 = vmatpush1.bf16.msra.mxu0 %v4969_v7  ;;  %v6410_v44 = vpack.c.bf16 %v347_v43, %v345_v42  ;;  %v65_v48 = vld [vmem:[%s7576_s3] sm:$0x3]  ;;  %s6182_s3 = smov 64  }
   0xd   :  { %4972 = vmatprep.subr.bf16.mxu0 %v4971_v11  ;;  %v6441_v49 = vrot.slane %v65_v48, %v6435_v47  ;;  %v6447_v55 = vrot.slane %v65_v48, %v6444_v54 }
   0xf   :  { %4723 = vmatmul.mubr.msk.f32.vlgmr.msra.gmra.mrb[0].mxu0 %vm77_vm0, %v53_v12 }
  0x10   :  { %4974 = vmatpush1.bf16.msra.mxu0 %v4973_v13  ;;  %172 = vmatprep.mubr.f32.mxu0 %v6181_v3 }
  0x11   :  { %4976 = vmatprep.subr.bf16.mxu0 %v6305_v16 }
  0x13   :  { %4724 = vmatmul.mubr.msk.f32.gmra.mrb[2].mxu0 %vm77_vm0, %v54_v17 }
  0x14   :  { %178 = vmatprep.mubr.f32.mxu0 %v6181_v3 }
  0x17   :  { %4725 = vmatmul.mubr.msk.f32.gmra.mrb[4].mxu0 %vm77_vm0, %v55_v18 }
  0x18   :  { %184 = vmatprep.mubr.f32.mxu0 %v6181_v3 }
  0x1b   :  { %4726 = vmatmul.mubr.msk.f32.gmra.mrb[6].mxu0 %vm77_vm0, %v56_v19 }
  0x1c   :  { %190 = vmatprep.mubr.f32.mxu0 %v6181_v3 }
  0x1f   :  { %4727 = vmatmul.mubr.msk.f32.gmra.mrb[8].mxu0 %vm77_vm0, %v57_v20 }
  0x20   :  { %196 = vmatprep.mubr.f32.mxu0 %v6181_v3 }
  0x23   :  { %4728 = vmatmul.mubr.msk.f32.gmra.mrb[10].mxu0 %vm77_vm0, %v58_v21 }
  0x24   :  { %202 = vmatprep.mubr.f32.mxu0 %v6181_v3 }
  0x27   :  { %4729 = vmatmul.mubr.msk.f32.gmra.mrb[12].mxu0 %vm77_vm0, %v59_v22 }
  0x28   :  { %208 = vmatprep.mubr.f32.mxu0 %v6181_v3 }
  0x2b   :  { %4730 = vmatmul.mubr.msk.f32.gmra.mrb[14].mxu0 %vm77_vm0, %v60_v23 }
  0x2c   :  { %284 = vmatprep.mubr.f32.mxu0 %v6181_v3 }
  0x33   :  { %4735 = vmatmul.mubr.msk.f32.vlgmr.msra.gmra.mrb[14].mxu0 %vm77_vm0, %v53_v12 }
  0x34   :  { %4978 = vmatpush1.bf16.msra.mxu0 %v6357_v28  ;;  %290 = vmatprep.mubr.f32.mxu0 %v6181_v3 }
  0x35   :  { %4980 = vmatprep.subr.bf16.mxu0 %v6359_v29 }
  0x37   :  { %4736 = vmatmul.mubr.msk.f32.gmra.mrb[12].mxu0 %vm77_vm0, %v54_v17 }
  0x38   :  { %296 = vmatprep.mubr.f32.mxu0 %v6181_v3  ;;  %4982 = vmatpush1.bf16.msra.mxu0 %v6376_v34 }
  0x39   :  { %4984 = vmatprep.subr.bf16.mxu0 %v6379_v35 }
  0x3b   :  { %4737 = vmatmul.mubr.msk.f32.gmra.mrb[10].mxu0 %vm77_vm0, %v55_v18 }
  0x3c   :  { %302 = vmatprep.mubr.f32.mxu0 %v6181_v3  ;;  %4986 = vmatpush1.bf16.msra.mxu0 %v6396_v40 }
  0x3d   :  { %4988 = vmatprep.subr.bf16.mxu0 %v6399_v41 }
  0x3f   :  { %4738 = vmatmul.mubr.msk.f32.gmra.mrb[8].mxu0 %vm77_vm0, %v56_v19 }
  0x40   :  { %308 = vmatprep.mubr.f32.mxu0 %v6181_v3  ;;  %4990 = vmatpush1.bf16.msra.mxu0 %v6410_v44 }
  0x41   :  { %4992 = vmatprep.subr.bf16.mxu0 %v6305_v16 }
  0x43   :  { %4739 = vmatmul.mubr.msk.f32.gmra.mrb[6].mxu0 %vm77_vm0, %v57_v20 }
  0x44   :  { %314 = vmatprep.mubr.f32.mxu0 %v6181_v3 }
  0x47   :  { %4740 = vmatmul.mubr.msk.f32.gmra.mrb[4].mxu0 %vm77_vm0, %v58_v21 }
  0x48   :  { %320 = vmatprep.mubr.f32.mxu0 %v6181_v3 }
  0x4b   :  { %4741 = vmatmul.mubr.msk.f32.gmra.mrb[2].mxu0 %vm77_vm0, %v59_v22 }
  0x4c   :  { %326 = vmatprep.mubr.f32.mxu0 %v6181_v3 }
  0x4f   :  { %4742 = vmatmul.mubr.msk.f32.gmra.mrb[0].mxu0 %vm77_vm0, %v60_v23 }
  0x50   :  { %417 = vmatprep.mubr.f32.mxu0 %v6181_v3 }
  0x57   :  { %418 = vmatmul.mubr.f32.vlgmr.msra.gmra.mrb[0].mxu0 %v6181_v3 }
  0x58   :  { %4994 = vmatpush1.bf16.msra.mxu0 %v6357_v28  ;;  %522 = vmatprep.mubr.f32.mxu0 %v6181_v3 }
  0x59   :  { %4996 = vmatprep.subr.bf16.mxu0 %v6359_v29 }
  0x5c   :  { %4998 = vmatpush1.bf16.msra.mxu0 %v6376_v34 }
  0x5d   :  { %5000 = vmatprep.subr.bf16.mxu0 %v6379_v35 }
  0x60   :  { %5002 = vmatpush1.bf16.msra.mxu0 %v6396_v40 }
  0x61   :  { %5004 = vmatprep.subr.bf16.mxu0 %v6399_v41 }
  0x64   :  { %5006 = vmatpush1.bf16.msra.mxu0 %v6410_v44 }
  0x65   :  { %5008 = vmatprep.subr.bf16.mxu0 %v6305_v16 }
 0x12a   :  { %v419_v50 = vpop.f32.mrb[0].mxu0 }
 0x12b   :  { %v5595_v51 = vadd.f32 %v419_v50, %v6441_v49  ;;  %v421_v52 = vpop.f32.mrb[1].mxu0 }
 0x12c   :  { %v5596_v56 = vadd.f32 %v421_v52, %v6447_v55 }
 0x12d   :  { %v4743_v53 = vmul.f32 -1.442695, %v5595_v51 }
 0x12e   :  { %v4744_v62 = vmul.f32 -1.442695, %v5596_v56 }
 0x12f   :  { %5791 = vpow2.f32 %v4743_v53 }
 0x130   :  { %5793 = vtanh.f32 %v5596_v56 }
 0x139   :  { %v5792_v57 = vpop.eup %5791 }
 0x13a   :  { %v432_v58 = vadd.f32 1.0, %v5792_v57  ;;  %v5794_v59 = vpop.eup %5793 }
 0x13c   :  { %5795 = vrcp.f32 %v432_v58 }
 0x13d   :  { %5797 = vpow2.f32 %v4744_v62 }
 0x146   :  { %v5796_v60 = vpop.eup %5795 }
 0x147   :  { %v440_v61 = vmul.f32 %v5796_v60, %v5794_v59  ;;  %v5798_v63 = vpop.eup %5797  ;;  %v439_v1 = vmul.f32 0.0, %v5796_v60 }
 0x148   :  { %v433_v0 = vadd.f32 1.0, %v5798_v63 }
 0x149   :  { %442 = vrot.lane.b32.xlu0 %v440_v61, %s6182_s3 }
 0x14a   :  { %5799 = vrcp.f32 %v433_v0 }
 0x154   :  { %v5800_v5 = vpop.eup %5799 }
 0x1bb   :  { %v443_v2 = vpop.permute.xlu0 %442 }
 0x1bc   :  { %v445_v4 = vadd.f32 %v443_v2, %v439_v1 }
 0x1be   :  { %5801 = vtanh.f32 %v445_v4 }
 0x1c8   :  { %v5802_v6 = vpop.eup %5801 }
 0x1c9   :  { %v447_v7 = vmul.f32 %v5802_v6, %v5800_v5 }
 0x1cb   :  { %449 = vrot.lane.b32.xlu0 %v447_v7, %s6182_s3 }
 0x23d   :  { %v450_v8 = vpop.permute.xlu0 %449 }
 0x23e   :  { %453 = vst.msk [vmem:[#allocation2] sm:$0xff] %vm452_vm1, %v450_v8  ;;  %4745 = vmatmul.mubr.msk.f32.vlgmr.msra.gmra.mrb[2].mxu0 %vm349_vm3, %v450_v8 }
 0x23f   :  { %455 = vst.msk [vmem:[#allocation2 + $0x38] sm:$0xff] %vm454_vm2, %v450_v8  ;;  %5010 = vmatpush1.bf16.msra.mxu0 %v6357_v28  ;;  %625 = vmatprep.mubr.f32.mxu0 %v6181_v3 }
 0x240   :  { %5012 = vmatprep.subr.bf16.mxu0 %v6359_v29 }
 0x243   :  { %5014 = vmatpush1.bf16.msra.mxu0 %v6376_v34 }
 0x244   :  { %5016 = vmatprep.subr.bf16.mxu0 %v6379_v35 }
 0x247   :  { %5018 = vmatpush1.bf16.msra.mxu0 %v6396_v40 }
 0x248   :  { %5020 = vmatprep.subr.bf16.mxu0 %v6399_v41 }
 0x24b   :  { %5022 = vmatpush1.bf16.msra.mxu0 %v6410_v44 }
 0x24c   :  { %5024 = vmatprep.subr.bf16.mxu0 %v6305_v16 }
 0x311   :  { %v524_v9 = vpop.f32.mrb[2].mxu0 }
 0x312   :  { %v5597_v10 = vadd.f32 %v524_v9, %v6441_v49  ;;  %v526_v11 = vpop.f32.mrb[3].mxu0 }
 0x313   :  { %v5598_v13 = vadd.f32 %v526_v11, %v6447_v55 }
 0x314   :  { %v4746_v12 = vmul.f32 -1.442695, %v5597_v10 }
 0x315   :  { %v4747_v20 = vmul.f32 -1.442695, %v5598_v13 }
 0x316   :  { %5803 = vpow2.f32 %v4746_v12 }
 0x317   :  { %5805 = vtanh.f32 %v5598_v13 }
 0x320   :  { %v5804_v14 = vpop.eup %5803 }
 0x321   :  { %v537_v15 = vadd.f32 1.0, %v5804_v14  ;;  %v5806_v17 = vpop.eup %5805 }
 0x323   :  { %5807 = vrcp.f32 %v537_v15 }
 0x324   :  { %5809 = vpow2.f32 %v4747_v20 }
 0x32d   :  { %v5808_v18 = vpop.eup %5807 }
 0x32e   :  { %v545_v19 = vmul.f32 %v5808_v18, %v5806_v17  ;;  %v5810_v21 = vpop.eup %5809  ;;  %v544_v23 = vmul.f32 %v5808_v18, %v445_v4 }
 0x32f   :  { %v538_v22 = vadd.f32 1.0, %v5810_v21 }
 0x330   :  { %547 = vrot.lane.b32.xlu1 %v545_v19, %s6182_s3 }
 0x331   :  { %5811 = vrcp.f32 %v538_v22 }
 0x33b   :  { %v5812_v26 = vpop.eup %5811 }
 0x3a2   :  { %v548_v24 = vpop.permute.xlu1 %547 }
 0x3a3   :  { %v550_v25 = vadd.f32 %v548_v24, %v544_v23 }
 0x3a5   :  { %5813 = vtanh.f32 %v550_v25 }
 0x3af   :  { %v5814_v27 = vpop.eup %5813 }
 0x3b0   :  { %v552_v30 = vmul.f32 %v5814_v27, %v5812_v26 }
 0x3b2   :  { %554 = vrot.lane.b32.xlu1 %v552_v30, %s6182_s3 }
 0x424   :  { %v555_v31 = vpop.permute.xlu1 %554 }
 0x425   :  { %557 = vst.msk [vmem:[#allocation2 + $0x8] sm:$0xff] %vm452_vm1, %v555_v31  ;;  %4748 = vmatmul.mubr.msk.f32.vlgmr.msra.gmra.mrb[4].mxu0 %vm349_vm3, %v555_v31 }
 0x426   :  { %558 = vst.msk [vmem:[#allocation2 + $0x30] sm:$0xff] %vm454_vm2, %v555_v31  ;;  %5026 = vmatpush1.bf16.msra.mxu0 %v6357_v28  ;;  %728 = vmatprep.mubr.f32.mxu0 %v6181_v3 }
 0x427   :  { %5028 = vmatprep.subr.bf16.mxu0 %v6359_v29 }
 0x42a   :  { %5030 = vmatpush1.bf16.msra.mxu0 %v6376_v34 }
 0x42b   :  { %5032 = vmatprep.subr.bf16.mxu0 %v6379_v35 }
 0x42e   :  { %5034 = vmatpush1.bf16.msra.mxu0 %v6396_v40 }
 0x42f   :  { %5036 = vmatprep.subr.bf16.mxu0 %v6399_v41 }
 0x432   :  { %5038 = vmatpush1.bf16.msra.mxu0 %v6410_v44 }
 0x433   :  { %5040 = vmatprep.subr.bf16.mxu0 %v6305_v16 }
 0x4f8   :  { %v627_v32 = vpop.f32.mrb[4].mxu0 }
 0x4f9   :  { %v5599_v33 = vadd.f32 %v627_v32, %v6441_v49  ;;  %v629_v36 = vpop.f32.mrb[5].mxu0 }
 0x4fa   :  { %v5600_v38 = vadd.f32 %v629_v36, %v6447_v55 }
 0x4fb   :  { %v4749_v37 = vmul.f32 -1.442695, %v5599_v33 }
 0x4fc   :  { %v4750_v48 = vmul.f32 -1.442695, %v5600_v38 }
 0x4fd   :  { %5815 = vpow2.f32 %v4749_v37 }
 0x4fe   :  { %5817 = vtanh.f32 %v5600_v38 }
 0x507   :  { %v5816_v39 = vpop.eup %5815 }
 0x508   :  { %v640_v42 = vadd.f32 1.0, %v5816_v39  ;;  %v5818_v43 = vpop.eup %5817 }
 0x50a   :  { %5819 = vrcp.f32 %v640_v42 }
 0x50b   :  { %5821 = vpow2.f32 %v4750_v48 }
 0x514   :  { %v5820_v45 = vpop.eup %5819 }
 0x515   :  { %v648_v46 = vmul.f32 %v5820_v45, %v5818_v43  ;;  %v5822_v50 = vpop.eup %5821  ;;  %v647_v52 = vmul.f32 %v5820_v45, %v550_v25 }
 0x516   :  { %v641_v51 = vadd.f32 1.0, %v5822_v50 }
 0x517   :  { %650 = vrot.lane.b32.xlu0 %v648_v46, %s6182_s3 }
 0x518   :  { %5823 = vrcp.f32 %v641_v51 }
 0x522   :  { %v5824_v57 = vpop.eup %5823 }
 0x589   :  { %v651_v53 = vpop.permute.xlu0 %650 }
 0x58a   :  { %v653_v56 = vadd.f32 %v651_v53, %v647_v52 }
 0x58c   :  { %5825 = vtanh.f32 %v653_v56 }
 0x596   :  { %v5826_v58 = vpop.eup %5825 }
 0x597   :  { %v655_v59 = vmul.f32 %v5826_v58, %v5824_v57 }
 0x599   :  { %657 = vrot.lane.b32.xlu1 %v655_v59, %s6182_s3 }
 0x60b   :  { %v658_v60 = vpop.permute.xlu1 %657 }
 0x60c   :  { %660 = vst.msk [vmem:[#allocation2 + $0x10] sm:$0xff] %vm452_vm1, %v658_v60  ;;  %4751 = vmatmul.mubr.msk.f32.vlgmr.msra.gmra.mrb[6].mxu0 %vm349_vm3, %v658_v60 }
 0x60d   :  { %661 = vst.msk [vmem:[#allocation2 + $0x28] sm:$0xff] %vm454_vm2, %v658_v60  ;;  %5042 = vmatpush1.bf16.msra.mxu0 %v6357_v28  ;;  %831 = vmatprep.mubr.f32.mxu0 %v6181_v3 }
 0x60e   :  { %5044 = vmatprep.subr.bf16.mxu0 %v6359_v29 }
 0x611   :  { %5046 = vmatpush1.bf16.msra.mxu0 %v6376_v34 }
 0x612   :  { %5048 = vmatprep.subr.bf16.mxu0 %v6379_v35 }
 0x615   :  { %5050 = vmatpush1.bf16.msra.mxu0 %v6396_v40 }
 0x616   :  { %5052 = vmatprep.subr.bf16.mxu0 %v6399_v41 }
 0x619   :  { %5054 = vmatpush1.bf16.msra.mxu0 %v6410_v44 }
 0x61a   :  { %5056 = vmatprep.subr.bf16.mxu0 %v6305_v16 }
 0x6df   :  { %v730_v61 = vpop.f32.mrb[6].mxu0 }
 0x6e0   :  { %v5601_v62 = vadd.f32 %v730_v61, %v6441_v49  ;;  %v732_v63 = vpop.f32.mrb[7].mxu0 }
 0x6e1   :  { %v5602_v1 = vadd.f32 %v732_v63, %v6447_v55 }
 0x6e2   :  { %v4752_v0 = vmul.f32 -1.442695, %v5601_v62 }
 0x6e3   :  { %v4753_v8 = vmul.f32 -1.442695, %v5602_v1 }
 0x6e4   :  { %5827 = vpow2.f32 %v4752_v0 }
 0x6e5   :  { %5829 = vtanh.f32 %v5602_v1 }
 0x6ee   :  { %v5828_v2 = vpop.eup %5827 }
 0x6ef   :  { %v743_v4 = vadd.f32 1.0, %v5828_v2  ;;  %v5830_v5 = vpop.eup %5829 }
 0x6f1   :  { %5831 = vrcp.f32 %v743_v4 }
 0x6f2   :  { %5833 = vpow2.f32 %v4753_v8 }
 0x6fb   :  { %v5832_v6 = vpop.eup %5831 }
 0x6fc   :  { %v751_v7 = vmul.f32 %v5832_v6, %v5830_v5  ;;  %v5834_v9 = vpop.eup %5833  ;;  %v750_v11 = vmul.f32 %v5832_v6, %v653_v56 }
 0x6fd   :  { %v744_v10 = vadd.f32 1.0, %v5834_v9 }
 0x6fe   :  { %753 = vrot.lane.b32.xlu0 %v751_v7, %s6182_s3 }
 0x6ff   :  { %5835 = vrcp.f32 %v744_v10 }
 0x709   :  { %v5836_v14 = vpop.eup %5835 }
 0x770   :  { %v754_v12 = vpop.permute.xlu0 %753 }
 0x771   :  { %v756_v13 = vadd.f32 %v754_v12, %v750_v11 }
 0x773   :  { %5837 = vtanh.f32 %v756_v13 }
 0x77d   :  { %v5838_v15 = vpop.eup %5837 }
 0x77e   :  { %v758_v17 = vmul.f32 %v5838_v15, %v5836_v14 }
 0x780   :  { %760 = vrot.lane.b32.xlu1 %v758_v17, %s6182_s3 }
 0x7f2   :  { %v761_v18 = vpop.permute.xlu1 %760 }
 0x7f3   :  { %763 = vst.msk [vmem:[#allocation2 + $0x18] sm:$0xff] %vm452_vm1, %v761_v18  ;;  %4754 = vmatmul.mubr.msk.f32.vlgmr.msra.gmra.mrb[8].mxu0 %vm349_vm3, %v761_v18 }
 0x7f4   :  { %764 = vst.msk [vmem:[#allocation2 + $0x20] sm:$0xff] %vm454_vm2, %v761_v18  ;;  %5058 = vmatpush1.bf16.msra.mxu0 %v6357_v28  ;;  %934 = vmatprep.mubr.f32.mxu0 %v6181_v3 }
 0x7f5   :  { %5060 = vmatprep.subr.bf16.mxu0 %v6359_v29 }
 0x7f8   :  { %5062 = vmatpush1.bf16.msra.mxu0 %v6376_v34 }
 0x7f9   :  { %5064 = vmatprep.subr.bf16.mxu0 %v6379_v35 }
 0x7fc   :  { %5066 = vmatpush1.bf16.msra.mxu0 %v6396_v40 }
 0x7fd   :  { %5068 = vmatprep.subr.bf16.mxu0 %v6399_v41 }
 0x800   :  { %5070 = vmatpush1.bf16.msra.mxu0 %v6410_v44 }
 0x801   :  { %5072 = vmatprep.subr.bf16.mxu0 %v6305_v16 }
 0x8c6   :  { %v833_v19 = vpop.f32.mrb[8].mxu0 }
 0x8c7   :  { %v5603_v20 = vadd.f32 %v833_v19, %v6441_v49  ;;  %v835_v21 = vpop.f32.mrb[9].mxu0 }
 0x8c8   :  { %v5604_v23 = vadd.f32 %v835_v21, %v6447_v55 }
 0x8c9   :  { %v4755_v22 = vmul.f32 -1.442695, %v5603_v20 }
 0x8ca   :  { %v4756_v31 = vmul.f32 -1.442695, %v5604_v23 }
 0x8cb   :  { %5839 = vpow2.f32 %v4755_v22 }
 0x8cc   :  { %5841 = vtanh.f32 %v5604_v23 }
 0x8d5   :  { %v5840_v24 = vpop.eup %5839 }
 0x8d6   :  { %v846_v25 = vadd.f32 1.0, %v5840_v24  ;;  %v5842_v26 = vpop.eup %5841 }
 0x8d8   :  { %5843 = vrcp.f32 %v846_v25 }
 0x8d9   :  { %5845 = vpow2.f32 %v4756_v31 }
 0x8e2   :  { %v5844_v27 = vpop.eup %5843 }
 0x8e3   :  { %v854_v30 = vmul.f32 %v5844_v27, %v5842_v26  ;;  %v5846_v32 = vpop.eup %5845  ;;  %v853_v36 = vmul.f32 %v5844_v27, %v756_v13 }
 0x8e4   :  { %v847_v33 = vadd.f32 1.0, %v5846_v32  ;;  %v1186_v32 = vld [vmem:[%s7577_s4 + $0x8] sm:$0xff] }
 0x8e5   :  { %856 = vrot.lane.b32.xlu0 %v854_v30, %s6182_s3 }
 0x8e6   :  { %5847 = vrcp.f32 %v847_v33 }
 0x8f0   :  { %v5848_v39 = vpop.eup %5847 }
 0x957   :  { %v857_v37 = vpop.permute.xlu0 %856 }
 0x958   :  { %v859_v38 = vadd.f32 %v857_v37, %v853_v36  ;;  %v1187_v36 = vld [vmem:[%s7577_s4 + $0x10] sm:$0xff]  ;;  %v1190_v37 = vld [vmem:[%s7577_s4 + $0x28] sm:$0xff] }
 0x95a   :  { %5849 = vtanh.f32 %v859_v38 }
 0x964   :  { %v5850_v42 = vpop.eup %5849 }
 0x965   :  { %v861_v43 = vmul.f32 %v5850_v42, %v5848_v39 }
 0x967   :  { %863 = vrot.lane.b32.xlu1 %v861_v43, %s6182_s3  ;;  %v1189_v43 = vld [vmem:[%s7577_s4 + $0x20] sm:$0xff] }
 0x9d9   :  { %v864_v45 = vpop.permute.xlu1 %863 }
 0x9da   :  { %866 = vst.msk [vmem:[#allocation2 + $0x20] sm:$0xff] %vm452_vm1, %v864_v45  ;;  %4757 = vmatmul.mubr.msk.f32.vlgmr.msra.gmra.mrb[10].mxu0 %vm349_vm3, %v864_v45 }
 0x9db   :  { %867 = vst.msk [vmem:[#allocation2 + $0x18] sm:$0xff] %vm454_vm2, %v864_v45  ;;  %5074 = vmatpush1.bf16.msra.mxu0 %v6357_v28  ;;  %1037 = vmatprep.mubr.f32.mxu0 %v6181_v3  ;;  %v1191_v45 = vld [vmem:[%s7577_s4 + $0x30] sm:$0xff] }
 0x9dc   :  { %5076 = vmatprep.subr.bf16.mxu0 %v6359_v29 }
 0x9df   :  { %5078 = vmatpush1.bf16.msra.mxu0 %v6376_v34 }
 0x9e0   :  { %5080 = vmatprep.subr.bf16.mxu0 %v6379_v35 }
 0x9e3   :  { %5082 = vmatpush1.bf16.msra.mxu0 %v6396_v40 }
 0x9e4   :  { %5084 = vmatprep.subr.bf16.mxu0 %v6399_v41 }
 0x9e7   :  { %5086 = vmatpush1.bf16.msra.mxu0 %v6410_v44 }
 0x9e8   :  { %5088 = vmatprep.subr.bf16.mxu0 %v6305_v16 }
 0xaad   :  { %v936_v46 = vpop.f32.mrb[10].mxu0 }
 0xaae   :  { %v5605_v48 = vadd.f32 %v936_v46, %v6441_v49  ;;  %v938_v50 = vpop.f32.mrb[11].mxu0  ;;  %v5109_v46 = vpack.c.bf16 %v1191_v45, %v1189_v43  ;;  %v1482_v43 = vld [vmem:[%s7578_s5 + $0x10] sm:$0xff]  ;;  %v1485_v45 = vld [vmem:[%s7578_s5 + $0x28] sm:$0xff] }
 0xaaf   :  { %v5606_v52 = vadd.f32 %v938_v50, %v6447_v55 }
 0xab0   :  { %v4758_v51 = vmul.f32 -1.442695, %v5605_v48 }
 0xab1   :  { %v4759_v60 = vmul.f32 -1.442695, %v5606_v52 }
 0xab2   :  { %5851 = vpow2.f32 %v4758_v51 }
 0xab3   :  { %5853 = vtanh.f32 %v5606_v52 }
 0xabc   :  { %v5852_v53 = vpop.eup %5851 }
 0xabd   :  { %v949_v56 = vadd.f32 1.0, %v5852_v53  ;;  %v5854_v57 = vpop.eup %5853 }
 0xabf   :  { %5855 = vrcp.f32 %v949_v56  ;;  %v1194_v56 = vld [vmem:[%s7577_s4 + $0x48] sm:$0xff] }
 0xac0   :  { %5857 = vpow2.f32 %v4759_v60  ;;  %v1193_v60 = vld [vmem:[%s7577_s4 + $0x40] sm:$0xff] }
 0xac9   :  { %v5856_v58 = vpop.eup %5855 }
 0xaca   :  { %v957_v59 = vmul.f32 %v5856_v58, %v5854_v57  ;;  %v5858_v16 = vpop.eup %5857  ;;  %v956_v62 = vmul.f32 %v5856_v58, %v859_v38  ;;  %v1192_v38 = vld [vmem:[%s7577_s4 + $0x38] sm:$0xff] }
 0xacb   :  { %v950_v61 = vadd.f32 1.0, %v5858_v16  ;;  %v5107_v42 = vpack.c.bf16 %v1192_v38, %v1190_v37  ;;  %v1196_v57 = vld [vmem:[%s7577_s4 + $0x58] sm:$0xff]  ;;  %v1195_v16 = vld [vmem:[%s7577_s4 + $0x50] sm:$0xff] }
 0xacc   :  { %959 = vrot.lane.b32.xlu0 %v957_v59, %s6182_s3  ;;  %v5111_v59 = vpack.c.bf16 %v1196_v57, %v1194_v56  ;;  %v1491_v56 = vld [vmem:[%s7578_s5 + $0x58] sm:$0xff] }
 0xacd   :  { %5859 = vrcp.f32 %v950_v61  ;;  %v5113_v61 = vpack.c.bf16 %v1195_v16, %v1193_v60  ;;  %v1490_v60 = vld [vmem:[%s7578_s5 + $0x50] sm:$0xff]  ;;  %v1493_v16 = vld [vmem:[%s7578_s5 + $0x68] sm:$0xff] }
 0xad7   :  { %v5860_v1 = vpop.eup %5859 }
 0xb3e   :  { %v960_v63 = vpop.permute.xlu0 %959 }
 0xb3f   :  { %v962_v0 = vadd.f32 %v960_v63, %v956_v62  ;;  %v1198_v62 = vld [vmem:[%s7577_s4 + $0x68] sm:$0xff]  ;;  %v1200_v63 = vld [vmem:[%s7577_s4 + $0x78] sm:$0xff] }
 0xb41   :  { %5861 = vtanh.f32 %v962_v0 }
 0xb4b   :  { %v5862_v2 = vpop.eup %5861 }
 0xb4c   :  { %v964_v4 = vmul.f32 %v5862_v2, %v5860_v1  ;;  %v5115_v1 = vpack.c.bf16 %v1200_v63, %v1198_v62  ;;  %v1199_v2 = vld [vmem:[%s7577_s4 + $0x70] sm:$0xff] }
 0xb4e   :  { %966 = vrot.lane.b32.xlu1 %v964_v4, %s6182_s3 }
 0xbc0   :  { %v967_v5 = vpop.permute.xlu1 %966 }
 0xbc1   :  { %969 = vst.msk [vmem:[#allocation2 + $0x28] sm:$0xff] %vm452_vm1, %v967_v5  ;;  %4760 = vmatmul.mubr.msk.f32.vlgmr.msra.gmra.mrb[12].mxu0 %vm349_vm3, %v967_v5 }
 0xbc2   :  { %970 = vst.msk [vmem:[#allocation2 + $0x10] sm:$0xff] %vm454_vm2, %v967_v5  ;;  %5090 = vmatpush1.bf16.msra.mxu0 %v6357_v28  ;;  %1140 = vmatprep.mubr.f32.mxu0 %v6181_v3  ;;  %v4775_v5 = vld [vmem:[%s7577_s4 + $0x88] sm:$0xff] }
 0xbc3   :  { %5092 = vmatprep.subr.bf16.mxu0 %v6359_v29 }
 0xbc6   :  { %5094 = vmatpush1.bf16.msra.mxu0 %v6376_v34 }
 0xbc7   :  { %5096 = vmatprep.subr.bf16.mxu0 %v6379_v35 }
 0xbc8   :  { %v1182_v37 = vld [vmem:[#allocation2 + $0x28] sm:$0xff] }
 0xbca   :  { %5098 = vmatpush1.bf16.msra.mxu0 %v6396_v40 }
 0xbcb   :  { %5100 = vmatprep.subr.bf16.mxu0 %v6399_v41 }
 0xbce   :  { %5102 = vmatpush1.bf16.msra.mxu0 %v6410_v44 }
 0xc94   :  { %v1039_v6 = vpop.f32.mrb[12].mxu0 }
 0xc95   :  { %v5607_v7 = vadd.f32 %v1039_v6, %v6441_v49  ;;  %v1041_v8 = vpop.f32.mrb[13].mxu0  ;;  %v4777_v6 = vld [vmem:[%s7577_s4 + $0x98] sm:$0xff] }
 0xc96   :  { %v5608_v28 = vadd.f32 %v1041_v8, %v6447_v55  ;;  %v5119_v8 = vpack.c.bf16 %v4777_v6, %v4775_v5 }
 0xc97   :  { %v4761_v9 = vmul.f32 -1.442695, %v5607_v7 }
 0xc98   :  { %v4762_v40 = vmul.f32 -1.442695, %v5608_v28 }
 0xc99   :  { %5863 = vpow2.f32 %v4761_v9 }
 0xc9a   :  { %5865 = vtanh.f32 %v5608_v28 }
 0xca3   :  { %v5864_v10 = vpop.eup %5863 }
 0xca4   :  { %v1052_v29 = vadd.f32 1.0, %v5864_v10  ;;  %v5866_v34 = vpop.eup %5865 }
 0xca6   :  { %5867 = vrcp.f32 %v1052_v29  ;;  %v4774_v29 = vld [vmem:[%s7577_s4 + $0x80] sm:$0xff] }
 0xca7   :  { %5869 = vpow2.f32 %v4762_v40 }
 0xcb0   :  { %v5868_v35 = vpop.eup %5867 }
 0xcb1   :  { %v1060_v11 = vmul.f32 %v5868_v35, %v5866_v34  ;;  %v5870_v41 = vpop.eup %5869  ;;  %v1059_v12 = vmul.f32 %v5868_v35, %v962_v0  ;;  %v1197_v0 = vld [vmem:[%s7577_s4 + $0x60] sm:$0xff]  ;;  %v4776_v34 = vld [vmem:[%s7577_s4 + $0x90] sm:$0xff]  ;;  %v4779_v35 = vld [vmem:[%s7577_s4 + $0xa8] sm:$0xff] }
 0xcb2   :  { %v1053_v44 = vadd.f32 1.0, %v5870_v41  ;;  %v5117_v4 = vpack.c.bf16 %v1199_v2, %v1197_v0  ;;  %v5121_v40 = vpack.c.bf16 %v4776_v34, %v4774_v29  ;;  %v1492_v0 = vld [vmem:[%s7578_s5 + $0x60] sm:$0xff] }
 0xcb3   :  { %1062 = vrot.lane.b32.xlu0 %v1060_v11, %s6182_s3  ;;  %v4781_v11 = vld [vmem:[%s7577_s4 + $0xb8] sm:$0xff] }
 0xcb4   :  { %5871 = vrcp.f32 %v1053_v44  ;;  %v5123_v41 = vpack.c.bf16 %v4781_v11, %v4779_v35  ;;  %v4778_v44 = vld [vmem:[%s7577_s4 + $0xa0] sm:$0xff] }
 0xcbe   :  { %v5872_v15 = vpop.eup %5871 }
 0xd25   :  { %v1063_v13 = vpop.permute.xlu0 %1062 }
 0xd26   :  { %v1065_v14 = vadd.f32 %v1063_v13, %v1059_v12  ;;  %v4780_v12 = vld [vmem:[%s7577_s4 + $0xb0] sm:$0xff] }
 0xd28   :  { %5873 = vtanh.f32 %v1065_v14 }
 0xd32   :  { %v5874_v17 = vpop.eup %5873 }
 0xd33   :  { %v1067_v18 = vmul.f32 %v5874_v17, %v5872_v15  ;;  %v4785_v15 = vld [vmem:[%s7577_s4 + $0xd8] sm:$0xff]  ;;  %v5125_v17 = vpack.c.bf16 %v4780_v12, %v4778_v44 }
 0xd35   :  { %1069 = vrot.lane.b32.xlu1 %v1067_v18, %s6182_s3 }
 0xda7   :  { %v1070_v19 = vpop.permute.xlu1 %1069 }
 0xda8   :  { %1072 = vst.msk [vmem:[#allocation2 + $0x30] sm:$0xff] %vm452_vm1, %v1070_v19  ;;  %4763 = vmatmul.mubr.msk.f32.vlgmr.msra.gmra.mrb[14].mxu0 %vm349_vm3, %v1070_v19 }
 0xda9   :  { %1073 = vst.msk [vmem:[#allocation2 + $0x8] sm:$0xff] %vm454_vm2, %v1070_v19  ;;  %2442 = vmatprep.mubr.f32.mxu0 %v6181_v3  ;;  %v4782_v19 = vld [vmem:[%s7577_s4 + $0xc0] sm:$0xff] }
 0xdaf   :  { %v1183_v38 = vld [vmem:[#allocation2 + $0x30] sm:$0xff] }
 0xe7b   :  { %v1142_v20 = vpop.f32.mrb[14].mxu0 }
 0xe7c   :  { %v5609_v21 = vadd.f32 %v1142_v20, %v6441_v49  ;;  %v1144_v22 = vpop.f32.mrb[15].mxu0  ;;  %v1188_v49 = vld [vmem:[%s7577_s4 + $0x18] sm:$0xff]  ;;  %v4784_v20 = vld [vmem:[%s7577_s4 + $0xd0] sm:$0xff] }
 0xe7d   :  { %v5610_v24 = vadd.f32 %v1144_v22, %v6447_v55  ;;  %v1185_v55 = vld [vmem:[%s7577_s4] sm:$0xff]  ;;  %v5103_v33 = vpack.c.bf16 %v1188_v49, %v1186_v32  ;;  %v4787_v22 = vld [vmem:[%s7577_s4 + $0xe8] sm:$0xff]  ;;  %v1483_v32 = vld [vmem:[%s7578_s5 + $0x18] sm:$0xff] }
 0xe7e   :  { %v4764_v23 = vmul.f32 -1.442695, %v5609_v21  ;;  %v5105_v39 = vpack.c.bf16 %v1187_v36, %v1185_v55  ;;  %v1178_v21 = vld [vmem:[#allocation2 + $0x8] sm:$0xff]  ;;  %v1181_v36 = vld [vmem:[#allocation2 + $0x20] sm:$0xff] }
 0xe7f   :  { %5104 = vmatprep.subr.bf16.mxu1 %v5103_v33  ;;  %v4765_v48 = vmul.f32 -1.442695, %v5610_v24  ;;  %v1180_v33 = vld [vmem:[#allocation2 + $0x18] sm:$0xff] }
 0xe80   :  { %5875 = vpow2.f32 %v4764_v23  ;;  %5106 = vmatpush1.bf16.msra.mxu1 %v5105_v39  ;;  %v4789_v23 = vld [vmem:[%s7577_s4 + $0xf8] sm:$0xff] }
 0xe81   :  { %5877 = vtanh.f32 %v5610_v24  ;;  %5108 = vmatprep.subr.bf16.mxu1 %v5107_v42  ;;  %v5129_v24 = vpack.c.bf16 %v4784_v20, %v4782_v19  ;;  %v1480_v42 = vld [vmem:[%s7578_s5] sm:$0xff] }
 0xe84   :  { %5110 = vmatpush1.bf16.msra.mxu1 %v5109_v46  ;;  %v1487_v46 = vld [vmem:[%s7578_s5 + $0x38] sm:$0xff] }
 0xe85   :  { %5112 = vmatprep.subr.bf16.mxu1 %v5111_v59  ;;  %v1488_v59 = vld [vmem:[%s7578_s5 + $0x40] sm:$0xff] }
 0xe86   :  { %v6729_v62 = vpack.c.bf16 %v1490_v60, %v1488_v59 }
 0xe88   :  { %5114 = vmatpush1.bf16.msra.mxu1 %v5113_v61  ;;  %v1495_v61 = vld [vmem:[%s7578_s5 + $0x78] sm:$0xff] }
 0xe89   :  { %5116 = vmatprep.subr.bf16.mxu1 %v5115_v1  ;;  %v6732_v63 = vpack.c.bf16 %v1495_v61, %v1493_v16  ;;  %v1494_v1 = vld [vmem:[%s7578_s5 + $0x70] sm:$0xff] }
 0xe8a   :  { %v5876_v25 = vpop.eup %5875  ;;  %v6743_v2 = vpack.c.bf16 %v1494_v1, %v1492_v0 }
 0xe8b   :  { %v1155_v26 = vadd.f32 1.0, %v5876_v25  ;;  %v5878_v27 = vpop.eup %5877  ;;  %v5131_v25 = vpack.c.bf16 %v4789_v23, %v4787_v22 }
 0xe8c   :  { %5118 = vmatpush1.bf16.msra.mxu1 %v5117_v4  ;;  %v1201_v4 = vld [vmem:[%s7579_s6] sm:$0x3] }
 0xe8d   :  { %5879 = vrcp.f32 %v1155_v26  ;;  %5120 = vmatprep.subr.bf16.mxu1 %v5119_v8  ;;  %v4786_v26 = vld [vmem:[%s7577_s4 + $0xe0] sm:$0xff]  ;;  %v6772_v5 = vrot.slane %v1201_v4, %v6435_v47 }
 0xe8e   :  { %5881 = vpow2.f32 %v4765_v48  ;;  %v6690_v48 = vpack.c.bf16 %v1482_v43, %v1480_v42 }
 0xe97   :  { %v5880_v30 = vpop.eup %5879 }
 0xe98   :  { %v1163_v31 = vmul.f32 %v5880_v30, %v5878_v27  ;;  %v5882_v50 = vpop.eup %5881  ;;  %v1162_v52 = vmul.f32 %v5880_v30, %v1065_v14  ;;  %v4783_v14 = vld [vmem:[%s7577_s4 + $0xc8] sm:$0xff]  ;;  %v4788_v27 = vld [vmem:[%s7577_s4 + $0xf0] sm:$0xff] }
 0xe99   :  { %v1156_v51 = vadd.f32 1.0, %v5882_v50  ;;  %v5127_v18 = vpack.c.bf16 %v4785_v15, %v4783_v14  ;;  %v1179_v30 = vld [vmem:[#allocation2 + $0x10] sm:$0xff]  ;;  %v5133_v49 = vpack.c.bf16 %v4788_v27, %v4786_v26  ;;  %v6692_v50 = vpack.c.bf16 %v1487_v46, %v1485_v45 }
 0xe9a   :  { %1165 = vrot.lane.b32.xlu0 %v1163_v31, %s6182_s3  ;;  %v1481_v31 = vld [vmem:[%s7578_s5 + $0x8] sm:$0xff] }
 0xe9b   :  { %5883 = vrcp.f32 %v1156_v51  ;;  %v6665_v55 = vpack.c.bf16 %v1483_v32, %v1481_v31  ;;  %v1484_v51 = vld [vmem:[%s7578_s5 + $0x20] sm:$0xff] }
 0xea5   :  { %v5884_v7 = vpop.eup %5883 }
 0xf0c   :  { %v1166_v53 = vpop.permute.xlu0 %1165 }
 0xf0d   :  { %v1168_v58 = vadd.f32 %v1166_v53, %v1162_v52  ;;  %v1486_v52 = vld [vmem:[%s7578_s5 + $0x30] sm:$0xff]  ;;  %v1489_v53 = vld [vmem:[%s7578_s5 + $0x48] sm:$0xff] }
 0xf0e   :  { %v6709_v57 = vpack.c.bf16 %v1486_v52, %v1484_v51 }
 0xf0f   :  { %5885 = vtanh.f32 %v1168_v58  ;;  %v6712_v58 = vpack.c.bf16 %v1491_v56, %v1489_v53 }
 0xf19   :  { %v5886_v9 = vpop.eup %5885 }
 0xf1a   :  { %v1170_v28 = vmul.f32 %v5886_v9, %v5884_v7 }
 0xf1c   :  { %1172 = vrot.lane.b32.xlu1 %v1170_v28, %s6182_s3  ;;  %v6776_v28 = vrot.slane %v1201_v4, %v6444_v54 }
 0xf8e   :  { %v1173_v10 = vpop.permute.xlu1 %1172 }
 0xf8f   :  { %1175 = vst.msk [vmem:[#allocation2 + $0x38] sm:$0xff] %vm452_vm1, %v1173_v10 }
 0xf90   :  { %1176 = vst.msk [vmem:[#allocation2] sm:$0xff] %vm454_vm2, %v1173_v10 }
 0xf96   :  { %v1184_v39 = vld [vmem:[#allocation2 + $0x38] sm:$0xff] }
 0xf97   :  { %v1177_v13 = vld [vmem:[#allocation2] sm:$0xff] }
 0xf98   :  { %4766 = vmatmul.mubr.msk.f32.vlgmr.msra.gmra.mrb[0].mxu1 %vm349_vm3, %v1177_v13 }
 0xf99   :  { %5122 = vmatpush1.bf16.msra.mxu1 %v5121_v40  ;;  %1307 = vmatprep.mubr.f32.mxu1 %v6181_v3 }
 0xf9a   :  { %5124 = vmatprep.subr.bf16.mxu1 %v5123_v41 }
 0xf9c   :  { %4767 = vmatmul.mubr.msk.f32.gmra.mrb[2].mxu1 %vm349_vm3, %v1178_v21 }
 0xf9d   :  { %1313 = vmatprep.mubr.f32.mxu1 %v6181_v3  ;;  %5126 = vmatpush1.bf16.msra.mxu1 %v5125_v17 }
 0xf9e   :  { %5128 = vmatprep.subr.bf16.mxu1 %v5127_v18 }
 0xfa0   :  { %4768 = vmatmul.mubr.msk.f32.gmra.mrb[4].mxu1 %vm349_vm3, %v1179_v30 }
 0xfa1   :  { %1319 = vmatprep.mubr.f32.mxu1 %v6181_v3  ;;  %5130 = vmatpush1.bf16.msra.mxu1 %v5129_v24 }
 0xfa2   :  { %5132 = vmatprep.subr.bf16.mxu1 %v5131_v25 }
 0xfa4   :  { %4769 = vmatmul.mubr.msk.f32.gmra.mrb[6].mxu1 %vm349_vm3, %v1180_v33 }
 0xfa5   :  { %1325 = vmatprep.mubr.f32.mxu1 %v6181_v3  ;;  %5134 = vmatpush1.bf16.msra.mxu1 %v5133_v49 }
 0xfa6   :  { %5136 = vmatprep.subr.bf16.mxu1 %v6665_v55 }
 0xfa8   :  { %4770 = vmatmul.mubr.msk.f32.gmra.mrb[8].mxu1 %vm349_vm3, %v1181_v36 }
 0xfa9   :  { %1331 = vmatprep.mubr.f32.mxu1 %v6181_v3 }
 0xfac   :  { %4771 = vmatmul.mubr.msk.f32.gmra.mrb[10].mxu1 %vm349_vm3, %v1182_v37 }
 0xfad   :  { %1337 = vmatprep.mubr.f32.mxu1 %v6181_v3 }
 0xfb0   :  { %4772 = vmatmul.mubr.msk.f32.gmra.mrb[12].mxu1 %vm349_vm3, %v1183_v38 }
 0xfb1   :  { %1343 = vmatprep.mubr.f32.mxu1 %v6181_v3 }
 0xfb4   :  { %4773 = vmatmul.mubr.msk.f32.gmra.mrb[14].mxu1 %vm349_vm3, %v1184_v39 }
 0xfb5   :  { %1431 = vmatprep.mubr.f32.mxu1 %v6181_v3 }
 0xfbc   :  { %4790 = vmatmul.mubr.msk.f32.vlgmr.msra.gmra.mrb[14].mxu1 %vm349_vm3, %v1177_v13 }
 0xfbd   :  { %5138 = vmatpush1.bf16.msra.mxu1 %v6690_v48  ;;  %1437 = vmatprep.mubr.f32.mxu1 %v6181_v3 }
 0xfbe   :  { %5140 = vmatprep.subr.bf16.mxu1 %v6692_v50 }
 0xfc0   :  { %4791 = vmatmul.mubr.msk.f32.gmra.mrb[12].mxu1 %vm349_vm3, %v1178_v21 }
 0xfc1   :  { %1443 = vmatprep.mubr.f32.mxu1 %v6181_v3  ;;  %5142 = vmatpush1.bf16.msra.mxu1 %v6709_v57 }
 0xfc2   :  { %5144 = vmatprep.subr.bf16.mxu1 %v6712_v58 }
 0xfc4   :  { %4792 = vmatmul.mubr.msk.f32.gmra.mrb[10].mxu1 %vm349_vm3, %v1179_v30 }
 0xfc5   :  { %1449 = vmatprep.mubr.f32.mxu1 %v6181_v3  ;;  %5146 = vmatpush1.bf16.msra.mxu1 %v6729_v62 }
 0xfc6   :  { %5148 = vmatprep.subr.bf16.mxu1 %v6732_v63 }
 0xfc8   :  { %4793 = vmatmul.mubr.msk.f32.gmra.mrb[8].mxu1 %vm349_vm3, %v1180_v33 }
 0xfc9   :  { %1455 = vmatprep.mubr.f32.mxu1 %v6181_v3  ;;  %5150 = vmatpush1.bf16.msra.mxu1 %v6743_v2 }
 0xfca   :  { %5152 = vmatprep.subr.bf16.mxu1 %v6665_v55 }
 0xfcc   :  { %4794 = vmatmul.mubr.msk.f32.gmra.mrb[6].mxu1 %vm349_vm3, %v1181_v36 }
 0xfcd   :  { %1461 = vmatprep.mubr.f32.mxu1 %v6181_v3 }
 0xfd0   :  { %4795 = vmatmul.mubr.msk.f32.gmra.mrb[4].mxu1 %vm349_vm3, %v1182_v37 }
 0xfd1   :  { %1467 = vmatprep.mubr.f32.mxu1 %v6181_v3 }
 0xfd4   :  { %4796 = vmatmul.mubr.msk.f32.gmra.mrb[2].mxu1 %vm349_vm3, %v1183_v38 }
 0xfd5   :  { %1473 = vmatprep.mubr.f32.mxu1 %v6181_v3 }
 0xfd8   :  { %4797 = vmatmul.mubr.msk.f32.gmra.mrb[0].mxu1 %vm349_vm3, %v1184_v39 }
 0xfd9   :  { %1560 = vmatprep.mubr.f32.mxu1 %v6181_v3 }
 0xfe0   :  { %1561 = vmatmul.mubr.f32.vlgmr.msra.gmra.mrb[0].mxu1 %v6181_v3 }
 0xfe1   :  { %5154 = vmatpush1.bf16.msra.mxu1 %v6690_v48  ;;  %1663 = vmatprep.mubr.f32.mxu1 %v6181_v3 }
 0xfe2   :  { %5156 = vmatprep.subr.bf16.mxu1 %v6692_v50 }
 0xfe5   :  { %5158 = vmatpush1.bf16.msra.mxu1 %v6709_v57 }
 0xfe6   :  { %5160 = vmatprep.subr.bf16.mxu1 %v6712_v58 }
 0xfe9   :  { %5162 = vmatpush1.bf16.msra.mxu1 %v6729_v62 }
 0xfea   :  { %5164 = vmatprep.subr.bf16.mxu1 %v6732_v63 }
 0xfed   :  { %5166 = vmatpush1.bf16.msra.mxu1 %v6743_v2 }
 0xfee   :  { %5168 = vmatprep.subr.bf16.mxu1 %v6665_v55 }
0x10b3   :  { %v1562_v6 = vpop.f32.mrb[0].mxu1 }
0x10b4   :  { %v5611_v7 = vadd.f32 %v1562_v6, %v6772_v5  ;;  %v1564_v8 = vpop.f32.mrb[1].mxu1 }
0x10b5   :  { %v5612_v10 = vadd.f32 %v1564_v8, %v6776_v28 }
0x10b6   :  { %v4798_v9 = vmul.f32 -1.442695, %v5611_v7 }
0x10b7   :  { %v4799_v41 = vmul.f32 -1.442695, %v5612_v10 }
0x10b8   :  { %5887 = vpow2.f32 %v4798_v9 }
0x10b9   :  { %5889 = vtanh.f32 %v5612_v10 }
0x10c2   :  { %v5888_v29 = vpop.eup %5887 }
0x10c3   :  { %v1575_v34 = vadd.f32 1.0, %v5888_v29  ;;  %v5890_v35 = vpop.eup %5889 }
0x10c5   :  { %5891 = vrcp.f32 %v1575_v34 }
0x10c6   :  { %5893 = vpow2.f32 %v4799_v41 }
0x10cf   :  { %v5892_v11 = vpop.eup %5891 }
0x10d0   :  { %v1583_v40 = vmul.f32 %v5892_v11, %v5890_v35  ;;  %v5894_v44 = vpop.eup %5893  ;;  %v1582_v13 = vmul.f32 0.0, %v5892_v11 }
0x10d1   :  { %v1576_v12 = vadd.f32 1.0, %v5894_v44 }
0x10d2   :  { %1585 = vrot.lane.b32.xlu0 %v1583_v40, %s6182_s3 }
0x10d3   :  { %5895 = vrcp.f32 %v1576_v12 }
0x10dd   :  { %v5896_v17 = vpop.eup %5895 }
0x1144   :  { %v1586_v14 = vpop.permute.xlu0 %1585 }
0x1145   :  { %v1588_v15 = vadd.f32 %v1586_v14, %v1582_v13 }
0x1147   :  { %5897 = vtanh.f32 %v1588_v15 }
0x1151   :  { %v5898_v18 = vpop.eup %5897 }
0x1152   :  { %v1590_v19 = vmul.f32 %v5898_v18, %v5896_v17 }
0x1154   :  { %1592 = vrot.lane.b32.xlu1 %v1590_v19, %s6182_s3 }
0x11c6   :  { %v1593_v20 = vpop.permute.xlu1 %1592 }
0x11c7   :  { %1595 = vst.msk [vmem:[#allocation2] sm:$0xff] %vm452_vm1, %v1593_v20  ;;  %4800 = vmatmul.mubr.msk.f32.vlgmr.msra.gmra.mrb[2].mxu1 %vm349_vm3, %v1593_v20 }
0x11c8   :  { %1596 = vst.msk [vmem:[#allocation2 + $0x38] sm:$0xff] %vm454_vm2, %v1593_v20  ;;  %5170 = vmatpush1.bf16.msra.mxu1 %v6690_v48  ;;  %1766 = vmatprep.mubr.f32.mxu1 %v6181_v3 }
0x11c9   :  { %5172 = vmatprep.subr.bf16.mxu1 %v6692_v50 }
0x11cc   :  { %5174 = vmatpush1.bf16.msra.mxu1 %v6709_v57 }
0x11cd   :  { %5176 = vmatprep.subr.bf16.mxu1 %v6712_v58 }
0x11d0   :  { %5178 = vmatpush1.bf16.msra.mxu1 %v6729_v62 }
0x11d1   :  { %5180 = vmatprep.subr.bf16.mxu1 %v6732_v63 }
0x11d4   :  { %5182 = vmatpush1.bf16.msra.mxu1 %v6743_v2 }
0x11d5   :  { %5184 = vmatprep.subr.bf16.mxu1 %v6665_v55 }
0x129a   :  { %v1665_v21 = vpop.f32.mrb[2].mxu1 }
0x129b   :  { %v5613_v22 = vadd.f32 %v1665_v21, %v6772_v5  ;;  %v1667_v23 = vpop.f32.mrb[3].mxu1 }
0x129c   :  { %v5614_v25 = vadd.f32 %v1667_v23, %v6776_v28 }
0x129d   :  { %v4801_v24 = vmul.f32 -1.442695, %v5613_v22 }
0x129e   :  { %v4802_v49 = vmul.f32 -1.442695, %v5614_v25 }
0x129f   :  { %5899 = vpow2.f32 %v4801_v24 }
0x12a0   :  { %5901 = vtanh.f32 %v5614_v25 }
0x12a9   :  { %v5900_v26 = vpop.eup %5899 }
0x12aa   :  { %v1678_v27 = vadd.f32 1.0, %v5900_v26  ;;  %v5902_v30 = vpop.eup %5901 }
0x12ac   :  { %5903 = vrcp.f32 %v1678_v27 }
0x12ad   :  { %5905 = vpow2.f32 %v4802_v49 }
0x12b6   :  { %v5904_v31 = vpop.eup %5903 }
0x12b7   :  { %v1686_v32 = vmul.f32 %v5904_v31, %v5902_v30  ;;  %v5906_v33 = vpop.eup %5905  ;;  %v1685_v37 = vmul.f32 %v5904_v31, %v1588_v15 }
0x12b8   :  { %v1679_v36 = vadd.f32 1.0, %v5906_v33 }
0x12b9   :  { %1688 = vrot.lane.b32.xlu0 %v1686_v32, %s6182_s3 }
0x12ba   :  { %5907 = vrcp.f32 %v1679_v36 }
0x12c4   :  { %v5908_v42 = vpop.eup %5907 }
0x132b   :  { %v1689_v38 = vpop.permute.xlu0 %1688 }
0x132c   :  { %v1691_v39 = vadd.f32 %v1689_v38, %v1685_v37 }
0x132e   :  { %5909 = vtanh.f32 %v1691_v39 }
0x1338   :  { %v5910_v43 = vpop.eup %5909 }
0x1339   :  { %v1693_v45 = vmul.f32 %v5910_v43, %v5908_v42 }
0x133b   :  { %1695 = vrot.lane.b32.xlu1 %v1693_v45, %s6182_s3 }
0x13ad   :  { %v1696_v46 = vpop.permute.xlu1 %1695 }
0x13ae   :  { %1698 = vst.msk [vmem:[#allocation2 + $0x8] sm:$0xff] %vm452_vm1, %v1696_v46  ;;  %4803 = vmatmul.mubr.msk.f32.vlgmr.msra.gmra.mrb[4].mxu1 %vm349_vm3, %v1696_v46 }
0x13af   :  { %1699 = vst.msk [vmem:[#allocation2 + $0x30] sm:$0xff] %vm454_vm2, %v1696_v46  ;;  %5186 = vmatpush1.bf16.msra.mxu1 %v6690_v48  ;;  %1869 = vmatprep.mubr.f32.mxu1 %v6181_v3 }
0x13b0   :  { %5188 = vmatprep.subr.bf16.mxu1 %v6692_v50 }
0x13b3   :  { %5190 = vmatpush1.bf16.msra.mxu1 %v6709_v57 }
0x13b4   :  { %5192 = vmatprep.subr.bf16.mxu1 %v6712_v58 }
0x13b7   :  { %5194 = vmatpush1.bf16.msra.mxu1 %v6729_v62 }
0x13b8   :  { %5196 = vmatprep.subr.bf16.mxu1 %v6732_v63 }
0x13bb   :  { %5198 = vmatpush1.bf16.msra.mxu1 %v6743_v2 }
0x13bc   :  { %5200 = vmatprep.subr.bf16.mxu1 %v6665_v55 }
0x1481   :  { %v1768_v51 = vpop.f32.mrb[4].mxu1 }
0x1482   :  { %v5615_v52 = vadd.f32 %v1768_v51, %v6772_v5  ;;  %v1770_v53 = vpop.f32.mrb[5].mxu1 }
0x1483   :  { %v5616_v59 = vadd.f32 %v1770_v53, %v6776_v28 }
0x1484   :  { %v4804_v56 = vmul.f32 -1.442695, %v5615_v52 }
0x1485   :  { %v4805_v4 = vmul.f32 -1.442695, %v5616_v59 }
0x1486   :  { %5911 = vpow2.f32 %v4804_v56 }
0x1487   :  { %5913 = vtanh.f32 %v5616_v59 }
0x1490   :  { %v5912_v60 = vpop.eup %5911 }
0x1491   :  { %v1781_v16 = vadd.f32 1.0, %v5912_v60  ;;  %v5914_v61 = vpop.eup %5913 }
0x1493   :  { %5915 = vrcp.f32 %v1781_v16 }
0x1494   :  { %5917 = vpow2.f32 %v4805_v4 }
0x149d   :  { %v5916_v0 = vpop.eup %5915 }
0x149e   :  { %v1789_v1 = vmul.f32 %v5916_v0, %v5914_v61  ;;  %v5918_v6 = vpop.eup %5917  ;;  %v1788_v8 = vmul.f32 %v5916_v0, %v1691_v39 }
0x149f   :  { %v1782_v7 = vadd.f32 1.0, %v5918_v6 }
0x14a0   :  { %1791 = vrot.lane.b32.xlu0 %v1789_v1, %s6182_s3 }
0x14a1   :  { %5919 = vrcp.f32 %v1782_v7 }
0x14ab   :  { %v5920_v29 = vpop.eup %5919 }
0x1512   :  { %v1792_v9 = vpop.permute.xlu0 %1791 }
0x1513   :  { %v1794_v10 = vadd.f32 %v1792_v9, %v1788_v8 }
0x1515   :  { %5921 = vtanh.f32 %v1794_v10 }
0x151f   :  { %v5922_v34 = vpop.eup %5921 }
0x1520   :  { %v1796_v35 = vmul.f32 %v5922_v34, %v5920_v29 }
0x1522   :  { %1798 = vrot.lane.b32.xlu1 %v1796_v35, %s6182_s3 }
0x1594   :  { %v1799_v11 = vpop.permute.xlu1 %1798 }
0x1595   :  { %1801 = vst.msk [vmem:[#allocation2 + $0x10] sm:$0xff] %vm452_vm1, %v1799_v11  ;;  %4806 = vmatmul.mubr.msk.f32.vlgmr.msra.gmra.mrb[6].mxu1 %vm349_vm3, %v1799_v11 }
0x1596   :  { %1802 = vst.msk [vmem:[#allocation2 + $0x28] sm:$0xff] %vm454_vm2, %v1799_v11  ;;  %5202 = vmatpush1.bf16.msra.mxu1 %v6690_v48  ;;  %1972 = vmatprep.mubr.f32.mxu1 %v6181_v3 }
0x1597   :  { %5204 = vmatprep.subr.bf16.mxu1 %v6692_v50 }
0x159a   :  { %5206 = vmatpush1.bf16.msra.mxu1 %v6709_v57 }
0x159b   :  { %5208 = vmatprep.subr.bf16.mxu1 %v6712_v58 }
0x159e   :  { %5210 = vmatpush1.bf16.msra.mxu1 %v6729_v62 }
0x159f   :  { %5212 = vmatprep.subr.bf16.mxu1 %v6732_v63 }
0x15a2   :  { %5214 = vmatpush1.bf16.msra.mxu1 %v6743_v2 }
0x15a3   :  { %5216 = vmatprep.subr.bf16.mxu1 %v6665_v55 }
0x1668   :  { %v1871_v40 = vpop.f32.mrb[6].mxu1 }
0x1669   :  { %v5617_v41 = vadd.f32 %v1871_v40, %v6772_v5  ;;  %v1873_v44 = vpop.f32.mrb[7].mxu1 }
0x166a   :  { %v5618_v13 = vadd.f32 %v1873_v44, %v6776_v28 }
0x166b   :  { %v4807_v12 = vmul.f32 -1.442695, %v5617_v41 }
0x166c   :  { %v4808_v20 = vmul.f32 -1.442695, %v5618_v13 }
0x166d   :  { %5923 = vpow2.f32 %v4807_v12 }
0x166e   :  { %5925 = vtanh.f32 %v5618_v13 }
0x1677   :  { %v5924_v14 = vpop.eup %5923 }
0x1678   :  { %v1884_v15 = vadd.f32 1.0, %v5924_v14  ;;  %v5926_v17 = vpop.eup %5925 }
0x167a   :  { %5927 = vrcp.f32 %v1884_v15 }
0x167b   :  { %5929 = vpow2.f32 %v4808_v20 }
0x1684   :  { %v5928_v18 = vpop.eup %5927 }
0x1685   :  { %v1892_v19 = vmul.f32 %v5928_v18, %v5926_v17  ;;  %v5930_v21 = vpop.eup %5929  ;;  %v1891_v23 = vmul.f32 %v5928_v18, %v1794_v10 }
0x1686   :  { %v1885_v22 = vadd.f32 1.0, %v5930_v21 }
0x1687   :  { %1894 = vrot.lane.b32.xlu0 %v1892_v19, %s6182_s3 }
0x1688   :  { %5931 = vrcp.f32 %v1885_v22 }
0x1692   :  { %v5932_v26 = vpop.eup %5931 }
0x16f9   :  { %v1895_v24 = vpop.permute.xlu0 %1894 }
0x16fa   :  { %v1897_v25 = vadd.f32 %v1895_v24, %v1891_v23 }
0x16fc   :  { %5933 = vtanh.f32 %v1897_v25 }
0x1706   :  { %v5934_v27 = vpop.eup %5933 }
0x1707   :  { %v1899_v30 = vmul.f32 %v5934_v27, %v5932_v26 }
0x1709   :  { %1901 = vrot.lane.b32.xlu1 %v1899_v30, %s6182_s3 }
0x177b   :  { %v1902_v31 = vpop.permute.xlu1 %1901 }
0x177c   :  { %1904 = vst.msk [vmem:[#allocation2 + $0x18] sm:$0xff] %vm452_vm1, %v1902_v31  ;;  %4809 = vmatmul.mubr.msk.f32.vlgmr.msra.gmra.mrb[8].mxu1 %vm349_vm3, %v1902_v31 }
0x177d   :  { %1905 = vst.msk [vmem:[#allocation2 + $0x20] sm:$0xff] %vm454_vm2, %v1902_v31  ;;  %5218 = vmatpush1.bf16.msra.mxu1 %v6690_v48  ;;  %2075 = vmatprep.mubr.f32.mxu1 %v6181_v3 }
0x177e   :  { %5220 = vmatprep.subr.bf16.mxu1 %v6692_v50 }
0x1781   :  { %5222 = vmatpush1.bf16.msra.mxu1 %v6709_v57 }
0x1782   :  { %5224 = vmatprep.subr.bf16.mxu1 %v6712_v58 }
0x1785   :  { %5226 = vmatpush1.bf16.msra.mxu1 %v6729_v62 }
0x1786   :  { %5228 = vmatprep.subr.bf16.mxu1 %v6732_v63 }
0x1789   :  { %5230 = vmatpush1.bf16.msra.mxu1 %v6743_v2 }
0x178a   :  { %5232 = vmatprep.subr.bf16.mxu1 %v6665_v55 }
0x184f   :  { %v1974_v32 = vpop.f32.mrb[8].mxu1 }
0x1850   :  { %v5619_v49 = vadd.f32 %v1974_v32, %v6772_v5  ;;  %v1976_v33 = vpop.f32.mrb[9].mxu1 }
0x1851   :  { %v5620_v37 = vadd.f32 %v1976_v33, %v6776_v28 }
0x1852   :  { %v4810_v36 = vmul.f32 -1.442695, %v5619_v49 }
0x1853   :  { %v4811_v46 = vmul.f32 -1.442695, %v5620_v37 }
0x1854   :  { %5935 = vpow2.f32 %v4810_v36 }
0x1855   :  { %5937 = vtanh.f32 %v5620_v37 }
0x185e   :  { %v5936_v38 = vpop.eup %5935 }
0x185f   :  { %v1987_v39 = vadd.f32 1.0, %v5936_v38  ;;  %v5938_v42 = vpop.eup %5937 }
0x1861   :  { %5939 = vrcp.f32 %v1987_v39 }
0x1862   :  { %5941 = vpow2.f32 %v4811_v46 }
0x186b   :  { %v5940_v43 = vpop.eup %5939 }
0x186c   :  { %v1995_v45 = vmul.f32 %v5940_v43, %v5938_v42  ;;  %v5942_v51 = vpop.eup %5941  ;;  %v1994_v53 = vmul.f32 %v5940_v43, %v1897_v25 }
0x186d   :  { %v1988_v52 = vadd.f32 1.0, %v5942_v51  ;;  %v2327_v51 = vld [vmem:[%s7580_s7 + $0x8] sm:$0xff] }
0x186e   :  { %1997 = vrot.lane.b32.xlu0 %v1995_v45, %s6182_s3 }
0x186f   :  { %5943 = vrcp.f32 %v1988_v52 }
0x1879   :  { %v5944_v60 = vpop.eup %5943 }
0x18e0   :  { %v1998_v56 = vpop.permute.xlu0 %1997 }
0x18e1   :  { %v2000_v59 = vadd.f32 %v1998_v56, %v1994_v53  ;;  %v2328_v53 = vld [vmem:[%s7580_s7 + $0x10] sm:$0xff]  ;;  %v2331_v56 = vld [vmem:[%s7580_s7 + $0x28] sm:$0xff] }
0x18e3   :  { %5945 = vtanh.f32 %v2000_v59 }
0x18ed   :  { %v5946_v16 = vpop.eup %5945 }
0x18ee   :  { %v2002_v61 = vmul.f32 %v5946_v16, %v5944_v60 }
0x18f0   :  { %2004 = vrot.lane.b32.xlu1 %v2002_v61, %s6182_s3  ;;  %v2330_v61 = vld [vmem:[%s7580_s7 + $0x20] sm:$0xff] }
0x1962   :  { %v2005_v0 = vpop.permute.xlu1 %2004 }
0x1963   :  { %2007 = vst.msk [vmem:[#allocation2 + $0x20] sm:$0xff] %vm452_vm1, %v2005_v0  ;;  %4812 = vmatmul.mubr.msk.f32.vlgmr.msra.gmra.mrb[10].mxu1 %vm349_vm3, %v2005_v0 }
0x1964   :  { %2008 = vst.msk [vmem:[#allocation2 + $0x18] sm:$0xff] %vm454_vm2, %v2005_v0  ;;  %5234 = vmatpush1.bf16.msra.mxu1 %v6690_v48  ;;  %2178 = vmatprep.mubr.f32.mxu1 %v6181_v3  ;;  %v2332_v0 = vld [vmem:[%s7580_s7 + $0x30] sm:$0xff] }
0x1965   :  { %5236 = vmatprep.subr.bf16.mxu1 %v6692_v50 }
0x1968   :  { %5238 = vmatpush1.bf16.msra.mxu1 %v6709_v57 }
0x1969   :  { %5240 = vmatprep.subr.bf16.mxu1 %v6712_v58 }
0x196c   :  { %5242 = vmatpush1.bf16.msra.mxu1 %v6729_v62 }
0x196d   :  { %5244 = vmatprep.subr.bf16.mxu1 %v6732_v63 }
0x1970   :  { %5246 = vmatpush1.bf16.msra.mxu1 %v6743_v2 }
0x1971   :  { %5248 = vmatprep.subr.bf16.mxu1 %v6665_v55 }
0x1a36   :  { %v2077_v1 = vpop.f32.mrb[10].mxu1 }
0x1a37   :  { %v5621_v4 = vadd.f32 %v2077_v1, %v6772_v5  ;;  %v2079_v6 = vpop.f32.mrb[11].mxu1  ;;  %v5269_v1 = vpack.c.bf16 %v2332_v0, %v2330_v61  ;;  %v2623_v61 = vld [vmem:[%s7581_s8 + $0x10] sm:$0xff]  ;;  %v2626_v0 = vld [vmem:[%s7581_s8 + $0x28] sm:$0xff] }
0x1a38   :  { %v5622_v8 = vadd.f32 %v2079_v6, %v6776_v28 }
0x1a39   :  { %v4813_v7 = vmul.f32 -1.442695, %v5621_v4 }
0x1a3a   :  { %v4814_v11 = vmul.f32 -1.442695, %v5622_v8 }
0x1a3b   :  { %5947 = vpow2.f32 %v4813_v7 }
0x1a3c   :  { %5949 = vtanh.f32 %v5622_v8 }
0x1a45   :  { %v5948_v9 = vpop.eup %5947 }
0x1a46   :  { %v2090_v10 = vadd.f32 1.0, %v5948_v9  ;;  %v5950_v29 = vpop.eup %5949 }
0x1a48   :  { %5951 = vrcp.f32 %v2090_v10  ;;  %v2335_v10 = vld [vmem:[%s7580_s7 + $0x48] sm:$0xff] }
0x1a49   :  { %5953 = vpow2.f32 %v4814_v11  ;;  %v2334_v11 = vld [vmem:[%s7580_s7 + $0x40] sm:$0xff] }
0x1a52   :  { %v5952_v34 = vpop.eup %5951 }
0x1a53   :  { %v2098_v35 = vmul.f32 %v5952_v34, %v5950_v29  ;;  %v5954_v55 = vpop.eup %5953  ;;  %v2097_v41 = vmul.f32 %v5952_v34, %v2000_v59  ;;  %v2333_v59 = vld [vmem:[%s7580_s7 + $0x38] sm:$0xff] }
0x1a54   :  { %v2091_v40 = vadd.f32 1.0, %v5954_v55  ;;  %v5267_v16 = vpack.c.bf16 %v2333_v59, %v2331_v56  ;;  %v2337_v29 = vld [vmem:[%s7580_s7 + $0x58] sm:$0xff]  ;;  %v2336_v55 = vld [vmem:[%s7580_s7 + $0x50] sm:$0xff] }
0x1a55   :  { %2100 = vrot.lane.b32.xlu0 %v2098_v35, %s6182_s3  ;;  %v5271_v35 = vpack.c.bf16 %v2337_v29, %v2335_v10  ;;  %v2632_v10 = vld [vmem:[%s7581_s8 + $0x58] sm:$0xff] }
0x1a56   :  { %5955 = vrcp.f32 %v2091_v40  ;;  %v5273_v40 = vpack.c.bf16 %v2336_v55, %v2334_v11  ;;  %v2631_v11 = vld [vmem:[%s7581_s8 + $0x50] sm:$0xff]  ;;  %v2634_v55 = vld [vmem:[%s7581_s8 + $0x68] sm:$0xff] }
0x1a60   :  { %v5956_v13 = vpop.eup %5955 }
0x1ac7   :  { %v2101_v44 = vpop.permute.xlu0 %2100 }
0x1ac8   :  { %v2103_v12 = vadd.f32 %v2101_v44, %v2097_v41  ;;  %v2339_v41 = vld [vmem:[%s7580_s7 + $0x68] sm:$0xff]  ;;  %v2341_v44 = vld [vmem:[%s7580_s7 + $0x78] sm:$0xff] }
0x1aca   :  { %5957 = vtanh.f32 %v2103_v12 }
0x1ad4   :  { %v5958_v14 = vpop.eup %5957 }
0x1ad5   :  { %v2105_v15 = vmul.f32 %v5958_v14, %v5956_v13  ;;  %v5275_v13 = vpack.c.bf16 %v2341_v44, %v2339_v41  ;;  %v2340_v14 = vld [vmem:[%s7580_s7 + $0x70] sm:$0xff] }
0x1ad7   :  { %2107 = vrot.lane.b32.xlu1 %v2105_v15, %s6182_s3 }
0x1b49   :  { %v2108_v17 = vpop.permute.xlu1 %2107 }
0x1b4a   :  { %2110 = vst.msk [vmem:[#allocation2 + $0x28] sm:$0xff] %vm452_vm1, %v2108_v17  ;;  %4815 = vmatmul.mubr.msk.f32.vlgmr.msra.gmra.mrb[12].mxu1 %vm349_vm3, %v2108_v17 }
0x1b4b   :  { %2111 = vst.msk [vmem:[#allocation2 + $0x10] sm:$0xff] %vm454_vm2, %v2108_v17  ;;  %5250 = vmatpush1.bf16.msra.mxu1 %v6690_v48  ;;  %2281 = vmatprep.mubr.f32.mxu1 %v6181_v3  ;;  %v4830_v17 = vld [vmem:[%s7580_s7 + $0x88] sm:$0xff] }
0x1b4c   :  { %5252 = vmatprep.subr.bf16.mxu1 %v6692_v50 }
0x1b4f   :  { %5254 = vmatpush1.bf16.msra.mxu1 %v6709_v57 }
0x1b50   :  { %5256 = vmatprep.subr.bf16.mxu1 %v6712_v58 }
0x1b51   :  { %v2323_v56 = vld [vmem:[#allocation2 + $0x28] sm:$0xff] }
0x1b53   :  { %5258 = vmatpush1.bf16.msra.mxu1 %v6729_v62 }
0x1b54   :  { %5260 = vmatprep.subr.bf16.mxu1 %v6732_v63 }
0x1b57   :  { %5262 = vmatpush1.bf16.msra.mxu1 %v6743_v2 }
0x1c1d   :  { %v2180_v18 = vpop.f32.mrb[12].mxu1 }
0x1c1e   :  { %v5623_v19 = vadd.f32 %v2180_v18, %v6772_v5  ;;  %v2182_v20 = vpop.f32.mrb[13].mxu1  ;;  %v4832_v18 = vld [vmem:[%s7580_s7 + $0x98] sm:$0xff] }
0x1c1f   :  { %v5624_v48 = vadd.f32 %v2182_v20, %v6776_v28  ;;  %v5279_v20 = vpack.c.bf16 %v4832_v18, %v4830_v17 }
0x1c20   :  { %v4816_v21 = vmul.f32 -1.442695, %v5623_v19 }
0x1c21   :  { %v4817_v62 = vmul.f32 -1.442695, %v5624_v48 }
0x1c22   :  { %5959 = vpow2.f32 %v4816_v21 }
0x1c23   :  { %5961 = vtanh.f32 %v5624_v48 }
0x1c2c   :  { %v5960_v22 = vpop.eup %5959 }
0x1c2d   :  { %v2193_v50 = vadd.f32 1.0, %v5960_v22  ;;  %v5962_v57 = vpop.eup %5961 }
0x1c2f   :  { %5963 = vrcp.f32 %v2193_v50  ;;  %v4829_v50 = vld [vmem:[%s7580_s7 + $0x80] sm:$0xff] }
0x1c30   :  { %5965 = vpow2.f32 %v4817_v62 }
0x1c39   :  { %v5964_v58 = vpop.eup %5963 }
0x1c3a   :  { %v2201_v23 = vmul.f32 %v5964_v58, %v5962_v57  ;;  %v5966_v63 = vpop.eup %5965  ;;  %v2200_v24 = vmul.f32 %v5964_v58, %v2103_v12  ;;  %v2338_v12 = vld [vmem:[%s7580_s7 + $0x60] sm:$0xff]  ;;  %v4831_v57 = vld [vmem:[%s7580_s7 + $0x90] sm:$0xff]  ;;  %v4834_v58 = vld [vmem:[%s7580_s7 + $0xa8] sm:$0xff] }
0x1c3b   :  { %v2194_v2 = vadd.f32 1.0, %v5966_v63  ;;  %v5277_v15 = vpack.c.bf16 %v2340_v14, %v2338_v12  ;;  %v5281_v62 = vpack.c.bf16 %v4831_v57, %v4829_v50  ;;  %v2633_v12 = vld [vmem:[%s7581_s8 + $0x60] sm:$0xff] }
0x1c3c   :  { %2203 = vrot.lane.b32.xlu0 %v2201_v23, %s6182_s3  ;;  %v4836_v23 = vld [vmem:[%s7580_s7 + $0xb8] sm:$0xff] }
0x1c3d   :  { %5967 = vrcp.f32 %v2194_v2  ;;  %v5283_v63 = vpack.c.bf16 %v4836_v23, %v4834_v58  ;;  %v4833_v2 = vld [vmem:[%s7580_s7 + $0xa0] sm:$0xff] }
0x1c47   :  { %v5968_v27 = vpop.eup %5967 }
0x1cae   :  { %v2204_v25 = vpop.permute.xlu0 %2203 }
0x1caf   :  { %v2206_v26 = vadd.f32 %v2204_v25, %v2200_v24  ;;  %v4835_v24 = vld [vmem:[%s7580_s7 + $0xb0] sm:$0xff] }
0x1cb1   :  { %5969 = vtanh.f32 %v2206_v26 }
0x1cbb   :  { %v5970_v30 = vpop.eup %5969 }
0x1cbc   :  { %v2208_v31 = vmul.f32 %v5970_v30, %v5968_v27  ;;  %v4840_v27 = vld [vmem:[%s7580_s7 + $0xd8] sm:$0xff]  ;;  %v5285_v30 = vpack.c.bf16 %v4835_v24, %v4833_v2 }
0x1cbe   :  { %2210 = vrot.lane.b32.xlu1 %v2208_v31, %s6182_s3 }
0x1d30   :  { %v2211_v32 = vpop.permute.xlu1 %2210 }
0x1d31   :  { %2213 = vst.msk [vmem:[#allocation2 + $0x30] sm:$0xff] %vm452_vm1, %v2211_v32  ;;  %4818 = vmatmul.mubr.msk.f32.vlgmr.msra.gmra.mrb[14].mxu1 %vm349_vm3, %v2211_v32 }
0x1d32   :  { %2214 = vst.msk [vmem:[#allocation2 + $0x8] sm:$0xff] %vm454_vm2, %v2211_v32  ;;  %3583 = vmatprep.mubr.f32.mxu1 %v6181_v3  ;;  %v4837_v32 = vld [vmem:[%s7580_s7 + $0xc0] sm:$0xff] }
0x1d38   :  { %v2324_v59 = vld [vmem:[#allocation2 + $0x30] sm:$0xff] }
0x1e04   :  { %v2283_v49 = vpop.f32.mrb[14].mxu1 }
0x1e05   :  { %v5625_v33 = vadd.f32 %v2283_v49, %v6772_v5  ;;  %v2285_v36 = vpop.f32.mrb[15].mxu1  ;;  %v2329_v5 = vld [vmem:[%s7580_s7 + $0x18] sm:$0xff]  ;;  %v4839_v49 = vld [vmem:[%s7580_s7 + $0xd0] sm:$0xff] }
0x1e06   :  { %v5626_v38 = vadd.f32 %v2285_v36, %v6776_v28  ;;  %v2326_v28 = vld [vmem:[%s7580_s7] sm:$0xff]  ;;  %v5263_v52 = vpack.c.bf16 %v2329_v5, %v2327_v51  ;;  %v4842_v36 = vld [vmem:[%s7580_s7 + $0xe8] sm:$0xff]  ;;  %v2624_v51 = vld [vmem:[%s7581_s8 + $0x18] sm:$0xff] }
0x1e07   :  { %v4819_v37 = vmul.f32 -1.442695, %v5625_v33  ;;  %v5265_v60 = vpack.c.bf16 %v2328_v53, %v2326_v28  ;;  %v2319_v33 = vld [vmem:[#allocation2 + $0x8] sm:$0xff]  ;;  %v2322_v53 = vld [vmem:[#allocation2 + $0x20] sm:$0xff] }
0x1e08   :  { %5264 = vmatprep.subr.bf16.mxu0 %v5263_v52  ;;  %v4820_v4 = vmul.f32 -1.442695, %v5626_v38  ;;  %v2321_v52 = vld [vmem:[#allocation2 + $0x18] sm:$0xff] }
0x1e09   :  { %5971 = vpow2.f32 %v4819_v37  ;;  %5266 = vmatpush1.bf16.msra.mxu0 %v5265_v60  ;;  %v4844_v37 = vld [vmem:[%s7580_s7 + $0xf8] sm:$0xff] }
0x1e0a   :  { %5973 = vtanh.f32 %v5626_v38  ;;  %5268 = vmatprep.subr.bf16.mxu0 %v5267_v16  ;;  %v5289_v38 = vpack.c.bf16 %v4839_v49, %v4837_v32  ;;  %v2621_v16 = vld [vmem:[%s7581_s8] sm:$0xff] }
0x1e0d   :  { %5270 = vmatpush1.bf16.msra.mxu0 %v5269_v1  ;;  %v2628_v1 = vld [vmem:[%s7581_s8 + $0x38] sm:$0xff] }
0x1e0e   :  { %5272 = vmatprep.subr.bf16.mxu0 %v5271_v35  ;;  %v2629_v35 = vld [vmem:[%s7581_s8 + $0x40] sm:$0xff] }
0x1e0f   :  { %v7058_v41 = vpack.c.bf16 %v2631_v11, %v2629_v35 }
0x1e11   :  { %5274 = vmatpush1.bf16.msra.mxu0 %v5273_v40  ;;  %v2636_v40 = vld [vmem:[%s7581_s8 + $0x78] sm:$0xff] }
0x1e12   :  { %5276 = vmatprep.subr.bf16.mxu0 %v5275_v13  ;;  %v7061_v44 = vpack.c.bf16 %v2636_v40, %v2634_v55  ;;  %v2635_v13 = vld [vmem:[%s7581_s8 + $0x70] sm:$0xff] }
0x1e13   :  { %v5972_v39 = vpop.eup %5971  ;;  %v7072_v14 = vpack.c.bf16 %v2635_v13, %v2633_v12 }
0x1e14   :  { %v2296_v42 = vadd.f32 1.0, %v5972_v39  ;;  %v5974_v43 = vpop.eup %5973  ;;  %v5291_v39 = vpack.c.bf16 %v4844_v37, %v4842_v36 }
0x1e15   :  { %5278 = vmatpush1.bf16.msra.mxu0 %v5277_v15  ;;  %v2342_v15 = vld [vmem:[%s7582_s9] sm:$0x3] }
0x1e16   :  { %5975 = vrcp.f32 %v2296_v42  ;;  %5280 = vmatprep.subr.bf16.mxu0 %v5279_v20  ;;  %v4841_v42 = vld [vmem:[%s7580_s7 + $0xe0] sm:$0xff]  ;;  %v7101_v17 = vrot.slane %v2342_v15, %v6435_v47 }
0x1e17   :  { %5977 = vpow2.f32 %v4820_v4  ;;  %v7019_v4 = vpack.c.bf16 %v2623_v61, %v2621_v16 }
0x1e20   :  { %v5976_v45 = vpop.eup %5975 }
0x1e21   :  { %v2304_v46 = vmul.f32 %v5976_v45, %v5974_v43  ;;  %v5978_v6 = vpop.eup %5977  ;;  %v2303_v8 = vmul.f32 %v5976_v45, %v2206_v26  ;;  %v4838_v26 = vld [vmem:[%s7580_s7 + $0xc8] sm:$0xff]  ;;  %v4843_v43 = vld [vmem:[%s7580_s7 + $0xf0] sm:$0xff] }
0x1e22   :  { %v2297_v7 = vadd.f32 1.0, %v5978_v6  ;;  %v5287_v31 = vpack.c.bf16 %v4840_v27, %v4838_v26  ;;  %v2320_v45 = vld [vmem:[#allocation2 + $0x10] sm:$0xff]  ;;  %v5293_v5 = vpack.c.bf16 %v4843_v43, %v4841_v42  ;;  %v7021_v6 = vpack.c.bf16 %v2628_v1, %v2626_v0 }
0x1e23   :  { %2306 = vrot.lane.b32.xlu0 %v2304_v46, %s6182_s3  ;;  %v2622_v46 = vld [vmem:[%s7581_s8 + $0x8] sm:$0xff] }
0x1e24   :  { %5979 = vrcp.f32 %v2297_v7  ;;  %v6994_v28 = vpack.c.bf16 %v2624_v51, %v2622_v46  ;;  %v2625_v7 = vld [vmem:[%s7581_s8 + $0x20] sm:$0xff] }
0x1e2e   :  { %v5980_v19 = vpop.eup %5979 }
0x1e95   :  { %v2307_v9 = vpop.permute.xlu0 %2306 }
0x1e96   :  { %v2309_v34 = vadd.f32 %v2307_v9, %v2303_v8  ;;  %v2627_v8 = vld [vmem:[%s7581_s8 + $0x30] sm:$0xff]  ;;  %v2630_v9 = vld [vmem:[%s7581_s8 + $0x48] sm:$0xff] }
0x1e97   :  { %v7038_v29 = vpack.c.bf16 %v2627_v8, %v2625_v7 }
0x1e98   :  { %5981 = vtanh.f32 %v2309_v34  ;;  %v7041_v34 = vpack.c.bf16 %v2632_v10, %v2630_v9 }
0x1ea2   :  { %v5982_v21 = vpop.eup %5981 }
0x1ea3   :  { %v2311_v48 = vmul.f32 %v5982_v21, %v5980_v19 }
0x1ea5   :  { %2313 = vrot.lane.b32.xlu1 %v2311_v48, %s6182_s3  ;;  %v7105_v48 = vrot.slane %v2342_v15, %v6444_v54 }
0x1f17   :  { %v2314_v22 = vpop.permute.xlu1 %2313 }
0x1f18   :  { %2316 = vst.msk [vmem:[#allocation2 + $0x38] sm:$0xff] %vm452_vm1, %v2314_v22 }
0x1f19   :  { %2317 = vst.msk [vmem:[#allocation2] sm:$0xff] %vm454_vm2, %v2314_v22 }
0x1f1f   :  { %v2325_v60 = vld [vmem:[#allocation2 + $0x38] sm:$0xff] }
0x1f20   :  { %v2318_v25 = vld [vmem:[#allocation2] sm:$0xff] }
0x1f21   :  { %4821 = vmatmul.mubr.msk.f32.vlgmr.msra.gmra.mrb[16].mxu0 %vm349_vm3, %v2318_v25 }
0x1f22   :  { %5282 = vmatpush1.bf16.msra.mxu0 %v5281_v62  ;;  %2448 = vmatprep.mubr.f32.mxu0 %v6181_v3 }
0x1f23   :  { %5284 = vmatprep.subr.bf16.mxu0 %v5283_v63 }
0x1f25   :  { %4822 = vmatmul.mubr.msk.f32.gmra.mrb[18].mxu0 %vm349_vm3, %v2319_v33 }
0x1f26   :  { %2454 = vmatprep.mubr.f32.mxu0 %v6181_v3  ;;  %5286 = vmatpush1.bf16.msra.mxu0 %v5285_v30 }
0x1f27   :  { %5288 = vmatprep.subr.bf16.mxu0 %v5287_v31 }
0x1f29   :  { %4823 = vmatmul.mubr.msk.f32.gmra.mrb[20].mxu0 %vm349_vm3, %v2320_v45 }
0x1f2a   :  { %2460 = vmatprep.mubr.f32.mxu0 %v6181_v3  ;;  %5290 = vmatpush1.bf16.msra.mxu0 %v5289_v38 }
0x1f2b   :  { %5292 = vmatprep.subr.bf16.mxu0 %v5291_v39 }
0x1f2d   :  { %4824 = vmatmul.mubr.msk.f32.gmra.mrb[22].mxu0 %vm349_vm3, %v2321_v52 }
0x1f2e   :  { %2466 = vmatprep.mubr.f32.mxu0 %v6181_v3  ;;  %5294 = vmatpush1.bf16.msra.mxu0 %v5293_v5 }
0x1f2f   :  { %5296 = vmatprep.subr.bf16.mxu0 %v6994_v28 }
0x1f31   :  { %4825 = vmatmul.mubr.msk.f32.gmra.mrb[24].mxu0 %vm349_vm3, %v2322_v53 }
0x1f32   :  { %2472 = vmatprep.mubr.f32.mxu0 %v6181_v3 }
0x1f35   :  { %4826 = vmatmul.mubr.msk.f32.gmra.mrb[26].mxu0 %vm349_vm3, %v2323_v56 }
0x1f36   :  { %2478 = vmatprep.mubr.f32.mxu0 %v6181_v3 }
0x1f39   :  { %4827 = vmatmul.mubr.msk.f32.gmra.mrb[28].mxu0 %vm349_vm3, %v2324_v59 }
0x1f3a   :  { %2484 = vmatprep.mubr.f32.mxu0 %v6181_v3 }
0x1f3d   :  { %4828 = vmatmul.mubr.msk.f32.gmra.mrb[30].mxu0 %vm349_vm3, %v2325_v60 }
0x1f3e   :  { %2572 = vmatprep.mubr.f32.mxu0 %v6181_v3 }
0x1f45   :  { %4845 = vmatmul.mubr.msk.f32.vlgmr.msra.gmra.mrb[30].mxu0 %vm349_vm3, %v2318_v25 }
0x1f46   :  { %5298 = vmatpush1.bf16.msra.mxu0 %v7019_v4  ;;  %2578 = vmatprep.mubr.f32.mxu0 %v6181_v3 }
0x1f47   :  { %5300 = vmatprep.subr.bf16.mxu0 %v7021_v6 }
0x1f49   :  { %4846 = vmatmul.mubr.msk.f32.gmra.mrb[28].mxu0 %vm349_vm3, %v2319_v33 }
0x1f4a   :  { %2584 = vmatprep.mubr.f32.mxu0 %v6181_v3  ;;  %5302 = vmatpush1.bf16.msra.mxu0 %v7038_v29 }
0x1f4b   :  { %5304 = vmatprep.subr.bf16.mxu0 %v7041_v34 }
0x1f4d   :  { %4847 = vmatmul.mubr.msk.f32.gmra.mrb[26].mxu0 %vm349_vm3, %v2320_v45 }
0x1f4e   :  { %2590 = vmatprep.mubr.f32.mxu0 %v6181_v3  ;;  %5306 = vmatpush1.bf16.msra.mxu0 %v7058_v41 }
0x1f4f   :  { %5308 = vmatprep.subr.bf16.mxu0 %v7061_v44 }
0x1f51   :  { %4848 = vmatmul.mubr.msk.f32.gmra.mrb[24].mxu0 %vm349_vm3, %v2321_v52 }
0x1f52   :  { %2596 = vmatprep.mubr.f32.mxu0 %v6181_v3  ;;  %5310 = vmatpush1.bf16.msra.mxu0 %v7072_v14 }
0x1f53   :  { %5312 = vmatprep.subr.bf16.mxu0 %v6994_v28 }
0x1f55   :  { %4849 = vmatmul.mubr.msk.f32.gmra.mrb[22].mxu0 %vm349_vm3, %v2322_v53 }
0x1f56   :  { %2602 = vmatprep.mubr.f32.mxu0 %v6181_v3 }
0x1f59   :  { %4850 = vmatmul.mubr.msk.f32.gmra.mrb[20].mxu0 %vm349_vm3, %v2323_v56 }
0x1f5a   :  { %2608 = vmatprep.mubr.f32.mxu0 %v6181_v3 }
0x1f5d   :  { %4851 = vmatmul.mubr.msk.f32.gmra.mrb[18].mxu0 %vm349_vm3, %v2324_v59 }
0x1f5e   :  { %2614 = vmatprep.mubr.f32.mxu0 %v6181_v3 }
0x1f61   :  { %4852 = vmatmul.mubr.msk.f32.gmra.mrb[16].mxu0 %vm349_vm3, %v2325_v60 }
0x1f62   :  { %2701 = vmatprep.mubr.f32.mxu0 %v6181_v3 }
0x1f69   :  { %2702 = vmatmul.mubr.f32.vlgmr.msra.gmra.mrb[16].mxu0 %v6181_v3 }
0x1f6a   :  { %5314 = vmatpush1.bf16.msra.mxu0 %v7019_v4  ;;  %2804 = vmatprep.mubr.f32.mxu0 %v6181_v3 }
0x1f6b   :  { %5316 = vmatprep.subr.bf16.mxu0 %v7021_v6 }
0x1f6e   :  { %5318 = vmatpush1.bf16.msra.mxu0 %v7038_v29 }
0x1f6f   :  { %5320 = vmatprep.subr.bf16.mxu0 %v7041_v34 }
0x1f72   :  { %5322 = vmatpush1.bf16.msra.mxu0 %v7058_v41 }
0x1f73   :  { %5324 = vmatprep.subr.bf16.mxu0 %v7061_v44 }
0x1f76   :  { %5326 = vmatpush1.bf16.msra.mxu0 %v7072_v14 }
0x1f77   :  { %5328 = vmatprep.subr.bf16.mxu0 %v6994_v28 }
0x203c   :  { %v2703_v18 = vpop.f32.mrb[16].mxu0 }
0x203d   :  { %v5627_v19 = vadd.f32 %v2703_v18, %v7101_v17  ;;  %v2705_v20 = vpop.f32.mrb[17].mxu0 }
0x203e   :  { %v5628_v22 = vadd.f32 %v2705_v20, %v7105_v48 }
0x203f   :  { %v4853_v21 = vmul.f32 -1.442695, %v5627_v19 }
0x2040   :  { %v4854_v63 = vmul.f32 -1.442695, %v5628_v22 }
0x2041   :  { %5983 = vpow2.f32 %v4853_v21 }
0x2042   :  { %5985 = vtanh.f32 %v5628_v22 }
0x204b   :  { %v5984_v50 = vpop.eup %5983 }
0x204c   :  { %v2716_v57 = vadd.f32 1.0, %v5984_v50  ;;  %v5986_v58 = vpop.eup %5985 }
0x204e   :  { %5987 = vrcp.f32 %v2716_v57 }
0x204f   :  { %5989 = vpow2.f32 %v4854_v63 }
0x2058   :  { %v5988_v23 = vpop.eup %5987 }
0x2059   :  { %v2724_v62 = vmul.f32 %v5988_v23, %v5986_v58  ;;  %v5990_v2 = vpop.eup %5989  ;;  %v2723_v25 = vmul.f32 0.0, %v5988_v23 }
0x205a   :  { %v2717_v24 = vadd.f32 1.0, %v5990_v2 }
0x205b   :  { %2726 = vrot.lane.b32.xlu0 %v2724_v62, %s6182_s3 }
0x205c   :  { %5991 = vrcp.f32 %v2717_v24 }
0x2066   :  { %v5992_v30 = vpop.eup %5991 }
0x20cd   :  { %v2727_v26 = vpop.permute.xlu0 %2726 }
0x20ce   :  { %v2729_v27 = vadd.f32 %v2727_v26, %v2723_v25 }
0x20d0   :  { %5993 = vtanh.f32 %v2729_v27 }
0x20da   :  { %v5994_v31 = vpop.eup %5993 }
0x20db   :  { %v2731_v32 = vmul.f32 %v5994_v31, %v5992_v30 }
0x20dd   :  { %2733 = vrot.lane.b32.xlu1 %v2731_v32, %s6182_s3 }
0x214f   :  { %v2734_v49 = vpop.permute.xlu1 %2733 }
0x2150   :  { %2736 = vst.msk [vmem:[#allocation2] sm:$0xff] %vm452_vm1, %v2734_v49  ;;  %4855 = vmatmul.mubr.msk.f32.vlgmr.msra.gmra.mrb[18].mxu0 %vm349_vm3, %v2734_v49 }
0x2151   :  { %2737 = vst.msk [vmem:[#allocation2 + $0x38] sm:$0xff] %vm454_vm2, %v2734_v49  ;;  %5330 = vmatpush1.bf16.msra.mxu0 %v7019_v4  ;;  %2907 = vmatprep.mubr.f32.mxu0 %v6181_v3 }
0x2152   :  { %5332 = vmatprep.subr.bf16.mxu0 %v7021_v6 }
0x2155   :  { %5334 = vmatpush1.bf16.msra.mxu0 %v7038_v29 }
0x2156   :  { %5336 = vmatprep.subr.bf16.mxu0 %v7041_v34 }
0x2159   :  { %5338 = vmatpush1.bf16.msra.mxu0 %v7058_v41 }
0x215a   :  { %5340 = vmatprep.subr.bf16.mxu0 %v7061_v44 }
0x215d   :  { %5342 = vmatpush1.bf16.msra.mxu0 %v7072_v14 }
0x215e   :  { %5344 = vmatprep.subr.bf16.mxu0 %v6994_v28 }
0x2223   :  { %v2806_v33 = vpop.f32.mrb[18].mxu0 }
0x2224   :  { %v5629_v36 = vadd.f32 %v2806_v33, %v7101_v17  ;;  %v2808_v37 = vpop.f32.mrb[19].mxu0 }
0x2225   :  { %v5630_v39 = vadd.f32 %v2808_v37, %v7105_v48 }
0x2226   :  { %v4856_v38 = vmul.f32 -1.442695, %v5629_v36 }
0x2227   :  { %v4857_v5 = vmul.f32 -1.442695, %v5630_v39 }
0x2228   :  { %5995 = vpow2.f32 %v4856_v38 }
0x2229   :  { %5997 = vtanh.f32 %v5630_v39 }
0x2232   :  { %v5996_v42 = vpop.eup %5995 }
0x2233   :  { %v2819_v43 = vadd.f32 1.0, %v5996_v42  ;;  %v5998_v45 = vpop.eup %5997 }
0x2235   :  { %5999 = vrcp.f32 %v2819_v43 }
0x2236   :  { %6001 = vpow2.f32 %v4857_v5 }
0x223f   :  { %v6000_v46 = vpop.eup %5999 }
0x2240   :  { %v2827_v51 = vmul.f32 %v6000_v46, %v5998_v45  ;;  %v6002_v52 = vpop.eup %6001  ;;  %v2826_v56 = vmul.f32 %v6000_v46, %v2729_v27 }
0x2241   :  { %v2820_v53 = vadd.f32 1.0, %v6002_v52 }
0x2242   :  { %2829 = vrot.lane.b32.xlu0 %v2827_v51, %s6182_s3 }
0x2243   :  { %6003 = vrcp.f32 %v2820_v53 }
0x224d   :  { %v6004_v16 = vpop.eup %6003 }
0x22b4   :  { %v2830_v59 = vpop.permute.xlu0 %2829 }
0x22b5   :  { %v2832_v60 = vadd.f32 %v2830_v59, %v2826_v56 }
0x22b7   :  { %6005 = vtanh.f32 %v2832_v60 }
0x22c1   :  { %v6006_v61 = vpop.eup %6005 }
0x22c2   :  { %v2834_v0 = vmul.f32 %v6006_v61, %v6004_v16 }
0x22c4   :  { %2836 = vrot.lane.b32.xlu1 %v2834_v0, %s6182_s3 }
0x2336   :  { %v2837_v1 = vpop.permute.xlu1 %2836 }
0x2337   :  { %2839 = vst.msk [vmem:[#allocation2 + $0x8] sm:$0xff] %vm452_vm1, %v2837_v1  ;;  %4858 = vmatmul.mubr.msk.f32.vlgmr.msra.gmra.mrb[20].mxu0 %vm349_vm3, %v2837_v1 }
0x2338   :  { %2840 = vst.msk [vmem:[#allocation2 + $0x30] sm:$0xff] %vm454_vm2, %v2837_v1  ;;  %5346 = vmatpush1.bf16.msra.mxu0 %v7019_v4  ;;  %3010 = vmatprep.mubr.f32.mxu0 %v6181_v3 }
0x2339   :  { %5348 = vmatprep.subr.bf16.mxu0 %v7021_v6 }
0x233c   :  { %5350 = vmatpush1.bf16.msra.mxu0 %v7038_v29 }
0x233d   :  { %5352 = vmatprep.subr.bf16.mxu0 %v7041_v34 }
0x2340   :  { %5354 = vmatpush1.bf16.msra.mxu0 %v7058_v41 }
0x2341   :  { %5356 = vmatprep.subr.bf16.mxu0 %v7061_v44 }
0x2344   :  { %5358 = vmatpush1.bf16.msra.mxu0 %v7072_v14 }
0x2345   :  { %5360 = vmatprep.subr.bf16.mxu0 %v6994_v28 }
0x240a   :  { %v2909_v7 = vpop.f32.mrb[20].mxu0 }
0x240b   :  { %v5631_v8 = vadd.f32 %v2909_v7, %v7101_v17  ;;  %v2911_v9 = vpop.f32.mrb[21].mxu0 }
0x240c   :  { %v5632_v35 = vadd.f32 %v2911_v9, %v7105_v48 }
0x240d   :  { %v4859_v10 = vmul.f32 -1.442695, %v5631_v8 }
0x240e   :  { %v4860_v15 = vmul.f32 -1.442695, %v5632_v35 }
0x240f   :  { %6007 = vpow2.f32 %v4859_v10 }
0x2410   :  { %6009 = vtanh.f32 %v5632_v35 }
0x2419   :  { %v6008_v11 = vpop.eup %6007 }
0x241a   :  { %v2922_v55 = vadd.f32 1.0, %v6008_v11  ;;  %v6010_v40 = vpop.eup %6009 }
0x241c   :  { %6011 = vrcp.f32 %v2922_v55 }
0x241d   :  { %6013 = vpow2.f32 %v4860_v15 }
0x2426   :  { %v6012_v12 = vpop.eup %6011 }
0x2427   :  { %v2930_v13 = vmul.f32 %v6012_v12, %v6010_v40  ;;  %v6014_v18 = vpop.eup %6013  ;;  %v2929_v20 = vmul.f32 %v6012_v12, %v2832_v60 }
0x2428   :  { %v2923_v19 = vadd.f32 1.0, %v6014_v18 }
0x2429   :  { %2932 = vrot.lane.b32.xlu0 %v2930_v13, %s6182_s3 }
0x242a   :  { %6015 = vrcp.f32 %v2923_v19 }
0x2434   :  { %v6016_v50 = vpop.eup %6015 }
0x249b   :  { %v2933_v21 = vpop.permute.xlu0 %2932 }
0x249c   :  { %v2935_v22 = vadd.f32 %v2933_v21, %v2929_v20 }
0x249e   :  { %6017 = vtanh.f32 %v2935_v22 }
0x24a8   :  { %v6018_v57 = vpop.eup %6017 }
0x24a9   :  { %v2937_v58 = vmul.f32 %v6018_v57, %v6016_v50 }
0x24ab   :  { %2939 = vrot.lane.b32.xlu1 %v2937_v58, %s6182_s3 }
0x251d   :  { %v2940_v23 = vpop.permute.xlu1 %2939 }
0x251e   :  { %2942 = vst.msk [vmem:[#allocation2 + $0x10] sm:$0xff] %vm452_vm1, %v2940_v23  ;;  %4861 = vmatmul.mubr.msk.f32.vlgmr.msra.gmra.mrb[22].mxu0 %vm349_vm3, %v2940_v23 }
0x251f   :  { %2943 = vst.msk [vmem:[#allocation2 + $0x28] sm:$0xff] %vm454_vm2, %v2940_v23  ;;  %5362 = vmatpush1.bf16.msra.mxu0 %v7019_v4  ;;  %3113 = vmatprep.mubr.f32.mxu0 %v6181_v3 }
0x2520   :  { %5364 = vmatprep.subr.bf16.mxu0 %v7021_v6 }
0x2523   :  { %5366 = vmatpush1.bf16.msra.mxu0 %v7038_v29 }
0x2524   :  { %5368 = vmatprep.subr.bf16.mxu0 %v7041_v34 }
0x2527   :  { %5370 = vmatpush1.bf16.msra.mxu0 %v7058_v41 }
0x2528   :  { %5372 = vmatprep.subr.bf16.mxu0 %v7061_v44 }
0x252b   :  { %5374 = vmatpush1.bf16.msra.mxu0 %v7072_v14 }
0x252c   :  { %5376 = vmatprep.subr.bf16.mxu0 %v6994_v28 }
0x25f1   :  { %v3012_v62 = vpop.f32.mrb[22].mxu0 }
0x25f2   :  { %v5633_v63 = vadd.f32 %v3012_v62, %v7101_v17  ;;  %v3014_v2 = vpop.f32.mrb[23].mxu0 }
0x25f3   :  { %v5634_v25 = vadd.f32 %v3014_v2, %v7105_v48 }
0x25f4   :  { %v4862_v24 = vmul.f32 -1.442695, %v5633_v63 }
0x25f5   :  { %v4863_v49 = vmul.f32 -1.442695, %v5634_v25 }
0x25f6   :  { %6019 = vpow2.f32 %v4862_v24 }
0x25f7   :  { %6021 = vtanh.f32 %v5634_v25 }
0x2600   :  { %v6020_v26 = vpop.eup %6019 }
0x2601   :  { %v3025_v27 = vadd.f32 1.0, %v6020_v26  ;;  %v6022_v30 = vpop.eup %6021 }
0x2603   :  { %6023 = vrcp.f32 %v3025_v27 }
0x2604   :  { %6025 = vpow2.f32 %v4863_v49 }
0x260d   :  { %v6024_v31 = vpop.eup %6023 }
0x260e   :  { %v3033_v32 = vmul.f32 %v6024_v31, %v6022_v30  ;;  %v6026_v33 = vpop.eup %6025  ;;  %v3032_v37 = vmul.f32 %v6024_v31, %v2935_v22 }
0x260f   :  { %v3026_v36 = vadd.f32 1.0, %v6026_v33 }
0x2610   :  { %3035 = vrot.lane.b32.xlu0 %v3033_v32, %s6182_s3 }
0x2611   :  { %6027 = vrcp.f32 %v3026_v36 }
0x261b   :  { %v6028_v42 = vpop.eup %6027 }
0x2682   :  { %v3036_v38 = vpop.permute.xlu0 %3035 }
0x2683   :  { %v3038_v39 = vadd.f32 %v3036_v38, %v3032_v37 }
0x2685   :  { %6029 = vtanh.f32 %v3038_v39 }
0x268f   :  { %v6030_v43 = vpop.eup %6029 }
0x2690   :  { %v3040_v45 = vmul.f32 %v6030_v43, %v6028_v42 }
0x2692   :  { %3042 = vrot.lane.b32.xlu1 %v3040_v45, %s6182_s3 }
0x2704   :  { %v3043_v46 = vpop.permute.xlu1 %3042 }
0x2705   :  { %3045 = vst.msk [vmem:[#allocation2 + $0x18] sm:$0xff] %vm452_vm1, %v3043_v46  ;;  %4864 = vmatmul.mubr.msk.f32.vlgmr.msra.gmra.mrb[24].mxu0 %vm349_vm3, %v3043_v46 }
0x2706   :  { %3046 = vst.msk [vmem:[#allocation2 + $0x20] sm:$0xff] %vm454_vm2, %v3043_v46  ;;  %5378 = vmatpush1.bf16.msra.mxu0 %v7019_v4  ;;  %3216 = vmatprep.mubr.f32.mxu0 %v6181_v3 }
0x2707   :  { %5380 = vmatprep.subr.bf16.mxu0 %v7021_v6 }
0x270a   :  { %5382 = vmatpush1.bf16.msra.mxu0 %v7038_v29 }
0x270b   :  { %5384 = vmatprep.subr.bf16.mxu0 %v7041_v34 }
0x270e   :  { %5386 = vmatpush1.bf16.msra.mxu0 %v7058_v41 }
0x270f   :  { %5388 = vmatprep.subr.bf16.mxu0 %v7061_v44 }
0x2712   :  { %5390 = vmatpush1.bf16.msra.mxu0 %v7072_v14 }
0x2713   :  { %5392 = vmatprep.subr.bf16.mxu0 %v6994_v28 }
0x27d8   :  { %v3115_v51 = vpop.f32.mrb[24].mxu0 }
0x27d9   :  { %v5635_v5 = vadd.f32 %v3115_v51, %v7101_v17  ;;  %v3117_v52 = vpop.f32.mrb[25].mxu0 }
0x27da   :  { %v5636_v56 = vadd.f32 %v3117_v52, %v7105_v48 }
0x27db   :  { %v4865_v53 = vmul.f32 -1.442695, %v5635_v5 }
0x27dc   :  { %v4866_v1 = vmul.f32 -1.442695, %v5636_v56 }
0x27dd   :  { %6031 = vpow2.f32 %v4865_v53 }
0x27de   :  { %6033 = vtanh.f32 %v5636_v56 }
0x27e7   :  { %v6032_v59 = vpop.eup %6031 }
0x27e8   :  { %v3128_v60 = vadd.f32 1.0, %v6032_v59  ;;  %v6034_v16 = vpop.eup %6033 }
0x27ea   :  { %6035 = vrcp.f32 %v3128_v60 }
0x27eb   :  { %6037 = vpow2.f32 %v4866_v1 }
0x27f4   :  { %v6036_v61 = vpop.eup %6035 }
0x27f5   :  { %v3136_v0 = vmul.f32 %v6036_v61, %v6034_v16  ;;  %v6038_v7 = vpop.eup %6037  ;;  %v3135_v9 = vmul.f32 %v6036_v61, %v3038_v39 }
0x27f6   :  { %v3129_v8 = vadd.f32 1.0, %v6038_v7  ;;  %v3468_v7 = vld [vmem:[%s7583_s10 + $0x8] sm:$0xff] }
0x27f7   :  { %3138 = vrot.lane.b32.xlu0 %v3136_v0, %s6182_s3 }
0x27f8   :  { %6039 = vrcp.f32 %v3129_v8 }
0x2802   :  { %v6040_v11 = vpop.eup %6039 }
0x2869   :  { %v3139_v10 = vpop.permute.xlu0 %3138 }
0x286a   :  { %v3141_v35 = vadd.f32 %v3139_v10, %v3135_v9  ;;  %v3469_v9 = vld [vmem:[%s7583_s10 + $0x10] sm:$0xff]  ;;  %v3472_v10 = vld [vmem:[%s7583_s10 + $0x28] sm:$0xff] }
0x286c   :  { %6041 = vtanh.f32 %v3141_v35 }
0x2876   :  { %v6042_v55 = vpop.eup %6041 }
0x2877   :  { %v3143_v40 = vmul.f32 %v6042_v55, %v6040_v11 }
0x2879   :  { %3145 = vrot.lane.b32.xlu1 %v3143_v40, %s6182_s3  ;;  %v3471_v40 = vld [vmem:[%s7583_s10 + $0x20] sm:$0xff] }
0x28eb   :  { %v3146_v12 = vpop.permute.xlu1 %3145 }
0x28ec   :  { %3148 = vst.msk [vmem:[#allocation2 + $0x20] sm:$0xff] %vm452_vm1, %v3146_v12  ;;  %4867 = vmatmul.mubr.msk.f32.vlgmr.msra.gmra.mrb[26].mxu0 %vm349_vm3, %v3146_v12 }
0x28ed   :  { %3149 = vst.msk [vmem:[#allocation2 + $0x18] sm:$0xff] %vm454_vm2, %v3146_v12  ;;  %5394 = vmatpush1.bf16.msra.mxu0 %v7019_v4  ;;  %3319 = vmatprep.mubr.f32.mxu0 %v6181_v3  ;;  %v3473_v12 = vld [vmem:[%s7583_s10 + $0x30] sm:$0xff] }
0x28ee   :  { %5396 = vmatprep.subr.bf16.mxu0 %v7021_v6 }
0x28f1   :  { %5398 = vmatpush1.bf16.msra.mxu0 %v7038_v29 }
0x28f2   :  { %5400 = vmatprep.subr.bf16.mxu0 %v7041_v34 }
0x28f5   :  { %5402 = vmatpush1.bf16.msra.mxu0 %v7058_v41 }
0x28f6   :  { %5404 = vmatprep.subr.bf16.mxu0 %v7061_v44 }
0x28f9   :  { %5406 = vmatpush1.bf16.msra.mxu0 %v7072_v14 }
0x28fa   :  { %5408 = vmatprep.subr.bf16.mxu0 %v6994_v28 }
0x29bf   :  { %v3218_v13 = vpop.f32.mrb[26].mxu0 }
0x29c0   :  { %v5637_v15 = vadd.f32 %v3218_v13, %v7101_v17  ;;  %v3220_v18 = vpop.f32.mrb[27].mxu0  ;;  %v5429_v13 = vpack.c.bf16 %v3473_v12, %v3471_v40  ;;  %v3764_v40 = vld [vmem:[%s7584_s11 + $0x10] sm:$0xff]  ;;  %v3767_v12 = vld [vmem:[%s7584_s11 + $0x28] sm:$0xff] }
0x29c1   :  { %v5638_v20 = vadd.f32 %v3220_v18, %v7105_v48 }
0x29c2   :  { %v4868_v19 = vmul.f32 -1.442695, %v5637_v15 }
0x29c3   :  { %v4869_v23 = vmul.f32 -1.442695, %v5638_v20 }
0x29c4   :  { %6043 = vpow2.f32 %v4868_v19 }
0x29c5   :  { %6045 = vtanh.f32 %v5638_v20 }
0x29ce   :  { %v6044_v21 = vpop.eup %6043 }
0x29cf   :  { %v3231_v22 = vadd.f32 1.0, %v6044_v21  ;;  %v6046_v50 = vpop.eup %6045 }
0x29d1   :  { %6047 = vrcp.f32 %v3231_v22  ;;  %v3476_v22 = vld [vmem:[%s7583_s10 + $0x48] sm:$0xff] }
0x29d2   :  { %6049 = vpow2.f32 %v4869_v23  ;;  %v3475_v23 = vld [vmem:[%s7583_s10 + $0x40] sm:$0xff] }
0x29db   :  { %v6048_v57 = vpop.eup %6047 }
0x29dc   :  { %v3239_v58 = vmul.f32 %v6048_v57, %v6046_v50  ;;  %v6050_v28 = vpop.eup %6049  ;;  %v3238_v63 = vmul.f32 %v6048_v57, %v3141_v35  ;;  %v3474_v35 = vld [vmem:[%s7583_s10 + $0x38] sm:$0xff] }
0x29dd   :  { %v3232_v62 = vadd.f32 1.0, %v6050_v28  ;;  %v5427_v55 = vpack.c.bf16 %v3474_v35, %v3472_v10  ;;  %v3478_v50 = vld [vmem:[%s7583_s10 + $0x58] sm:$0xff]  ;;  %v3477_v28 = vld [vmem:[%s7583_s10 + $0x50] sm:$0xff] }
0x29de   :  { %3241 = vrot.lane.b32.xlu0 %v3239_v58, %s6182_s3  ;;  %v5431_v58 = vpack.c.bf16 %v3478_v50, %v3476_v22  ;;  %v3773_v22 = vld [vmem:[%s7584_s11 + $0x58] sm:$0xff] }
0x29df   :  { %6051 = vrcp.f32 %v3232_v62  ;;  %v5433_v62 = vpack.c.bf16 %v3477_v28, %v3475_v23  ;;  %v3772_v23 = vld [vmem:[%s7584_s11 + $0x50] sm:$0xff]  ;;  %v3775_v28 = vld [vmem:[%s7584_s11 + $0x68] sm:$0xff] }
0x29e9   :  { %v6052_v25 = vpop.eup %6051 }
0x2a50   :  { %v3242_v2 = vpop.permute.xlu0 %3241 }
0x2a51   :  { %v3244_v24 = vadd.f32 %v3242_v2, %v3238_v63  ;;  %v3480_v63 = vld [vmem:[%s7583_s10 + $0x68] sm:$0xff]  ;;  %v3482_v2 = vld [vmem:[%s7583_s10 + $0x78] sm:$0xff] }
0x2a53   :  { %6053 = vtanh.f32 %v3244_v24 }
0x2a5d   :  { %v6054_v26 = vpop.eup %6053 }
0x2a5e   :  { %v3246_v27 = vmul.f32 %v6054_v26, %v6052_v25  ;;  %v5435_v25 = vpack.c.bf16 %v3482_v2, %v3480_v63  ;;  %v3481_v26 = vld [vmem:[%s7583_s10 + $0x70] sm:$0xff] }
0x2a60   :  { %3248 = vrot.lane.b32.xlu1 %v3246_v27, %s6182_s3 }
0x2ad2   :  { %v3249_v30 = vpop.permute.xlu1 %3248 }
0x2ad3   :  { %3251 = vst.msk [vmem:[#allocation2 + $0x28] sm:$0xff] %vm452_vm1, %v3249_v30  ;;  %4870 = vmatmul.mubr.msk.f32.vlgmr.msra.gmra.mrb[28].mxu0 %vm349_vm3, %v3249_v30 }
0x2ad4   :  { %3252 = vst.msk [vmem:[#allocation2 + $0x10] sm:$0xff] %vm454_vm2, %v3249_v30  ;;  %5410 = vmatpush1.bf16.msra.mxu0 %v7019_v4  ;;  %3422 = vmatprep.mubr.f32.mxu0 %v6181_v3  ;;  %v4885_v30 = vld [vmem:[%s7583_s10 + $0x88] sm:$0xff] }
0x2ad5   :  { %5412 = vmatprep.subr.bf16.mxu0 %v7021_v6 }
0x2ad8   :  { %5414 = vmatpush1.bf16.msra.mxu0 %v7038_v29 }
0x2ad9   :  { %5416 = vmatprep.subr.bf16.mxu0 %v7041_v34 }
0x2ada   :  { %v3464_v10 = vld [vmem:[#allocation2 + $0x28] sm:$0xff] }
0x2adc   :  { %5418 = vmatpush1.bf16.msra.mxu0 %v7058_v41 }
0x2add   :  { %5420 = vmatprep.subr.bf16.mxu0 %v7061_v44 }
0x2ae0   :  { %5422 = vmatpush1.bf16.msra.mxu0 %v7072_v14 }
0x2ba6   :  { %v3321_v31 = vpop.f32.mrb[28].mxu0 }
0x2ba7   :  { %v5639_v32 = vadd.f32 %v3321_v31, %v7101_v17  ;;  %v3323_v49 = vpop.f32.mrb[29].mxu0  ;;  %v4887_v31 = vld [vmem:[%s7583_s10 + $0x98] sm:$0xff] }
0x2ba8   :  { %v5640_v4 = vadd.f32 %v3323_v49, %v7105_v48  ;;  %v5439_v49 = vpack.c.bf16 %v4887_v31, %v4885_v30 }
0x2ba9   :  { %v4871_v33 = vmul.f32 -1.442695, %v5639_v32 }
0x2baa   :  { %v4872_v41 = vmul.f32 -1.442695, %v5640_v4 }
0x2bab   :  { %6055 = vpow2.f32 %v4871_v33 }
0x2bac   :  { %6057 = vtanh.f32 %v5640_v4 }
0x2bb5   :  { %v6056_v36 = vpop.eup %6055 }
0x2bb6   :  { %v3334_v6 = vadd.f32 1.0, %v6056_v36  ;;  %v6058_v29 = vpop.eup %6057 }
0x2bb8   :  { %6059 = vrcp.f32 %v3334_v6  ;;  %v4884_v6 = vld [vmem:[%s7583_s10 + $0x80] sm:$0xff] }
0x2bb9   :  { %6061 = vpow2.f32 %v4872_v41 }
0x2bc2   :  { %v6060_v34 = vpop.eup %6059 }
0x2bc3   :  { %v3342_v37 = vmul.f32 %v6060_v34, %v6058_v29  ;;  %v6062_v44 = vpop.eup %6061  ;;  %v3341_v38 = vmul.f32 %v6060_v34, %v3244_v24  ;;  %v3479_v24 = vld [vmem:[%s7583_s10 + $0x60] sm:$0xff]  ;;  %v4886_v29 = vld [vmem:[%s7583_s10 + $0x90] sm:$0xff]  ;;  %v4889_v34 = vld [vmem:[%s7583_s10 + $0xa8] sm:$0xff] }
0x2bc4   :  { %v3335_v14 = vadd.f32 1.0, %v6062_v44  ;;  %v5437_v27 = vpack.c.bf16 %v3481_v26, %v3479_v24  ;;  %v5441_v41 = vpack.c.bf16 %v4886_v29, %v4884_v6  ;;  %v3774_v24 = vld [vmem:[%s7584_s11 + $0x60] sm:$0xff] }
0x2bc5   :  { %3344 = vrot.lane.b32.xlu0 %v3342_v37, %s6182_s3  ;;  %v4891_v37 = vld [vmem:[%s7583_s10 + $0xb8] sm:$0xff] }
0x2bc6   :  { %6063 = vrcp.f32 %v3335_v14  ;;  %v5443_v44 = vpack.c.bf16 %v4891_v37, %v4889_v34  ;;  %v4888_v14 = vld [vmem:[%s7583_s10 + $0xa0] sm:$0xff] }
0x2bd0   :  { %v6064_v43 = vpop.eup %6063 }
0x2c37   :  { %v3345_v39 = vpop.permute.xlu0 %3344 }
0x2c38   :  { %v3347_v42 = vadd.f32 %v3345_v39, %v3341_v38  ;;  %v4890_v38 = vld [vmem:[%s7583_s10 + $0xb0] sm:$0xff] }
0x2c3a   :  { %6065 = vtanh.f32 %v3347_v42 }
0x2c44   :  { %v6066_v45 = vpop.eup %6065 }
0x2c45   :  { %v3349_v46 = vmul.f32 %v6066_v45, %v6064_v43  ;;  %v4895_v43 = vld [vmem:[%s7583_s10 + $0xd8] sm:$0xff]  ;;  %v5445_v45 = vpack.c.bf16 %v4890_v38, %v4888_v14 }
0x2c47   :  { %3351 = vrot.lane.b32.xlu1 %v3349_v46, %s6182_s3 }
0x2cb9   :  { %v3352_v51 = vpop.permute.xlu1 %3351 }
0x2cba   :  { %3354 = vst.msk [vmem:[#allocation2 + $0x30] sm:$0xff] %vm452_vm1, %v3352_v51  ;;  %4873 = vmatmul.mubr.msk.f32.vlgmr.msra.gmra.mrb[30].mxu0 %vm349_vm3, %v3352_v51 }
0x2cbb   :  { %3355 = vst.msk [vmem:[#allocation2 + $0x8] sm:$0xff] %vm454_vm2, %v3352_v51  ;;  %v4892_v51 = vld [vmem:[%s7583_s10 + $0xc0] sm:$0xff]  ;;  %4964 = vmatprep.mubr.msk.f32.mxu0 %vm6184_vm4, %v6181_v3 }
0x2cc1   :  { %v3465_v35 = vld [vmem:[#allocation2 + $0x30] sm:$0xff] }
0x2d8d   :  { %v3424_v5 = vpop.f32.mrb[30].mxu0 }
0x2d8e   :  { %v5641_v52 = vadd.f32 %v3424_v5, %v7101_v17  ;;  %v3426_v53 = vpop.f32.mrb[31].mxu0  ;;  %v3470_v17 = vld [vmem:[%s7583_s10 + $0x18] sm:$0xff]  ;;  %v4894_v5 = vld [vmem:[%s7583_s10 + $0xd0] sm:$0xff] }
0x2d8f   :  { %v5642_v59 = vadd.f32 %v3426_v53, %v7105_v48  ;;  %v3467_v48 = vld [vmem:[%s7583_s10] sm:$0xff]  ;;  %v5423_v8 = vpack.c.bf16 %v3470_v17, %v3468_v7  ;;  %v4897_v53 = vld [vmem:[%s7583_s10 + $0xe8] sm:$0xff]  ;;  %v3765_v7 = vld [vmem:[%s7584_s11 + $0x18] sm:$0xff] }
0x2d90   :  { %v4874_v56 = vmul.f32 -1.442695, %v5641_v52  ;;  %v5425_v11 = vpack.c.bf16 %v3469_v9, %v3467_v48  ;;  %v3460_v52 = vld [vmem:[#allocation2 + $0x8] sm:$0xff]  ;;  %v3463_v9 = vld [vmem:[#allocation2 + $0x20] sm:$0xff] }
0x2d91   :  { %5424 = vmatprep.subr.bf16.mxu1 %v5423_v8  ;;  %v4875_v15 = vmul.f32 -1.442695, %v5642_v59  ;;  %v3462_v8 = vld [vmem:[#allocation2 + $0x18] sm:$0xff] }
0x2d92   :  { %6067 = vpow2.f32 %v4874_v56  ;;  %5426 = vmatpush1.bf16.msra.mxu1 %v5425_v11  ;;  %v4899_v56 = vld [vmem:[%s7583_s10 + $0xf8] sm:$0xff] }
0x2d93   :  { %6069 = vtanh.f32 %v5642_v59  ;;  %5428 = vmatprep.subr.bf16.mxu1 %v5427_v55  ;;  %v5449_v59 = vpack.c.bf16 %v4894_v5, %v4892_v51  ;;  %v3762_v55 = vld [vmem:[%s7584_s11] sm:$0xff] }
0x2d96   :  { %5430 = vmatpush1.bf16.msra.mxu1 %v5429_v13  ;;  %v3769_v13 = vld [vmem:[%s7584_s11 + $0x38] sm:$0xff] }
0x2d97   :  { %5432 = vmatprep.subr.bf16.mxu1 %v5431_v58  ;;  %v3770_v58 = vld [vmem:[%s7584_s11 + $0x40] sm:$0xff] }
0x2d98   :  { %v7386_v63 = vpack.c.bf16 %v3772_v23, %v3770_v58 }
0x2d9a   :  { %5434 = vmatpush1.bf16.msra.mxu1 %v5433_v62  ;;  %v3777_v62 = vld [vmem:[%s7584_s11 + $0x78] sm:$0xff] }
0x2d9b   :  { %5436 = vmatprep.subr.bf16.mxu1 %v5435_v25  ;;  %v7389_v2 = vpack.c.bf16 %v3777_v62, %v3775_v28  ;;  %v3776_v25 = vld [vmem:[%s7584_s11 + $0x70] sm:$0xff] }
0x2d9c   :  { %v6068_v60 = vpop.eup %6067  ;;  %v7400_v26 = vpack.c.bf16 %v3776_v25, %v3774_v24 }
0x2d9d   :  { %v3437_v16 = vadd.f32 1.0, %v6068_v60  ;;  %v6070_v61 = vpop.eup %6069  ;;  %v5451_v60 = vpack.c.bf16 %v4899_v56, %v4897_v53 }
0x2d9e   :  { %5438 = vmatpush1.bf16.msra.mxu1 %v5437_v27  ;;  %v3483_v27 = vld [vmem:[%s7585_s12] sm:$0x3] }
0x2d9f   :  { %6071 = vrcp.f32 %v3437_v16  ;;  %5440 = vmatprep.subr.bf16.mxu1 %v5439_v49  ;;  %v4896_v16 = vld [vmem:[%s7583_s10 + $0xe0] sm:$0xff]  ;;  %v7429_v30 = vrot.slane %v3483_v27, %v6435_v47 }
0x2da0   :  { %6073 = vpow2.f32 %v4875_v15  ;;  %v7347_v15 = vpack.c.bf16 %v3764_v40, %v3762_v55 }
0x2da9   :  { %v6072_v0 = vpop.eup %6071 }
0x2daa   :  { %v3445_v1 = vmul.f32 %v6072_v0, %v6070_v61  ;;  %v6074_v18 = vpop.eup %6073  ;;  %v3444_v20 = vmul.f32 %v6072_v0, %v3347_v42  ;;  %v4893_v42 = vld [vmem:[%s7583_s10 + $0xc8] sm:$0xff]  ;;  %v4898_v61 = vld [vmem:[%s7583_s10 + $0xf0] sm:$0xff] }
0x2dab   :  { %v3438_v19 = vadd.f32 1.0, %v6074_v18  ;;  %v5447_v46 = vpack.c.bf16 %v4895_v43, %v4893_v42  ;;  %v3461_v0 = vld [vmem:[#allocation2 + $0x10] sm:$0xff]  ;;  %v5453_v17 = vpack.c.bf16 %v4898_v61, %v4896_v16  ;;  %v7349_v18 = vpack.c.bf16 %v3769_v13, %v3767_v12 }
0x2dac   :  { %3447 = vrot.lane.b32.xlu0 %v3445_v1, %s6182_s3  ;;  %v3763_v1 = vld [vmem:[%s7584_s11 + $0x8] sm:$0xff] }
0x2dad   :  { %6075 = vrcp.f32 %v3438_v19  ;;  %v7322_v48 = vpack.c.bf16 %v3765_v7, %v3763_v1  ;;  %v3766_v19 = vld [vmem:[%s7584_s11 + $0x20] sm:$0xff] }
0x2db7   :  { %v6076_v32 = vpop.eup %6075 }
0x2e1e   :  { %v3448_v21 = vpop.permute.xlu0 %3447 }
0x2e1f   :  { %v3450_v57 = vadd.f32 %v3448_v21, %v3444_v20  ;;  %v3768_v20 = vld [vmem:[%s7584_s11 + $0x30] sm:$0xff]  ;;  %v3771_v21 = vld [vmem:[%s7584_s11 + $0x48] sm:$0xff] }
0x2e20   :  { %v7366_v50 = vpack.c.bf16 %v3768_v20, %v3766_v19 }
0x2e21   :  { %6077 = vtanh.f32 %v3450_v57  ;;  %v7369_v57 = vpack.c.bf16 %v3773_v22, %v3771_v21 }
0x2e2b   :  { %v6078_v33 = vpop.eup %6077 }
0x2e2c   :  { %v3452_v4 = vmul.f32 %v6078_v33, %v6076_v32 }
0x2e2e   :  { %3454 = vrot.lane.b32.xlu1 %v3452_v4, %s6182_s3  ;;  %v7433_v4 = vrot.slane %v3483_v27, %v6444_v54 }
0x2ea0   :  { %v3455_v36 = vpop.permute.xlu1 %3454 }
0x2ea1   :  { %3457 = vst.msk [vmem:[#allocation2 + $0x38] sm:$0xff] %vm452_vm1, %v3455_v36 }
0x2ea2   :  { %3458 = vst.msk [vmem:[#allocation2] sm:$0xff] %vm454_vm2, %v3455_v36 }
0x2ea8   :  { %v3466_v11 = vld [vmem:[#allocation2 + $0x38] sm:$0xff] }
0x2ea9   :  { %v3459_v39 = vld [vmem:[#allocation2] sm:$0xff] }
0x2eaa   :  { %4876 = vmatmul.mubr.msk.f32.vlgmr.msra.gmra.mrb[16].mxu1 %vm349_vm3, %v3459_v39 }
0x2eab   :  { %5442 = vmatpush1.bf16.msra.mxu1 %v5441_v41  ;;  %3589 = vmatprep.mubr.f32.mxu1 %v6181_v3 }
0x2eac   :  { %5444 = vmatprep.subr.bf16.mxu1 %v5443_v44 }
0x2eae   :  { %4877 = vmatmul.mubr.msk.f32.gmra.mrb[18].mxu1 %vm349_vm3, %v3460_v52 }
0x2eaf   :  { %3595 = vmatprep.mubr.f32.mxu1 %v6181_v3  ;;  %5446 = vmatpush1.bf16.msra.mxu1 %v5445_v45 }
0x2eb0   :  { %5448 = vmatprep.subr.bf16.mxu1 %v5447_v46 }
0x2eb2   :  { %4878 = vmatmul.mubr.msk.f32.gmra.mrb[20].mxu1 %vm349_vm3, %v3461_v0 }
0x2eb3   :  { %3601 = vmatprep.mubr.f32.mxu1 %v6181_v3  ;;  %5450 = vmatpush1.bf16.msra.mxu1 %v5449_v59 }
0x2eb4   :  { %5452 = vmatprep.subr.bf16.mxu1 %v5451_v60 }
0x2eb6   :  { %4879 = vmatmul.mubr.msk.f32.gmra.mrb[22].mxu1 %vm349_vm3, %v3462_v8 }
0x2eb7   :  { %3607 = vmatprep.mubr.f32.mxu1 %v6181_v3  ;;  %5454 = vmatpush1.bf16.msra.mxu1 %v5453_v17 }
0x2eb8   :  { %5456 = vmatprep.subr.bf16.mxu1 %v7322_v48 }
0x2eba   :  { %4880 = vmatmul.mubr.msk.f32.gmra.mrb[24].mxu1 %vm349_vm3, %v3463_v9 }
0x2ebb   :  { %3613 = vmatprep.mubr.f32.mxu1 %v6181_v3 }
0x2ebe   :  { %4881 = vmatmul.mubr.msk.f32.gmra.mrb[26].mxu1 %vm349_vm3, %v3464_v10 }
0x2ebf   :  { %3619 = vmatprep.mubr.f32.mxu1 %v6181_v3 }
0x2ec2   :  { %4882 = vmatmul.mubr.msk.f32.gmra.mrb[28].mxu1 %vm349_vm3, %v3465_v35 }
0x2ec3   :  { %3625 = vmatprep.mubr.f32.mxu1 %v6181_v3 }
0x2ec6   :  { %4883 = vmatmul.mubr.msk.f32.gmra.mrb[30].mxu1 %vm349_vm3, %v3466_v11 }
0x2ec7   :  { %3713 = vmatprep.mubr.f32.mxu1 %v6181_v3 }
0x2ece   :  { %4900 = vmatmul.mubr.msk.f32.vlgmr.msra.gmra.mrb[30].mxu1 %vm349_vm3, %v3459_v39 }
0x2ecf   :  { %5458 = vmatpush1.bf16.msra.mxu1 %v7347_v15  ;;  %3719 = vmatprep.mubr.f32.mxu1 %v6181_v3 }
0x2ed0   :  { %5460 = vmatprep.subr.bf16.mxu1 %v7349_v18 }
0x2ed2   :  { %4901 = vmatmul.mubr.msk.f32.gmra.mrb[28].mxu1 %vm349_vm3, %v3460_v52 }
0x2ed3   :  { %3725 = vmatprep.mubr.f32.mxu1 %v6181_v3  ;;  %5462 = vmatpush1.bf16.msra.mxu1 %v7366_v50 }
0x2ed4   :  { %5464 = vmatprep.subr.bf16.mxu1 %v7369_v57 }
0x2ed6   :  { %4902 = vmatmul.mubr.msk.f32.gmra.mrb[26].mxu1 %vm349_vm3, %v3461_v0 }
0x2ed7   :  { %3731 = vmatprep.mubr.f32.mxu1 %v6181_v3  ;;  %5466 = vmatpush1.bf16.msra.mxu1 %v7386_v63 }
0x2ed8   :  { %5468 = vmatprep.subr.bf16.mxu1 %v7389_v2 }
0x2eda   :  { %4903 = vmatmul.mubr.msk.f32.gmra.mrb[24].mxu1 %vm349_vm3, %v3462_v8 }
0x2edb   :  { %3737 = vmatprep.mubr.f32.mxu1 %v6181_v3  ;;  %5470 = vmatpush1.bf16.msra.mxu1 %v7400_v26 }
0x2edc   :  { %5472 = vmatprep.subr.bf16.mxu1 %v7322_v48 }
0x2ede   :  { %4904 = vmatmul.mubr.msk.f32.gmra.mrb[22].mxu1 %vm349_vm3, %v3463_v9 }
0x2edf   :  { %3743 = vmatprep.mubr.f32.mxu1 %v6181_v3 }
0x2ee2   :  { %4905 = vmatmul.mubr.msk.f32.gmra.mrb[20].mxu1 %vm349_vm3, %v3464_v10 }
0x2ee3   :  { %3749 = vmatprep.mubr.f32.mxu1 %v6181_v3 }
0x2ee6   :  { %4906 = vmatmul.mubr.msk.f32.gmra.mrb[18].mxu1 %vm349_vm3, %v3465_v35 }
0x2ee7   :  { %3755 = vmatprep.mubr.f32.mxu1 %v6181_v3 }
0x2eea   :  { %4907 = vmatmul.mubr.msk.f32.gmra.mrb[16].mxu1 %vm349_vm3, %v3466_v11 }
0x2eeb   :  { %3842 = vmatprep.mubr.f32.mxu1 %v6181_v3 }
0x2ef2   :  { %3843 = vmatmul.mubr.f32.vlgmr.msra.gmra.mrb[16].mxu1 %v6181_v3 }
0x2ef3   :  { %5474 = vmatpush1.bf16.msra.mxu1 %v7347_v15  ;;  %3944 = vmatprep.mubr.f32.mxu1 %v6181_v3 }
0x2ef4   :  { %5476 = vmatprep.subr.bf16.mxu1 %v7349_v18 }
0x2ef7   :  { %5478 = vmatpush1.bf16.msra.mxu1 %v7366_v50 }
0x2ef8   :  { %5480 = vmatprep.subr.bf16.mxu1 %v7369_v57 }
0x2efb   :  { %5482 = vmatpush1.bf16.msra.mxu1 %v7386_v63 }
0x2efc   :  { %5484 = vmatprep.subr.bf16.mxu1 %v7389_v2 }
0x2eff   :  { %5486 = vmatpush1.bf16.msra.mxu1 %v7400_v26 }
0x2f00   :  { %5488 = vmatprep.subr.bf16.mxu1 %v7322_v48 }
0x2fc5   :  { %v3844_v31 = vpop.f32.mrb[16].mxu1 }
0x2fc6   :  { %v5643_v32 = vadd.f32 %v3844_v31, %v7429_v30  ;;  %v3846_v49 = vpop.f32.mrb[17].mxu1 }
0x2fc7   :  { %v5644_v36 = vadd.f32 %v3846_v49, %v7433_v4 }
0x2fc8   :  { %v4908_v33 = vmul.f32 -1.442695, %v5643_v32 }
0x2fc9   :  { %v4909_v44 = vmul.f32 -1.442695, %v5644_v36 }
0x2fca   :  { %6079 = vpow2.f32 %v4908_v33 }
0x2fcb   :  { %6081 = vtanh.f32 %v5644_v36 }
0x2fd4   :  { %v6080_v6 = vpop.eup %6079 }
0x2fd5   :  { %v3857_v29 = vadd.f32 1.0, %v6080_v6  ;;  %v6082_v34 = vpop.eup %6081 }
0x2fd7   :  { %6083 = vrcp.f32 %v3857_v29 }
0x2fd8   :  { %6085 = vpow2.f32 %v4909_v44 }
0x2fe1   :  { %v6084_v37 = vpop.eup %6083 }
0x2fe2   :  { %v3865_v41 = vmul.f32 %v6084_v37, %v6082_v34  ;;  %v6086_v14 = vpop.eup %6085  ;;  %v3864_v39 = vmul.f32 0.0, %v6084_v37 }
0x2fe3   :  { %v3858_v38 = vadd.f32 1.0, %v6086_v14 }
0x2fe4   :  { %3867 = vrot.lane.b32.xlu0 %v3865_v41, %s6182_s3 }
0x2fe5   :  { %6087 = vrcp.f32 %v3858_v38 }
0x2fef   :  { %v6088_v54 = vpop.eup %6087 }
0x3056   :  { %v3868_v42 = vpop.permute.xlu0 %3867 }
0x3057   :  { %v3870_v43 = vadd.f32 %v3868_v42, %v3864_v39 }
0x3059   :  { %6089 = vtanh.f32 %v3870_v43 }
0x3063   :  { %v6090_v45 = vpop.eup %6089 }
0x3064   :  { %v3872_v46 = vmul.f32 %v6090_v45, %v6088_v54 }
0x3066   :  { %3874 = vrot.lane.b32.xlu1 %v3872_v46, %s6182_s3 }
0x30d8   :  { %v3875_v51 = vpop.permute.xlu1 %3874 }
0x30d9   :  { %3877 = vst.msk [vmem:[#allocation2 + $0x38] sm:$0xff] %vm454_vm2, %v3875_v51  ;;  %4910 = vmatmul.mubr.msk.f32.vlgmr.msra.gmra.mrb[18].mxu1 %vm349_vm3, %v3875_v51 }
0x30da   :  { %5490 = vmatpush1.bf16.msra.mxu1 %v7347_v15  ;;  %4044 = vmatprep.mubr.f32.mxu1 %v6181_v3 }
0x30db   :  { %5492 = vmatprep.subr.bf16.mxu1 %v7349_v18 }
0x30de   :  { %5494 = vmatpush1.bf16.msra.mxu1 %v7366_v50 }
0x30df   :  { %5496 = vmatprep.subr.bf16.mxu1 %v7369_v57 }
0x30e2   :  { %5498 = vmatpush1.bf16.msra.mxu1 %v7386_v63 }
0x30e3   :  { %5500 = vmatprep.subr.bf16.mxu1 %v7389_v2 }
0x30e6   :  { %5502 = vmatpush1.bf16.msra.mxu1 %v7400_v26 }
0x30e7   :  { %5504 = vmatprep.subr.bf16.mxu1 %v7322_v48 }
0x31ac   :  { %v3946_v5 = vpop.f32.mrb[18].mxu1 }
0x31ad   :  { %v5645_v52 = vadd.f32 %v3946_v5, %v7429_v30  ;;  %v3948_v53 = vpop.f32.mrb[19].mxu1 }
0x31ae   :  { %v5646_v59 = vadd.f32 %v3948_v53, %v7433_v4 }
0x31af   :  { %v4911_v56 = vmul.f32 -1.442695, %v5645_v52 }
0x31b0   :  { %v4912_v7 = vmul.f32 -1.442695, %v5646_v59 }
0x31b1   :  { %6091 = vpow2.f32 %v4911_v56 }
0x31b2   :  { %6093 = vtanh.f32 %v5646_v59 }
0x31bb   :  { %v6092_v60 = vpop.eup %6091 }
0x31bc   :  { %v3959_v16 = vadd.f32 1.0, %v6092_v60  ;;  %v6094_v61 = vpop.eup %6093 }
0x31be   :  { %6095 = vrcp.f32 %v3959_v16 }
0x31bf   :  { %6097 = vpow2.f32 %v4912_v7 }
0x31c8   :  { %v6096_v0 = vpop.eup %6095 }
0x31c9   :  { %v3967_v1 = vmul.f32 %v6096_v0, %v6094_v61  ;;  %v6098_v17 = vpop.eup %6097  ;;  %v3966_v9 = vmul.f32 %v6096_v0, %v3870_v43 }
0x31ca   :  { %v3960_v8 = vadd.f32 1.0, %v6098_v17 }
0x31cb   :  { %3969 = vrot.lane.b32.xlu0 %v3967_v1, %s6182_s3 }
0x31cc   :  { %6099 = vrcp.f32 %v3960_v8 }
0x31d6   :  { %v6100_v11 = vpop.eup %6099 }
0x323d   :  { %v3970_v10 = vpop.permute.xlu0 %3969 }
0x323e   :  { %v3972_v35 = vadd.f32 %v3970_v10, %v3966_v9 }
0x3240   :  { %6101 = vtanh.f32 %v3972_v35 }
0x324a   :  { %v6102_v55 = vpop.eup %6101 }
0x324b   :  { %v3974_v40 = vmul.f32 %v6102_v55, %v6100_v11 }
0x324d   :  { %3976 = vrot.lane.b32.xlu1 %v3974_v40, %s6182_s3 }
0x32bf   :  { %v3977_v12 = vpop.permute.xlu1 %3976 }
0x32c0   :  { %4913 = vmatmul.mubr.msk.f32.vlgmr.msra.gmra.mrb[20].mxu1 %vm349_vm3, %v3977_v12 }
0x32c1   :  { %5506 = vmatpush1.bf16.msra.mxu1 %v7347_v15  ;;  %4144 = vmatprep.mubr.f32.mxu1 %v6181_v3 }
0x32c2   :  { %5508 = vmatprep.subr.bf16.mxu1 %v7349_v18 }
0x32c5   :  { %5510 = vmatpush1.bf16.msra.mxu1 %v7366_v50 }
0x32c6   :  { %5512 = vmatprep.subr.bf16.mxu1 %v7369_v57 }
0x32c9   :  { %5514 = vmatpush1.bf16.msra.mxu1 %v7386_v63 }
0x32ca   :  { %5516 = vmatprep.subr.bf16.mxu1 %v7389_v2 }
0x32cd   :  { %5518 = vmatpush1.bf16.msra.mxu1 %v7400_v26 }
0x32ce   :  { %5520 = vmatprep.subr.bf16.mxu1 %v7322_v48 }
0x3393   :  { %v4046_v13 = vpop.f32.mrb[20].mxu1 }
0x3394   :  { %v5647_v19 = vadd.f32 %v4046_v13, %v7429_v30  ;;  %v4048_v20 = vpop.f32.mrb[21].mxu1 }
0x3395   :  { %v5648_v22 = vadd.f32 %v4048_v20, %v7433_v4 }
0x3396   :  { %v4914_v21 = vmul.f32 -1.442695, %v5647_v19 }
0x3397   :  { %v4915_v25 = vmul.f32 -1.442695, %v5648_v22 }
0x3398   :  { %6103 = vpow2.f32 %v4914_v21 }
0x3399   :  { %6105 = vtanh.f32 %v5648_v22 }
0x33a2   :  { %v6104_v58 = vpop.eup %6103 }
0x33a3   :  { %v4059_v23 = vadd.f32 1.0, %v6104_v58  ;;  %v6106_v28 = vpop.eup %6105 }
0x33a5   :  { %6107 = vrcp.f32 %v4059_v23 }
0x33a6   :  { %6109 = vpow2.f32 %v4915_v25 }
0x33af   :  { %v6108_v62 = vpop.eup %6107 }
0x33b0   :  { %v4067_v24 = vmul.f32 %v6108_v62, %v6106_v28  ;;  %v6110_v27 = vpop.eup %6109  ;;  %v4066_v32 = vmul.f32 %v6108_v62, %v3972_v35 }
0x33b1   :  { %v4060_v31 = vadd.f32 1.0, %v6110_v27 }
0x33b2   :  { %4069 = vrot.lane.b32.xlu0 %v4067_v24, %s6182_s3 }
0x33b3   :  { %6111 = vrcp.f32 %v4060_v31 }
0x33bd   :  { %v6112_v36 = vpop.eup %6111 }
0x3424   :  { %v4070_v49 = vpop.permute.xlu0 %4069 }
0x3425   :  { %v4072_v33 = vadd.f32 %v4070_v49, %v4066_v32 }
0x3427   :  { %6113 = vtanh.f32 %v4072_v33 }
0x3431   :  { %v6114_v6 = vpop.eup %6113 }
0x3432   :  { %v4074_v29 = vmul.f32 %v6114_v6, %v6112_v36 }
0x3434   :  { %4076 = vrot.lane.b32.xlu1 %v4074_v29, %s6182_s3 }
0x34a6   :  { %v4077_v34 = vpop.permute.xlu1 %4076 }
0x34a7   :  { %4916 = vmatmul.mubr.msk.f32.vlgmr.msra.gmra.mrb[22].mxu1 %vm349_vm3, %v4077_v34 }
0x34a8   :  { %5522 = vmatpush1.bf16.msra.mxu1 %v7347_v15  ;;  %4244 = vmatprep.mubr.f32.mxu1 %v6181_v3 }
0x34a9   :  { %5524 = vmatprep.subr.bf16.mxu1 %v7349_v18 }
0x34ac   :  { %5526 = vmatpush1.bf16.msra.mxu1 %v7366_v50 }
0x34ad   :  { %5528 = vmatprep.subr.bf16.mxu1 %v7369_v57 }
0x34b0   :  { %5530 = vmatpush1.bf16.msra.mxu1 %v7386_v63 }
0x34b1   :  { %5532 = vmatprep.subr.bf16.mxu1 %v7389_v2 }
0x34b4   :  { %5534 = vmatpush1.bf16.msra.mxu1 %v7400_v26 }
0x34b5   :  { %5536 = vmatprep.subr.bf16.mxu1 %v7322_v48 }
0x357a   :  { %v4146_v37 = vpop.f32.mrb[22].mxu1 }
0x357b   :  { %v5649_v41 = vadd.f32 %v4146_v37, %v7429_v30  ;;  %v4148_v44 = vpop.f32.mrb[23].mxu1 }
0x357c   :  { %v5650_v38 = vadd.f32 %v4148_v44, %v7433_v4 }
0x357d   :  { %v4917_v14 = vmul.f32 -1.442695, %v5649_v41 }
0x357e   :  { %v4918_v46 = vmul.f32 -1.442695, %v5650_v38 }
0x357f   :  { %6115 = vpow2.f32 %v4917_v14 }
0x3580   :  { %6117 = vtanh.f32 %v5650_v38 }
0x3589   :  { %v6116_v39 = vpop.eup %6115 }
0x358a   :  { %v4159_v42 = vadd.f32 1.0, %v6116_v39  ;;  %v6118_v43 = vpop.eup %6117 }
0x358c   :  { %6119 = vrcp.f32 %v4159_v42 }
0x358d   :  { %6121 = vpow2.f32 %v4918_v46 }
0x3596   :  { %v6120_v54 = vpop.eup %6119 }
0x3597   :  { %v4167_v45 = vmul.f32 %v6120_v54, %v6118_v43  ;;  %v6122_v51 = vpop.eup %6121  ;;  %v4166_v52 = vmul.f32 %v6120_v54, %v4072_v33 }
0x3598   :  { %v4160_v5 = vadd.f32 1.0, %v6122_v51 }
0x3599   :  { %4169 = vrot.lane.b32.xlu0 %v4167_v45, %s6182_s3 }
0x359a   :  { %6123 = vrcp.f32 %v4160_v5 }
0x35a4   :  { %v6124_v59 = vpop.eup %6123 }
0x360b   :  { %v4170_v53 = vpop.permute.xlu0 %4169 }
0x360c   :  { %v4172_v56 = vadd.f32 %v4170_v53, %v4166_v52 }
0x360e   :  { %6125 = vtanh.f32 %v4172_v56 }
0x3618   :  { %v6126_v60 = vpop.eup %6125 }
0x3619   :  { %v4174_v16 = vmul.f32 %v6126_v60, %v6124_v59 }
0x361b   :  { %4176 = vrot.lane.b32.xlu1 %v4174_v16, %s6182_s3 }
0x368d   :  { %v4177_v61 = vpop.permute.xlu1 %4176 }
0x368e   :  { %4919 = vmatmul.mubr.msk.f32.vlgmr.msra.gmra.mrb[24].mxu1 %vm349_vm3, %v4177_v61 }
0x368f   :  { %5538 = vmatpush1.bf16.msra.mxu1 %v7347_v15  ;;  %4344 = vmatprep.mubr.f32.mxu1 %v6181_v3 }
0x3690   :  { %5540 = vmatprep.subr.bf16.mxu1 %v7349_v18 }
0x3693   :  { %5542 = vmatpush1.bf16.msra.mxu1 %v7366_v50 }
0x3694   :  { %5544 = vmatprep.subr.bf16.mxu1 %v7369_v57 }
0x3697   :  { %5546 = vmatpush1.bf16.msra.mxu1 %v7386_v63 }
0x3698   :  { %5548 = vmatprep.subr.bf16.mxu1 %v7389_v2 }
0x369b   :  { %5550 = vmatpush1.bf16.msra.mxu1 %v7400_v26 }
0x369c   :  { %5552 = vmatprep.subr.bf16.mxu1 %v7322_v48 }
0x3761   :  { %v4246_v0 = vpop.f32.mrb[24].mxu1 }
0x3762   :  { %v5651_v1 = vadd.f32 %v4246_v0, %v7429_v30  ;;  %v4248_v7 = vpop.f32.mrb[25].mxu1 }
0x3763   :  { %v5652_v8 = vadd.f32 %v4248_v7, %v7433_v4 }
0x3764   :  { %v4920_v17 = vmul.f32 -1.442695, %v5651_v1 }
0x3765   :  { %v4921_v40 = vmul.f32 -1.442695, %v5652_v8 }
0x3766   :  { %6127 = vpow2.f32 %v4920_v17 }
0x3767   :  { %6129 = vtanh.f32 %v5652_v8 }
0x3770   :  { %v6128_v9 = vpop.eup %6127 }
0x3771   :  { %v4259_v10 = vadd.f32 1.0, %v6128_v9  ;;  %v6130_v35 = vpop.eup %6129 }
0x3773   :  { %6131 = vrcp.f32 %v4259_v10 }
0x3774   :  { %6133 = vpow2.f32 %v4921_v40 }
0x377d   :  { %v6132_v11 = vpop.eup %6131 }
0x377e   :  { %v4267_v55 = vmul.f32 %v6132_v11, %v6130_v35  ;;  %v6134_v12 = vpop.eup %6133  ;;  %v4266_v19 = vmul.f32 %v6132_v11, %v4172_v56 }
0x377f   :  { %v4260_v13 = vadd.f32 1.0, %v6134_v12 }
0x3780   :  { %4269 = vrot.lane.b32.xlu0 %v4267_v55, %s6182_s3 }
0x3781   :  { %6135 = vrcp.f32 %v4260_v13 }
0x378b   :  { %v6136_v22 = vpop.eup %6135 }
0x37f2   :  { %v4270_v20 = vpop.permute.xlu0 %4269 }
0x37f3   :  { %v4272_v21 = vadd.f32 %v4270_v20, %v4266_v19 }
0x37f5   :  { %6137 = vtanh.f32 %v4272_v21 }
0x37ff   :  { %v6138_v58 = vpop.eup %6137 }
0x3800   :  { %v4274_v23 = vmul.f32 %v6138_v58, %v6136_v22  ;;  %v4621_v22 = vld [vmem:[%s7586_s14 + $0x10] sm:$0xff]  ;;  %v6183_v58 = vmov 0.0|0.0  }
0x3801   :  { %5583 = vmatprep.subr.bf16.mxu0 %v6183_v58 }
0x3802   :  { %4276 = vrot.lane.b32.xlu1 %v4274_v23, %s6182_s3 }
0x3874   :  { %v4277_v28 = vpop.permute.xlu1 %4276 }
0x3875   :  { %4922 = vmatmul.mubr.msk.f32.vlgmr.msra.gmra.mrb[26].mxu1 %vm349_vm3, %v4277_v28  ;;  %v4622_v28 = vld [vmem:[%s7586_s14 + $0x18] sm:$0xff] }
0x3876   :  { %5554 = vmatpush1.bf16.msra.mxu1 %v7347_v15  ;;  %4444 = vmatprep.mubr.f32.mxu1 %v6181_v3 }
0x3877   :  { %5556 = vmatprep.subr.bf16.mxu1 %v7349_v18 }
0x387a   :  { %5558 = vmatpush1.bf16.msra.mxu1 %v7366_v50 }
0x387b   :  { %5560 = vmatprep.subr.bf16.mxu1 %v7369_v57 }
0x387e   :  { %5562 = vmatpush1.bf16.msra.mxu1 %v7386_v63 }
0x387f   :  { %5564 = vmatprep.subr.bf16.mxu1 %v7389_v2 }
0x3882   :  { %5566 = vmatpush1.bf16.msra.mxu1 %v7400_v26 }
0x3883   :  { %5568 = vmatprep.subr.bf16.mxu1 %v7322_v48 }
0x3948   :  { %v4346_v62 = vpop.f32.mrb[26].mxu1 }
0x3949   :  { %v5653_v24 = vadd.f32 %v4346_v62, %v7429_v30  ;;  %v4348_v25 = vpop.f32.mrb[27].mxu1  ;;  %v5587_v62 = vpack.c.bf16 %v4622_v28, %v4621_v22 }
0x394a   :  { %v5654_v31 = vadd.f32 %v4348_v25, %v7433_v4  ;;  %v4624_v25 = vld [vmem:[%s7586_s14 + $0x28] sm:$0xff] }
0x394b   :  { %v4923_v27 = vmul.f32 -1.442695, %v5653_v24  ;;  %v4623_v24 = vld [vmem:[%s7586_s14 + $0x20] sm:$0xff] }
0x394c   :  { %v4924_v29 = vmul.f32 -1.442695, %v5654_v31 }
0x394d   :  { %6139 = vpow2.f32 %v4923_v27  ;;  %v5590_v27 = vpack.c.bf16 %v4624_v25, %v4623_v24 }
0x394e   :  { %6141 = vtanh.f32 %v5654_v31  ;;  %v4625_v31 = vld [vmem:[%s7586_s14 + $0x30] sm:$0xff] }
0x3957   :  { %v6140_v32 = vpop.eup %6139 }
0x3958   :  { %v4359_v49 = vadd.f32 1.0, %v6140_v32  ;;  %v6142_v33 = vpop.eup %6141 }
0x395a   :  { %6143 = vrcp.f32 %v4359_v49 }
0x395b   :  { %6145 = vpow2.f32 %v4924_v29 }
0x3964   :  { %v6144_v36 = vpop.eup %6143 }
0x3965   :  { %v4367_v6 = vmul.f32 %v6144_v36, %v6142_v33  ;;  %v6146_v48 = vpop.eup %6145  ;;  %v4366_v37 = vmul.f32 %v6144_v36, %v4272_v21  ;;  %v4620_v21 = vld [vmem:[%s7586_s14 + $0x8] sm:$0xff] }
0x3966   :  { %v4360_v34 = vadd.f32 1.0, %v6146_v48 }
0x3967   :  { %4369 = vrot.lane.b32.xlu0 %v4367_v6, %s6182_s3  ;;  %v4933_v6 = vld [vmem:[%s7587_s13 + $0x3] sm:$0x1] }
0x3968   :  { %6147 = vrcp.f32 %v4360_v34  ;;  %v4596_v29 = vadd.f32 1e-05, %v4933_v6 }
0x3972   :  { %v6148_v14 = vpop.eup %6147 }
0x39d9   :  { %v4370_v41 = vpop.permute.xlu0 %4369 }
0x39da   :  { %v4372_v44 = vadd.f32 %v4370_v41, %v4366_v37  ;;  %v4934_v41 = vld [vmem:[%s7587_s13 + $0x2] ss:$0 sm:$0xff] }
0x39dc   :  { %6149 = vtanh.f32 %v4372_v44 }
0x39e6   :  { %v6150_v38 = vpop.eup %6149 }
0x39e7   :  { %v4374_v39 = vmul.f32 %v6150_v38, %v6148_v14 }
0x39e9   :  { %4376 = vrot.lane.b32.xlu1 %v4374_v39, %s6182_s3  ;;  %v4935_v39 = vld [vmem:[%s7587_s13] ss:$0 sm:$0xff] }
0x3a5b   :  { %v4377_v42 = vpop.permute.xlu1 %4376 }
0x3a5c   :  { %4925 = vmatmul.mubr.msk.f32.vlgmr.msra.gmra.mrb[28].mxu1 %vm349_vm3, %v4377_v42 }
0x3a5d   :  { %5570 = vmatpush1.bf16.msra.mxu1 %v7347_v15  ;;  %4544 = vmatprep.mubr.f32.mxu1 %v6181_v3  ;;  %v4626_v3 = vld [vmem:[%s7586_s14 + $0x38] sm:$0xff] }
0x3a5e   :  { %5572 = vmatprep.subr.bf16.mxu1 %v7349_v18  ;;  %v5593_v36 = vpack.c.bf16 %v4626_v3, %v4625_v31 }
0x3a61   :  { %5574 = vmatpush1.bf16.msra.mxu1 %v7366_v50 }
0x3a62   :  { %5576 = vmatprep.subr.bf16.mxu1 %v7369_v57 }
0x3a65   :  { %5578 = vmatpush1.bf16.msra.mxu1 %v7386_v63 }
0x3a66   :  { %5580 = vmatprep.subr.bf16.mxu1 %v7389_v2 }
0x3a69   :  { %5582 = vmatpush1.bf16.msra.mxu1 %v7400_v26 }
0x3b2f   :  { %v4446_v43 = vpop.f32.mrb[28].mxu1 }
0x3b30   :  { %v5655_v54 = vadd.f32 %v4446_v43, %v7429_v30  ;;  %v4448_v45 = vpop.f32.mrb[29].mxu1  ;;  %v4936_v43 = vld [vmem:[%s7587_s13 + $0x1] ss:$0 sm:$0xff] }
0x3b31   :  { %v5656_v15 = vadd.f32 %v4448_v45, %v7433_v4 }
0x3b32   :  { %v4926_v46 = vmul.f32 -1.442695, %v5655_v54 }
0x3b33   :  { %v4927_v63 = vmul.f32 -1.442695, %v5656_v15 }
0x3b34   :  { %6151 = vpow2.f32 %v4926_v46  ;;  %v4937_v46 = vld [vmem:[%s7588_s15] ss:$0 sm:$0xff] }
0x3b35   :  { %6153 = vtanh.f32 %v5656_v15 }
0x3b3e   :  { %v6152_v51 = vpop.eup %6151 }
0x3b3f   :  { %v4459_v18 = vadd.f32 1.0, %v6152_v51  ;;  %v6154_v50 = vpop.eup %6153 }
0x3b41   :  { %6155 = vrcp.f32 %v4459_v18 }
0x3b42   :  { %6157 = vpow2.f32 %v4927_v63 }
0x3b4b   :  { %v6156_v57 = vpop.eup %6155 }
0x3b4c   :  { %v4467_v5 = vmul.f32 %v6156_v57, %v6154_v50  ;;  %v6158_v2 = vpop.eup %6157  ;;  %v4466_v52 = vmul.f32 %v6156_v57, %v4372_v44 }
0x3b4d   :  { %v4460_v26 = vadd.f32 1.0, %v6158_v2 }
0x3b4e   :  { %4469 = vrot.lane.b32.xlu0 %v4467_v5, %s6182_s3 }
0x3b4f   :  { %6159 = vrcp.f32 %v4460_v26 }
0x3b59   :  { %v6160_v59 = vpop.eup %6159 }
0x3bc0   :  { %v4470_v53 = vpop.permute.xlu0 %4469 }
0x3bc1   :  { %v4472_v56 = vadd.f32 %v4470_v53, %v4466_v52 }
0x3bc3   :  { %6161 = vtanh.f32 %v4472_v56 }
0x3bcd   :  { %v6162_v60 = vpop.eup %6161 }
0x3bce   :  { %v4474_v16 = vmul.f32 %v6162_v60, %v6160_v59 }
0x3bd0   :  { %4476 = vrot.lane.b32.xlu1 %v4474_v16, %s6182_s3 }
0x3c42   :  { %v4477_v61 = vpop.permute.xlu1 %4476 }
0x3c43   :  { %4928 = vmatmul.mubr.msk.f32.vlgmr.msra.gmra.mrb[30].mxu1 %vm349_vm3, %v4477_v61 }
0x3d16   :  { %v4546_v0 = vpop.f32.mrb[30].mxu1 }
0x3d17   :  { %v5657_v1 = vadd.f32 %v4546_v0, %v7429_v30  ;;  %v4548_v7 = vpop.f32.mrb[31].mxu1 }
0x3d18   :  { %v5658_v8 = vadd.f32 %v4548_v7, %v7433_v4  ;;  %v4619_v4 = vld [vmem:[%s7586_s14] sm:$0xff] }
0x3d19   :  { %v4929_v17 = vmul.f32 -1.442695, %v5657_v1  ;;  %v5584_v23 = vpack.c.bf16 %v4620_v21, %v4619_v4 }
0x3d1a   :  { %v4930_v40 = vmul.f32 -1.442695, %v5658_v8 }
0x3d1b   :  { %6163 = vpow2.f32 %v4929_v17  ;;  %5585 = vmatpush3.bf16.msra.mxu0 %v5584_v23 }
0x3d1c   :  { %6165 = vtanh.f32 %v5658_v8  ;;  %5586 = vmatprep.subr.bf16.mxu0 %v6183_v58 }
0x3d1f   :  { %5588 = vmatpush3.bf16.msra.mxu0 %v5587_v62 }
0x3d20   :  { %5589 = vmatprep.subr.bf16.mxu0 %v6183_v58 }
0x3d23   :  { %5591 = vmatpush3.bf16.msra.mxu0 %v5590_v27 }
0x3d24   :  { %5592 = vmatprep.subr.bf16.mxu0 %v6183_v58 }
0x3d25   :  { %v6164_v9 = vpop.eup %6163 }
0x3d26   :  { %v4559_v10 = vadd.f32 1.0, %v6164_v9  ;;  %v6166_v35 = vpop.eup %6165 }
0x3d27   :  { %5594 = vmatpush3.bf16.msra.mxu0 %v5593_v36 }
0x3d28   :  { %6167 = vrcp.f32 %v4559_v10 }
0x3d29   :  { %6169 = vpow2.f32 %v4930_v40 }
0x3d32   :  { %v6168_v11 = vpop.eup %6167 }
0x3d33   :  { %v4567_v55 = vmul.f32 %v6168_v11, %v6166_v35  ;;  %v6170_v12 = vpop.eup %6169  ;;  %v4566_v19 = vmul.f32 %v6168_v11, %v4472_v56 }
0x3d34   :  { %v4560_v13 = vadd.f32 1.0, %v6170_v12 }
0x3d35   :  { %4569 = vrot.lane.b32.xlu0 %v4567_v55, %s6182_s3 }
0x3d36   :  { %6171 = vrcp.f32 %v4560_v13 }
0x3d40   :  { %v6172_v32 = vpop.eup %6171 }
0x3da7   :  { %v4570_v30 = vpop.permute.xlu0 %4569 }
0x3da8   :  { %v4572_v20 = vadd.f32 %v4570_v30, %v4566_v19 }
0x3daa   :  { %6173 = vtanh.f32 %v4572_v20 }
0x3dab   :  { %6175 = vrsqrt.f32 %v4596_v29 }
0x3db4   :  { %v6174_v49 = vpop.eup %6173 }
0x3db5   :  { %v4574_v33 = vmul.f32 %v6174_v49, %v6172_v32  ;;  %v6176_v34 = vpop.eup %6175 }
0x3db6   :  { %v4602_v14 = vrot.slane %v6176_v34, %v6435_v47 }
0x3db7   :  { %4576 = vrot.lane.b32.xlu1 %v4574_v33, %s6182_s3 }
0x3e29   :  { %v4577_v48 = vpop.permute.xlu1 %4576 }
0x3e2a   :  { %4579 = vst.msk [vmem:[#allocation2 + $0x38] sm:$0xff] %vm452_vm1, %v4577_v48 }
0x3e31   :  { %v4580_v37 = vld [vmem:[#allocation2 + $0x38] sm:$0xff] }
0x3e32   :  { %v4581_v44 = vmax.f32 %v4580_v37, 0.0 }
0x3e34   :  { %v4595_v38 = vsub.f32 %v4581_v44, %v4934_v41 }
0x3e36   :  { %v4604_v42 = vmul.f32 %v4602_v14, %v4595_v38 }
0x3e38   :  { %v4611_v54 = vmul.f32 %v4935_v39, %v4604_v42 }
0x3e3a   :  { %v4618_v45 = vadd.f32 %v4936_v43, %v4611_v54 }
0x3e3c   :  { %4965 = vmatmul.mubr.msk.f32.vlgmr.msra.gmra.mrb[32].mxu0 %vm349_vm3, %v4618_v45 }
0x3f0f   :  { %v4703_v15 = vpop.f32.mrb[32].mxu0 }
0x3f10   :  { %v4704_v47 = vadd.f32 %v4937_v46, %v4703_v15  ;;  %v4966_v51 = vpop.f32.mrb[33].mxu0 }
0x3f12   :  { %4707 = vmax.xlane.f32.xlu0 %v4704_v47 }
0x3f9f   :  { %v4708_v18 = vpop.xlane.xlu0 %4707 }
0x3fa0   :  { %v4709_v50 = vsub.f32 %v4704_v47, %v4708_v18 }
0x3fa2   :  { %v4710_v57 = vmul.f32 1.442695, %v4709_v50 }
0x3fa4   :  { %6177 = vpow2.f32 %v4710_v57 }
0x3fae   :  { %v6178_v5 = vpop.eup %6177 }
0x3faf   :  { %4712 = vadd.xlane.f32.xlu1 %v6178_v5 }
0x403c   :  { %v4713_v63 = vpop.xlane.xlu1 %4712 }
0x403d   :  { %6179 = vlog2.f32 %v4713_v63 }
0x4047   :  { %v6180_v2 = vpop.eup %6179 }
0x4048   :  { %v4715_v26 = vmul.f32 0.6931472, %v6180_v2 }
0x404a   :  { %v4716_v52 = vadd.f32 %v4715_v26, %v4708_v18 }
0x404c   :  { %v4717_v53 = vsub.f32 %v4704_v47, %v4716_v52 }
0x404e   :  { %4718 = vst [vmem:[%s7589_s16] sm:$0xff] %v4717_v53 }

</bundles_post_ra>
